<compile_context>
chip_gen: v7x
topology: tpu7x:2x2x1
jax: 0.10.0
libtpu: 0.0.40
codegen_flags: <defaults>
</compile_context>

<pallas_src>
import functools

import jax
import jax.numpy as jnp
from jax.experimental import pallas as pl
from jax.experimental.pallas import tpu as pltpu

EPS = 1e-6


def _round_up(x, m):
    return (x + m - 1) // m * m


# ----------------------------------------------------------------------------
# Pallas kernel: row-tiled matmul with fused bias epilogue.
#   A: (M, K) f32   W: (K, N) f32   bias: (1, N) f32  ->  (M, N) f32
# K and N are small here, so they are kept as full-extent blocks (exempt from
# the (8,128) divisibility rule); only M is tiled / padded (to the sublane).
# ----------------------------------------------------------------------------
def _matmul_bias_kernel(a_ref, w_ref, b_ref, o_ref):
    o_ref[...] = (jnp.dot(a_ref[...], w_ref[...],
                          preferred_element_type=jnp.float32)
                  + b_ref[...]).astype(o_ref.dtype)


def matmul_bias_pallas(a, w, bias2d):
    M, K = a.shape
    K2, N = w.shape
    assert K == K2 and bias2d.shape == (1, N)
    # 128-row tiles when there is enough work (M=512 -> 4 parallel tiles);
    # otherwise a single sublane-rounded tile.  f32 kept everywhere (v5e has no
    # bf16 VPU for the epilogue; shapes here are far from MXU-bound anyway).
    tm = 128 if M >= 128 else _round_up(M, 8)
    Mp = _round_up(M, tm)
    if Mp != M:
        a = jnp.pad(a, ((0, Mp - M), (0, 0)))
    out = pl.pallas_call(
        _matmul_bias_kernel,
        out_shape=jax.ShapeDtypeStruct((Mp, N), jnp.float32),
        grid_spec=pltpu.PrefetchScalarGridSpec(
            num_scalar_prefetch=0,
            grid=(Mp // tm,),
            in_specs=[pl.BlockSpec((tm, K), lambda i: (i, 0)),
                      pl.BlockSpec((K, N), lambda i: (0, 0)),
                      pl.BlockSpec((1, N), lambda i: (0, 0))],
            out_specs=pl.BlockSpec((tm, N), lambda i: (i, 0))),
        compiler_params=pltpu.CompilerParams(
            dimension_semantics=("parallel",)),
    )(a, w, bias2d)
    if Mp != M:
        out = out[:M]
    return out


# ----------------------------------------------------------------------------
# Channels-last im2col (identity for 1x1) + fused conv wrapper
# ----------------------------------------------------------------------------
def _im2col_nhwc(x, k, stride, pad):
    """x: (B, H, W, C) -> (B, Ho, Wo, k*k*C); feature order (kh, kw, C)."""
    if k == 1 and stride == 1 and pad == 0:
        return x                      # 1x1 conv: activations are the patches
    B, H, W, C = x.shape
    xp = jnp.pad(x, ((0, 0), (pad, pad), (pad, pad), (0, 0)))
    Ho = (H + 2 * pad - k) // stride + 1
    Wo = (W + 2 * pad - k) // stride + 1
    cols = []
    for dh in range(k):
        for dw in range(k):
            cols.append(xp[:, dh:dh + (Ho - 1) * stride + 1:stride,
                           dw:dw + (Wo - 1) * stride + 1:stride, :])
    return jnp.concatenate(cols, axis=-1)


def fused_conv(x, Wm, bias2d, k, stride, pad):
    """x: (B, H, W, Cin), Wm: (k*k*Cin, Nout) -> (B, Ho, Wo, Nout)."""
    A4 = _im2col_nhwc(x, k, stride, pad)
    B, Ho, Wo, K = A4.shape
    out = matmul_bias_pallas(A4.reshape(B * Ho * Wo, K), Wm, bias2d)
    return out.reshape(B, Ho, Wo, -1)


# ----------------------------------------------------------------------------
# Parameter initialization (deterministic, xavier_uniform like the module)
# ----------------------------------------------------------------------------
class ParamGen:
    def __init__(self, seed=0):
        self.key = jax.random.PRNGKey(seed)
        self.i = 0

    def _next(self):
        self.i += 1
        return jax.random.fold_in(self.key, self.i)

    def conv(self, cout, cin, k):
        fan_in, fan_out = cin * k * k, cout * k * k
        limit = (6.0 / (fan_in + fan_out)) ** 0.5
        return jax.random.uniform(self._next(), (cout, cin, k, k),
                                  jnp.float32, -limit, limit)


def _to_mat(w):
    """(Cout, Cin, k, k) torch-layout conv weight -> (k*k*Cin, Cout)."""
    cout, cin, k, _ = w.shape
    return w.transpose(2, 3, 1, 0).reshape(k * k * cin, cout)


# ----------------------------------------------------------------------------
# Capsule building blocks (channels-last: a=(B,H,W,N), v=(B,H,W,N,D))
# ----------------------------------------------------------------------------
def _squash(v, axis=-1, eps=EPS):
    sq = jnp.sum(v * v, axis=axis, keepdims=True)
    return (sq / (1.0 + sq)) * v / jnp.sqrt(sq + eps)


def init_primary(pg, in_ch, out_caps, k=3):
    n, d = out_caps
    w_pose = pg.conv(n * d, in_ch, k)
    w_act = pg.conv(n, in_ch, k)
    # Pose and activation heads share the same input -> fuse along N.
    Wm = jnp.concatenate([_to_mat(w_pose), _to_mat(w_act)], axis=1)
    return {'Wm': Wm,
            'b': jnp.zeros((1, n * d + n), jnp.float32),
            'caps': (n, d), 'k': k, 'pad': (k - 1) // 2}


def primary_forward(p, x):
    n, d = p['caps']
    out = fused_conv(x, p['Wm'], p['b'], p['k'], 1, p['pad'])
    B, Ho, Wo, _ = out.shape
    v = out[..., :n * d].reshape(B, Ho, Wo, n, d)
    a = jax.nn.sigmoid(out[..., n * d:])
    return a, v


def init_capsule_block(pg, in_caps, out_caps, kernel_size=3, stride=1):
    ni, di = in_caps
    no, do = out_caps
    k = kernel_size
    pad = (k - 1) // 2
    w_pose = pg.conv(no * do, ni * di, k)   # pose conv: poses -> poses
    w_act = pg.conv(no, ni, k)              # act  conv: acts  -> acts
    # Fuse both convs into one matmul over the concatenated [poses, acts]
    # input channels via a block-diagonal weight (built once, at init time).
    c_in = ni * di + ni
    n_out = no * do + no
    Wcat = jnp.zeros((k, k, c_in, n_out), jnp.float32)
    Wcat = Wcat.at[:, :, :ni * di, :no * do].set(w_pose.transpose(2, 3, 1, 0))
    Wcat = Wcat.at[:, :, ni * di:, no * do:].set(w_act.transpose(2, 3, 1, 0))
    return {
        'Wm': Wcat.reshape(k * k * c_in, n_out),
        'b': jnp.zeros((1, n_out), jnp.float32),
        'bn_v_gamma': jnp.ones((no, do), jnp.float32),
        'bn_v_beta': jnp.zeros((no, do), jnp.float32),
        'bn_a_gamma': jnp.ones((no,), jnp.float32),
        'bn_a_beta': jnp.zeros((no,), jnp.float32),
        'bn1_gamma': jnp.ones((no,), jnp.float32),
        'bn1_beta': jnp.zeros((no,), jnp.float32),
        'cfg': ((ni, di), (no, do), k, stride, pad),
    }


def capsule_block_forward(p, a, v):
    # TODO(synk): ConvCaps2d / ConvCapsBN / DirectRouting reference source was
    # not provided; this implements plausible capsule semantics in their place.
    (ni, di), (no, do), k, stride, pad = p['cfg']
    B, H, W = v.shape[0], v.shape[1], v.shape[2]

    # ConvCaps2d: one fused (pose + act) conv via im2col + Pallas matmul.
    x_cat = jnp.concatenate([v.reshape(B, H, W, ni * di), a], axis=-1)
    out = fused_conv(x_cat, p['Wm'], p['b'], k, stride, pad)
    _, Ho, Wo, _ = out.shape
    v_out = out[..., :no * do].reshape(B, Ho, Wo, no, do)
    a_out = out[..., no * do:]

    # ConvCapsBN: batch-stat normalization per (capsule, pose-dim) / capsule.
    mv = jnp.mean(v_out, axis=(0, 1, 2), keepdims=True)
    vv = jnp.var(v_out, axis=(0, 1, 2), keepdims=True)
    v_out = (v_out - mv) * jax.lax.rsqrt(vv + EPS)
    v_out = v_out * p['bn_v_gamma'] + p['bn_v_beta']
    ma = jnp.mean(a_out, axis=(0, 1, 2), keepdims=True)
    va = jnp.var(a_out, axis=(0, 1, 2), keepdims=True)
    a_out = (a_out - ma) * jax.lax.rsqrt(va + EPS)
    a_out = a_out * p['bn_a_gamma'] + p['bn_a_beta']

    # DirectRouting (iter_rout=1): squash poses, sigmoid activations.
    v_out = _squash(v_out, axis=-1)
    a_out = jax.nn.sigmoid(a_out)

    # BatchNorm3d(out_caps[0]) on poses, train-mode batch statistics.
    m1 = jnp.mean(v_out, axis=(0, 1, 2, 4), keepdims=True)
    v1 = jnp.var(v_out, axis=(0, 1, 2, 4), keepdims=True)
    v_out = (v_out - m1) * jax.lax.rsqrt(v1 + 1e-5)
    v_out = (v_out * p['bn1_gamma'][None, None, None, :, None]
             + p['bn1_beta'][None, None, None, :, None])
    return a_out, v_out


def adapt_size(inputs, new_shape):
    a, v = inputs
    H, W = v.shape[1], v.shape[2]
    t0, t1 = new_shape
    d0 = (H - t0) // 2
    d1 = (W - t1) // 2
    a = a[:, d0:d0 + t0, d1:d1 + t1, :]
    v = v[:, d0:d0 + t0, d1:d1 + t1, :, :]
    return a, v


def capsule_concat(caps0, caps1):
    a0, v0 = caps0
    a1, v1 = caps1
    if v0.shape[1:3] != v1.shape[1:3]:
        t0 = min(v0.shape[1], v1.shape[1])
        t1 = min(v0.shape[2], v1.shape[2])
        a0, v0 = adapt_size([a0, v0], [t0, t1])
        a1, v1 = adapt_size([a1, v1], [t0, t1])
    a = jnp.concatenate([a0, a1], axis=-1)
    # TODO(synk): assumes both capsule groups share the pose dim D (true for
    # every configuration of this module), matching the original reshape path.
    v = jnp.concatenate([v0, v1], axis=3)
    return a, v


def upsample2x_nhwc(x):
    B, H, W, C = x.shape
    # TODO(synk): jax.image.resize bilinear differs slightly from
    # nn.Upsample(align_corners=False) at the borders.
    return jax.image.resize(x, (B, 2 * H, 2 * W, C), method='bilinear')


def init_up_block(pg, in_caps, out_caps, skip_in_c, skip_out_c, kernel_size=3):
    p = {'cb0': init_capsule_block(pg, [in_caps[0] + skip_out_c[0], in_caps[1]],
                                   out_caps, kernel_size, 1),
         'cb1': init_capsule_block(pg, out_caps, out_caps, 1, 1),
         'skip': skip_out_c[0] > 0}
    if p['skip']:
        p['skip_cb'] = init_capsule_block(pg, skip_in_c, skip_out_c, 1, 1)
    return p


def up_block_forward(p, x0, x1):
    a0, v0 = x0
    B, H, W, N, D = v0.shape
    a0 = upsample2x_nhwc(a0)
    v0 = upsample2x_nhwc(v0.reshape(B, H, W, N * D)).reshape(B, 2 * H, 2 * W, N, D)
    a1, v1 = x1
    if p['skip']:
        a1, v1 = capsule_block_forward(p['skip_cb'], a1, v1)
        a, v = capsule_concat((a0, v0), (a1, v1))
    else:
        a, v = adapt_size([a0, v0], [v1.shape[1], v1.shape[2]])
    a, v = capsule_block_forward(p['cb0'], a, v)
    a, v = capsule_block_forward(p['cb1'], a, v)
    return a, v


# ----------------------------------------------------------------------------
# SkipCapsule
# ----------------------------------------------------------------------------
def init_skip_capsule(pg, in_ch, out_ch, capsules, skip_capsules):
    scales = len(capsules)
    assert len(capsules) == len(skip_capsules)
    params = {'scales': scales,
              'primary': init_primary(pg, in_ch, capsules[0], k=3)}
    cur = capsules[0]
    caps = [cur] + list(capsules)
    down = []
    for i in range(scales):
        down.append({'cb0': init_capsule_block(pg, cur, caps[i + 1], 3, 2),
                     'cb1': init_capsule_block(pg, caps[i + 1], caps[i + 1], 1, 1)})
        cur = caps[i + 1]
    params['down'] = down
    up = []
    for i in range(scales):
        up.append(init_up_block(pg, cur, caps[-i - 1], caps[-i - 2],
                                skip_capsules[-i - 1], 3))
        cur = caps[-i - 1]
    params['up'] = up
    params['outc'] = init_capsule_block(pg, caps[0], [out_ch, 1], 1, 1)
    return params


def skip_capsule_forward(params, x0_nchw):
    # fbp_op is None in this configuration (op=None) -> no FBP pre-processing.
    x = jnp.transpose(x0_nchw, (0, 2, 3, 1))          # NCHW -> NHWC, once
    a, v = primary_forward(params['primary'], x)
    xs = [(a, v)]
    for i in range(params['scales']):
        a_t, v_t = xs[-1]
        a_t, v_t = capsule_block_forward(params['down'][i]['cb0'], a_t, v_t)
        a_t, v_t = capsule_block_forward(params['down'][i]['cb1'], a_t, v_t)
        xs.append((a_t, v_t))
    a, v = xs[-1]
    for i in range(params['scales']):
        a, v = up_block_forward(params['up'][i], (a, v), xs[-2 - i])
    a, v = capsule_block_forward(params['outc'], a, v)
    # Back to the PyTorch output convention.
    a_out = jnp.transpose(a, (0, 3, 1, 2))            # (B, out_ch, H, W)
    B, H, W, Nc, Dc = v.shape
    v_nchw = jnp.transpose(v, (0, 3, 4, 1, 2))        # (B, Nc, Dc, H, W)
    v_out = jax.nn.sigmoid(v_nchw.reshape(-1, Nc, H, W))
    return a_out, v_out


# ----------------------------------------------------------------------------
if __name__ == "__main__":
    # Small configuration: 2 scales, spatial 16x16, batch 2, single channel.
    in_ch, out_ch = 1, 1
    capsules = [[4, 2], [8, 2]]
    skip_capsules = [[2, 2], [2, 2]]

    pg = ParamGen(seed=0)
    params = init_skip_capsule(pg, in_ch, out_ch, capsules, skip_capsules)

    x = jax.random.normal(jax.random.PRNGKey(0), (2, in_ch, 16, 16), jnp.float32)

    fwd = jax.jit(functools.partial(skip_capsule_forward, params))
    a, v = fwd(x)
    jax.block_until_ready((a, v))

    assert a.shape == (2, 1, 16, 16), a.shape
    assert v.shape == (2, 1, 16, 16), v.shape
    assert bool(jnp.all(jnp.isfinite(a))) and bool(jnp.all(jnp.isfinite(v)))
    print("KERNEL_OK")
</pallas_src>

<mosaic_0001>
module attributes {stable_mosaic.version = 11 : i64} {
  func.func @_matmul_bias_kernel(%arg0: i32, %arg1: memref<128x9xf32, #tpu.memory_space<vmem>>, %arg2: memref<9x12xf32, #tpu.memory_space<vmem>>, %arg3: memref<1x12xf32, #tpu.memory_space<vmem>>, %arg4: memref<128x12xf32, #tpu.memory_space<vmem>>) attributes {dimension_semantics = [#tpu.dimension_semantics<parallel>], iteration_bounds = array<i64: 4>, scalar_prefetch = 0 : i64, scratch_operands = 0 : i64, tpu.core_type = #tpu.core_type<tc>, window_params = [{transform_indices = @transform_0, window_bounds = array<i64: 128, 9>}, {pipeline_mode = #tpu.pipeline_mode<synchronous>, transform_indices = @transform_1, window_bounds = array<i64: 9, 12>}, {pipeline_mode = #tpu.pipeline_mode<synchronous>, transform_indices = @transform_2, window_bounds = array<i64: 1, 12>}, {transform_indices = @transform_3, window_bounds = array<i64: 128, 12>}]} {
    %c0 = arith.constant 0 : index
    %c0_0 = arith.constant 0 : index
    %0 = vector.load %arg1[%c0, %c0_0] : memref<128x9xf32, #tpu.memory_space<vmem>>, vector<128x9xf32>
    %c0_1 = arith.constant 0 : index
    %c0_2 = arith.constant 0 : index
    %1 = vector.load %arg2[%c0_1, %c0_2] : memref<9x12xf32, #tpu.memory_space<vmem>>, vector<9x12xf32>
    %cst = arith.constant dense<0.000000e+00> : vector<128x12xf32>
    %2 = tpu.matmul %0, %1, %cst {dimension_numbers = #tpu.dot_dimension_numbers<[1], [0], [0], [1], [0, 0, 1, 1], [], []>} : vector<128x9xf32>, vector<9x12xf32>, vector<128x12xf32> -> vector<128x12xf32>
    %c0_3 = arith.constant 0 : index
    %c0_4 = arith.constant 0 : index
    %3 = vector.load %arg3[%c0_3, %c0_4] : memref<1x12xf32, #tpu.memory_space<vmem>>, vector<1x12xf32>
    %4 = vector.broadcast %3 : vector<1x12xf32> to vector<128x12xf32>
    %5 = arith.addf %2, %4 : vector<128x12xf32>
    %c0_5 = arith.constant 0 : index
    %c0_6 = arith.constant 0 : index
    %6 = vector.load %arg4[%c0_5, %c0_6] : memref<128x12xf32, #tpu.memory_space<vmem>>, vector<128x12xf32>
    tpu.vector_store %arg4[%c0_5, %c0_6], %5 {strides = array<i32>} : memref<128x12xf32, #tpu.memory_space<vmem>>, vector<128x12xf32>,
    return
  }
  func.func @transform_0(%arg0: i32) -> (i32, i32) {
    %c0_i32 = arith.constant 0 : i32
    %c0_i32_0 = arith.constant 0 : i32
    return %arg0, %c0_i32 : i32, i32
  }
  func.func @transform_1(%arg0: i32) -> (i32, i32) {
    %c0_i32 = arith.constant 0 : i32
    %c0_i32_0 = arith.constant 0 : i32
    %c0_i32_1 = arith.constant 0 : i32
    return %c0_i32, %c0_i32_0 : i32, i32
  }
  func.func @transform_2(%arg0: i32) -> (i32, i32) {
    %c0_i32 = arith.constant 0 : i32
    %c0_i32_0 = arith.constant 0 : i32
    %c0_i32_1 = arith.constant 0 : i32
    return %c0_i32, %c0_i32_0 : i32, i32
  }
  func.func @transform_3(%arg0: i32) -> (i32, i32) {
    %c0_i32 = arith.constant 0 : i32
    %c0_i32_0 = arith.constant 0 : i32
    return %arg0, %c0_i32 : i32, i32
  }
}

module attributes {stable_mosaic.version = 11 : i64} {
  func.func @_matmul_bias_kernel(%arg0: i32, %arg1: memref<128x12xf32, #tpu.memory_space<vmem>>, %arg2: memref<12x6xf32, #tpu.memory_space<vmem>>, %arg3: memref<1x6xf32, #tpu.memory_space<vmem>>, %arg4: memref<128x6xf32, #tpu.memory_space<vmem>>) attributes {dimension_semantics = [#tpu.dimension_semantics<parallel>], iteration_bounds = array<i64: 4>, scalar_prefetch = 0 : i64, scratch_operands = 0 : i64, tpu.core_type = #tpu.core_type<tc>, window_params = [{transform_indices = @transform_0, window_bounds = array<i64: 128, 12>}, {pipeline_mode = #tpu.pipeline_mode<synchronous>, transform_indices = @transform_1, window_bounds = array<i64: 12, 6>}, {pipeline_mode = #tpu.pipeline_mode<synchronous>, transform_indices = @transform_2, window_bounds = array<i64: 1, 6>}, {transform_indices = @transform_3, window_bounds = array<i64: 128, 6>}]} {
    %c0 = arith.constant 0 : index
    %c0_0 = arith.constant 0 : index
    %0 = vector.load %arg1[%c0, %c0_0] : memref<128x12xf32, #tpu.memory_space<vmem>>, vector<128x12xf32>
    %c0_1 = arith.constant 0 : index
    %c0_2 = arith.constant 0 : index
    %1 = vector.load %arg2[%c0_1, %c0_2] : memref<12x6xf32, #tpu.memory_space<vmem>>, vector<12x6xf32>
    %cst = arith.constant dense<0.000000e+00> : vector<128x6xf32>
    %2 = tpu.matmul %0, %1, %cst {dimension_numbers = #tpu.dot_dimension_numbers<[1], [0], [0], [1], [0, 0, 1, 1], [], []>} : vector<128x12xf32>, vector<12x6xf32>, vector<128x6xf32> -> vector<128x6xf32>
    %c0_3 = arith.constant 0 : index
    %c0_4 = arith.constant 0 : index
    %3 = vector.load %arg3[%c0_3, %c0_4] : memref<1x6xf32, #tpu.memory_space<vmem>>, vector<1x6xf32>
    %4 = vector.broadcast %3 : vector<1x6xf32> to vector<128x6xf32>
    %5 = arith.addf %2, %4 : vector<128x6xf32>
    %c0_5 = arith.constant 0 : index
    %c0_6 = arith.constant 0 : index
    %6 = vector.load %arg4[%c0_5, %c0_6] : memref<128x6xf32, #tpu.memory_space<vmem>>, vector<128x6xf32>
    tpu.vector_store %arg4[%c0_5, %c0_6], %5 {strides = array<i32>} : memref<128x6xf32, #tpu.memory_space<vmem>>, vector<128x6xf32>,
    return
  }
  func.func @transform_0(%arg0: i32) -> (i32, i32) {
    %c0_i32 = arith.constant 0 : i32
    %c0_i32_0 = arith.constant 0 : i32
    return %arg0, %c0_i32 : i32, i32
  }
  func.func @transform_1(%arg0: i32) -> (i32, i32) {
    %c0_i32 = arith.constant 0 : i32
    %c0_i32_0 = arith.constant 0 : i32
    %c0_i32_1 = arith.constant 0 : i32
    return %c0_i32, %c0_i32_0 : i32, i32
  }
  func.func @transform_2(%arg0: i32) -> (i32, i32) {
    %c0_i32 = arith.constant 0 : i32
    %c0_i32_0 = arith.constant 0 : i32
    %c0_i32_1 = arith.constant 0 : i32
    return %c0_i32, %c0_i32_0 : i32, i32
  }
  func.func @transform_3(%arg0: i32) -> (i32, i32) {
    %c0_i32 = arith.constant 0 : i32
    %c0_i32_0 = arith.constant 0 : i32
    return %arg0, %c0_i32 : i32, i32
  }
}

module attributes {stable_mosaic.version = 11 : i64} {
  func.func @_matmul_bias_kernel(%arg0: i32, %arg1: memref<128x108xf32, #tpu.memory_space<vmem>>, %arg2: memref<108x12xf32, #tpu.memory_space<vmem>>, %arg3: memref<1x12xf32, #tpu.memory_space<vmem>>, %arg4: memref<128x12xf32, #tpu.memory_space<vmem>>) attributes {dimension_semantics = [#tpu.dimension_semantics<parallel>], iteration_bounds = array<i64: 1>, scalar_prefetch = 0 : i64, scratch_operands = 0 : i64, tpu.core_type = #tpu.core_type<tc>, window_params = [{transform_indices = @transform_0, window_bounds = array<i64: 128, 108>}, {pipeline_mode = #tpu.pipeline_mode<synchronous>, transform_indices = @transform_1, window_bounds = array<i64: 108, 12>}, {pipeline_mode = #tpu.pipeline_mode<synchronous>, transform_indices = @transform_2, window_bounds = array<i64: 1, 12>}, {transform_indices = @transform_3, window_bounds = array<i64: 128, 12>}]} {
    %c0 = arith.constant 0 : index
    %c0_0 = arith.constant 0 : index
    %0 = vector.load %arg1[%c0, %c0_0] : memref<128x108xf32, #tpu.memory_space<vmem>>, vector<128x108xf32>
    %c0_1 = arith.constant 0 : index
    %c0_2 = arith.constant 0 : index
    %1 = vector.load %arg2[%c0_1, %c0_2] : memref<108x12xf32, #tpu.memory_space<vmem>>, vector<108x12xf32>
    %cst = arith.constant dense<0.000000e+00> : vector<128x12xf32>
    %2 = tpu.matmul %0, %1, %cst {dimension_numbers = #tpu.dot_dimension_numbers<[1], [0], [0], [1], [0, 0, 1, 1], [], []>} : vector<128x108xf32>, vector<108x12xf32>, vector<128x12xf32> -> vector<128x12xf32>
    %c0_3 = arith.constant 0 : index
    %c0_4 = arith.constant 0 : index
    %3 = vector.load %arg3[%c0_3, %c0_4] : memref<1x12xf32, #tpu.memory_space<vmem>>, vector<1x12xf32>
    %4 = vector.broadcast %3 : vector<1x12xf32> to vector<128x12xf32>
    %5 = arith.addf %2, %4 : vector<128x12xf32>
    %c0_5 = arith.constant 0 : index
    %c0_6 = arith.constant 0 : index
    %6 = vector.load %arg4[%c0_5, %c0_6] : memref<128x12xf32, #tpu.memory_space<vmem>>, vector<128x12xf32>
    tpu.vector_store %arg4[%c0_5, %c0_6], %5 {strides = array<i32>} : memref<128x12xf32, #tpu.memory_space<vmem>>, vector<128x12xf32>,
    return
  }
  func.func @transform_0(%arg0: i32) -> (i32, i32) {
    %c0_i32 = arith.constant 0 : i32
    %c0_i32_0 = arith.constant 0 : i32
    return %arg0, %c0_i32 : i32, i32
  }
  func.func @transform_1(%arg0: i32) -> (i32, i32) {
    %c0_i32 = arith.constant 0 : i32
    %c0_i32_0 = arith.constant 0 : i32
    %c0_i32_1 = arith.constant 0 : i32
    return %c0_i32, %c0_i32_0 : i32, i32
  }
  func.func @transform_2(%arg0: i32) -> (i32, i32) {
    %c0_i32 = arith.constant 0 : i32
    %c0_i32_0 = arith.constant 0 : i32
    %c0_i32_1 = arith.constant 0 : i32
    return %c0_i32, %c0_i32_0 : i32, i32
  }
  func.func @transform_3(%arg0: i32) -> (i32, i32) {
    %c0_i32 = arith.constant 0 : i32
    %c0_i32_0 = arith.constant 0 : i32
    return %arg0, %c0_i32 : i32, i32
  }
}

module attributes {stable_mosaic.version = 11 : i64} {
  func.func @_matmul_bias_kernel(%arg0: i32, %arg1: memref<128x12xf32, #tpu.memory_space<vmem>>, %arg2: memref<12x12xf32, #tpu.memory_space<vmem>>, %arg3: memref<1x12xf32, #tpu.memory_space<vmem>>, %arg4: memref<128x12xf32, #tpu.memory_space<vmem>>) attributes {dimension_semantics = [#tpu.dimension_semantics<parallel>], iteration_bounds = array<i64: 1>, scalar_prefetch = 0 : i64, scratch_operands = 0 : i64, tpu.core_type = #tpu.core_type<tc>, window_params = [{transform_indices = @transform_0, window_bounds = array<i64: 128, 12>}, {pipeline_mode = #tpu.pipeline_mode<synchronous>, transform_indices = @transform_1, window_bounds = array<i64: 12, 12>}, {pipeline_mode = #tpu.pipeline_mode<synchronous>, transform_indices = @transform_2, window_bounds = array<i64: 1, 12>}, {transform_indices = @transform_3, window_bounds = array<i64: 128, 12>}]} {
    %c0 = arith.constant 0 : index
    %c0_0 = arith.constant 0 : index
    %0 = vector.load %arg1[%c0, %c0_0] : memref<128x12xf32, #tpu.memory_space<vmem>>, vector<128x12xf32>
    %c0_1 = arith.constant 0 : index
    %c0_2 = arith.constant 0 : index
    %1 = vector.load %arg2[%c0_1, %c0_2] : memref<12x12xf32, #tpu.memory_space<vmem>>, vector<12x12xf32>
    %cst = arith.constant dense<0.000000e+00> : vector<128x12xf32>
    %2 = tpu.matmul %0, %1, %cst {dimension_numbers = #tpu.dot_dimension_numbers<[1], [0], [0], [1], [0, 0, 1, 1], [], []>} : vector<128x12xf32>, vector<12x12xf32>, vector<128x12xf32> -> vector<128x12xf32>
    %c0_3 = arith.constant 0 : index
    %c0_4 = arith.constant 0 : index
    %3 = vector.load %arg3[%c0_3, %c0_4] : memref<1x12xf32, #tpu.memory_space<vmem>>, vector<1x12xf32>
    %4 = vector.broadcast %3 : vector<1x12xf32> to vector<128x12xf32>
    %5 = arith.addf %2, %4 : vector<128x12xf32>
    %c0_5 = arith.constant 0 : index
    %c0_6 = arith.constant 0 : index
    %6 = vector.load %arg4[%c0_5, %c0_6] : memref<128x12xf32, #tpu.memory_space<vmem>>, vector<128x12xf32>
    tpu.vector_store %arg4[%c0_5, %c0_6], %5 {strides = array<i32>} : memref<128x12xf32, #tpu.memory_space<vmem>>, vector<128x12xf32>,
    return
  }
  func.func @transform_0(%arg0: i32) -> (i32, i32) {
    %c0_i32 = arith.constant 0 : i32
    %c0_i32_0 = arith.constant 0 : i32
    return %arg0, %c0_i32 : i32, i32
  }
  func.func @transform_1(%arg0: i32) -> (i32, i32) {
    %c0_i32 = arith.constant 0 : i32
    %c0_i32_0 = arith.constant 0 : i32
    %c0_i32_1 = arith.constant 0 : i32
    return %c0_i32, %c0_i32_0 : i32, i32
  }
  func.func @transform_2(%arg0: i32) -> (i32, i32) {
    %c0_i32 = arith.constant 0 : i32
    %c0_i32_0 = arith.constant 0 : i32
    %c0_i32_1 = arith.constant 0 : i32
    return %c0_i32, %c0_i32_0 : i32, i32
  }
  func.func @transform_3(%arg0: i32) -> (i32, i32) {
    %c0_i32 = arith.constant 0 : i32
    %c0_i32_0 = arith.constant 0 : i32
    return %arg0, %c0_i32 : i32, i32
  }
}

module attributes {stable_mosaic.version = 11 : i64} {
  func.func @_matmul_bias_kernel(%arg0: i32, %arg1: memref<32x108xf32, #tpu.memory_space<vmem>>, %arg2: memref<108x24xf32, #tpu.memory_space<vmem>>, %arg3: memref<1x24xf32, #tpu.memory_space<vmem>>, %arg4: memref<32x24xf32, #tpu.memory_space<vmem>>) attributes {dimension_semantics = [#tpu.dimension_semantics<parallel>], iteration_bounds = array<i64: 1>, scalar_prefetch = 0 : i64, scratch_operands = 0 : i64, tpu.core_type = #tpu.core_type<tc>, window_params = [{transform_indices = @transform_0, window_bounds = array<i64: 32, 108>}, {pipeline_mode = #tpu.pipeline_mode<synchronous>, transform_indices = @transform_1, window_bounds = array<i64: 108, 24>}, {pipeline_mode = #tpu.pipeline_mode<synchronous>, transform_indices = @transform_2, window_bounds = array<i64: 1, 24>}, {transform_indices = @transform_3, window_bounds = array<i64: 32, 24>}]} {
    %c0 = arith.constant 0 : index
    %c0_0 = arith.constant 0 : index
    %0 = vector.load %arg1[%c0, %c0_0] : memref<32x108xf32, #tpu.memory_space<vmem>>, vector<32x108xf32>
    %c0_1 = arith.constant 0 : index
    %c0_2 = arith.constant 0 : index
    %1 = vector.load %arg2[%c0_1, %c0_2] : memref<108x24xf32, #tpu.memory_space<vmem>>, vector<108x24xf32>
    %cst = arith.constant dense<0.000000e+00> : vector<32x24xf32>
    %2 = tpu.matmul %0, %1, %cst {dimension_numbers = #tpu.dot_dimension_numbers<[1], [0], [0], [1], [0, 0, 1, 1], [], []>} : vector<32x108xf32>, vector<108x24xf32>, vector<32x24xf32> -> vector<32x24xf32>
    %c0_3 = arith.constant 0 : index
    %c0_4 = arith.constant 0 : index
    %3 = vector.load %arg3[%c0_3, %c0_4] : memref<1x24xf32, #tpu.memory_space<vmem>>, vector<1x24xf32>
    %4 = vector.broadcast %3 : vector<1x24xf32> to vector<32x24xf32>
    %5 = arith.addf %2, %4 : vector<32x24xf32>
    %c0_5 = arith.constant 0 : index
    %c0_6 = arith.constant 0 : index
    %6 = vector.load %arg4[%c0_5, %c0_6] : memref<32x24xf32, #tpu.memory_space<vmem>>, vector<32x24xf32>
    tpu.vector_store %arg4[%c0_5, %c0_6], %5 {strides = array<i32>} : memref<32x24xf32, #tpu.memory_space<vmem>>, vector<32x24xf32>,
    return
  }
  func.func @transform_0(%arg0: i32) -> (i32, i32) {
    %c0_i32 = arith.constant 0 : i32
    %c0_i32_0 = arith.constant 0 : i32
    return %arg0, %c0_i32 : i32, i32
  }
  func.func @transform_1(%arg0: i32) -> (i32, i32) {
    %c0_i32 = arith.constant 0 : i32
    %c0_i32_0 = arith.constant 0 : i32
    %c0_i32_1 = arith.constant 0 : i32
    return %c0_i32, %c0_i32_0 : i32, i32
  }
  func.func @transform_2(%arg0: i32) -> (i32, i32) {
    %c0_i32 = arith.constant 0 : i32
    %c0_i32_0 = arith.constant 0 : i32
    %c0_i32_1 = arith.constant 0 : i32
    return %c0_i32, %c0_i32_0 : i32, i32
  }
  func.func @transform_3(%arg0: i32) -> (i32, i32) {
    %c0_i32 = arith.constant 0 : i32
    %c0_i32_0 = arith.constant 0 : i32
    return %arg0, %c0_i32 : i32, i32
  }
}

module attributes {stable_mosaic.version = 11 : i64} {
  func.func @_matmul_bias_kernel(%arg0: i32, %arg1: memref<32x24xf32, #tpu.memory_space<vmem>>, %arg2: memref<24x24xf32, #tpu.memory_space<vmem>>, %arg3: memref<1x24xf32, #tpu.memory_space<vmem>>, %arg4: memref<32x24xf32, #tpu.memory_space<vmem>>) attributes {dimension_semantics = [#tpu.dimension_semantics<parallel>], iteration_bounds = array<i64: 1>, scalar_prefetch = 0 : i64, scratch_operands = 0 : i64, tpu.core_type = #tpu.core_type<tc>, window_params = [{transform_indices = @transform_0, window_bounds = array<i64: 32, 24>}, {pipeline_mode = #tpu.pipeline_mode<synchronous>, transform_indices = @transform_1, window_bounds = array<i64: 24, 24>}, {pipeline_mode = #tpu.pipeline_mode<synchronous>, transform_indices = @transform_2, window_bounds = array<i64: 1, 24>}, {transform_indices = @transform_3, window_bounds = array<i64: 32, 24>}]} {
    %c0 = arith.constant 0 : index
    %c0_0 = arith.constant 0 : index
    %0 = vector.load %arg1[%c0, %c0_0] : memref<32x24xf32, #tpu.memory_space<vmem>>, vector<32x24xf32>
    %c0_1 = arith.constant 0 : index
    %c0_2 = arith.constant 0 : index
    %1 = vector.load %arg2[%c0_1, %c0_2] : memref<24x24xf32, #tpu.memory_space<vmem>>, vector<24x24xf32>
    %cst = arith.constant dense<0.000000e+00> : vector<32x24xf32>
    %2 = tpu.matmul %0, %1, %cst {dimension_numbers = #tpu.dot_dimension_numbers<[1], [0], [0], [1], [0, 0, 1, 1], [], []>} : vector<32x24xf32>, vector<24x24xf32>, vector<32x24xf32> -> vector<32x24xf32>
    %c0_3 = arith.constant 0 : index
    %c0_4 = arith.constant 0 : index
    %3 = vector.load %arg3[%c0_3, %c0_4] : memref<1x24xf32, #tpu.memory_space<vmem>>, vector<1x24xf32>
    %4 = vector.broadcast %3 : vector<1x24xf32> to vector<32x24xf32>
    %5 = arith.addf %2, %4 : vector<32x24xf32>
    %c0_5 = arith.constant 0 : index
    %c0_6 = arith.constant 0 : index
    %6 = vector.load %arg4[%c0_5, %c0_6] : memref<32x24xf32, #tpu.memory_space<vmem>>, vector<32x24xf32>
    tpu.vector_store %arg4[%c0_5, %c0_6], %5 {strides = array<i32>} : memref<32x24xf32, #tpu.memory_space<vmem>>, vector<32x24xf32>,
    return
  }
  func.func @transform_0(%arg0: i32) -> (i32, i32) {
    %c0_i32 = arith.constant 0 : i32
    %c0_i32_0 = arith.constant 0 : i32
    return %arg0, %c0_i32 : i32, i32
  }
  func.func @transform_1(%arg0: i32) -> (i32, i32) {
    %c0_i32 = arith.constant 0 : i32
    %c0_i32_0 = arith.constant 0 : i32
    %c0_i32_1 = arith.constant 0 : i32
    return %c0_i32, %c0_i32_0 : i32, i32
  }
  func.func @transform_2(%arg0: i32) -> (i32, i32) {
    %c0_i32 = arith.constant 0 : i32
    %c0_i32_0 = arith.constant 0 : i32
    %c0_i32_1 = arith.constant 0 : i32
    return %c0_i32, %c0_i32_0 : i32, i32
  }
  func.func @transform_3(%arg0: i32) -> (i32, i32) {
    %c0_i32 = arith.constant 0 : i32
    %c0_i32_0 = arith.constant 0 : i32
    return %arg0, %c0_i32 : i32, i32
  }
}

module attributes {stable_mosaic.version = 11 : i64} {
  func.func @_matmul_bias_kernel(%arg0: i32, %arg1: memref<128x12xf32, #tpu.memory_space<vmem>>, %arg2: memref<12x6xf32, #tpu.memory_space<vmem>>, %arg3: memref<1x6xf32, #tpu.memory_space<vmem>>, %arg4: memref<128x6xf32, #tpu.memory_space<vmem>>) attributes {dimension_semantics = [#tpu.dimension_semantics<parallel>], iteration_bounds = array<i64: 1>, scalar_prefetch = 0 : i64, scratch_operands = 0 : i64, tpu.core_type = #tpu.core_type<tc>, window_params = [{transform_indices = @transform_0, window_bounds = array<i64: 128, 12>}, {pipeline_mode = #tpu.pipeline_mode<synchronous>, transform_indices = @transform_1, window_bounds = array<i64: 12, 6>}, {pipeline_mode = #tpu.pipeline_mode<synchronous>, transform_indices = @transform_2, window_bounds = array<i64: 1, 6>}, {transform_indices = @transform_3, window_bounds = array<i64: 128, 6>}]} {
    %c0 = arith.constant 0 : index
    %c0_0 = arith.constant 0 : index
    %0 = vector.load %arg1[%c0, %c0_0] : memref<128x12xf32, #tpu.memory_space<vmem>>, vector<128x12xf32>
    %c0_1 = arith.constant 0 : index
    %c0_2 = arith.constant 0 : index
    %1 = vector.load %arg2[%c0_1, %c0_2] : memref<12x6xf32, #tpu.memory_space<vmem>>, vector<12x6xf32>
    %cst = arith.constant dense<0.000000e+00> : vector<128x6xf32>
    %2 = tpu.matmul %0, %1, %cst {dimension_numbers = #tpu.dot_dimension_numbers<[1], [0], [0], [1], [0, 0, 1, 1], [], []>} : vector<128x12xf32>, vector<12x6xf32>, vector<128x6xf32> -> vector<128x6xf32>
    %c0_3 = arith.constant 0 : index
    %c0_4 = arith.constant 0 : index
    %3 = vector.load %arg3[%c0_3, %c0_4] : memref<1x6xf32, #tpu.memory_space<vmem>>, vector<1x6xf32>
    %4 = vector.broadcast %3 : vector<1x6xf32> to vector<128x6xf32>
    %5 = arith.addf %2, %4 : vector<128x6xf32>
    %c0_5 = arith.constant 0 : index
    %c0_6 = arith.constant 0 : index
    %6 = vector.load %arg4[%c0_5, %c0_6] : memref<128x6xf32, #tpu.memory_space<vmem>>, vector<128x6xf32>
    tpu.vector_store %arg4[%c0_5, %c0_6], %5 {strides = array<i32>} : memref<128x6xf32, #tpu.memory_space<vmem>>, vector<128x6xf32>,
    return
  }
  func.func @transform_0(%arg0: i32) -> (i32, i32) {
    %c0_i32 = arith.constant 0 : i32
    %c0_i32_0 = arith.constant 0 : i32
    return %arg0, %c0_i32 : i32, i32
  }
  func.func @transform_1(%arg0: i32) -> (i32, i32) {
    %c0_i32 = arith.constant 0 : i32
    %c0_i32_0 = arith.constant 0 : i32
    %c0_i32_1 = arith.constant 0 : i32
    return %c0_i32, %c0_i32_0 : i32, i32
  }
  func.func @transform_2(%arg0: i32) -> (i32, i32) {
    %c0_i32 = arith.constant 0 : i32
    %c0_i32_0 = arith.constant 0 : i32
    %c0_i32_1 = arith.constant 0 : i32
    return %c0_i32, %c0_i32_0 : i32, i32
  }
  func.func @transform_3(%arg0: i32) -> (i32, i32) {
    %c0_i32 = arith.constant 0 : i32
    %c0_i32_0 = arith.constant 0 : i32
    return %arg0, %c0_i32 : i32, i32
  }
}

module attributes {stable_mosaic.version = 11 : i64} {
  func.func @_matmul_bias_kernel(%arg0: i32, %arg1: memref<128x270xf32, #tpu.memory_space<vmem>>, %arg2: memref<270x24xf32, #tpu.memory_space<vmem>>, %arg3: memref<1x24xf32, #tpu.memory_space<vmem>>, %arg4: memref<128x24xf32, #tpu.memory_space<vmem>>) attributes {dimension_semantics = [#tpu.dimension_semantics<parallel>], iteration_bounds = array<i64: 1>, scalar_prefetch = 0 : i64, scratch_operands = 0 : i64, tpu.core_type = #tpu.core_type<tc>, window_params = [{transform_indices = @transform_0, window_bounds = array<i64: 128, 270>}, {pipeline_mode = #tpu.pipeline_mode<synchronous>, transform_indices = @transform_1, window_bounds = array<i64: 270, 24>}, {pipeline_mode = #tpu.pipeline_mode<synchronous>, transform_indices = @transform_2, window_bounds = array<i64: 1, 24>}, {transform_indices = @transform_3, window_bounds = array<i64: 128, 24>}]} {
    %c0 = arith.constant 0 : index
    %c0_0 = arith.constant 0 : index
    %0 = vector.load %arg1[%c0, %c0_0] : memref<128x270xf32, #tpu.memory_space<vmem>>, vector<128x270xf32>
    %c0_1 = arith.constant 0 : index
    %c0_2 = arith.constant 0 : index
    %1 = vector.load %arg2[%c0_1, %c0_2] : memref<270x24xf32, #tpu.memory_space<vmem>>, vector<270x24xf32>
    %cst = arith.constant dense<0.000000e+00> : vector<128x24xf32>
    %2 = tpu.matmul %0, %1, %cst {dimension_numbers = #tpu.dot_dimension_numbers<[1], [0], [0], [1], [0, 0, 1, 1], [], []>} : vector<128x270xf32>, vector<270x24xf32>, vector<128x24xf32> -> vector<128x24xf32>
    %c0_3 = arith.constant 0 : index
    %c0_4 = arith.constant 0 : index
    %3 = vector.load %arg3[%c0_3, %c0_4] : memref<1x24xf32, #tpu.memory_space<vmem>>, vector<1x24xf32>
    %4 = vector.broadcast %3 : vector<1x24xf32> to vector<128x24xf32>
    %5 = arith.addf %2, %4 : vector<128x24xf32>
    %c0_5 = arith.constant 0 : index
    %c0_6 = arith.constant 0 : index
    %6 = vector.load %arg4[%c0_5, %c0_6] : memref<128x24xf32, #tpu.memory_space<vmem>>, vector<128x24xf32>
    tpu.vector_store %arg4[%c0_5, %c0_6], %5 {strides = array<i32>} : memref<128x24xf32, #tpu.memory_space<vmem>>, vector<128x24xf32>,
    return
  }
  func.func @transform_0(%arg0: i32) -> (i32, i32) {
    %c0_i32 = arith.constant 0 : i32
    %c0_i32_0 = arith.constant 0 : i32
    return %arg0, %c0_i32 : i32, i32
  }
  func.func @transform_1(%arg0: i32) -> (i32, i32) {
    %c0_i32 = arith.constant 0 : i32
    %c0_i32_0 = arith.constant 0 : i32
    %c0_i32_1 = arith.constant 0 : i32
    return %c0_i32, %c0_i32_0 : i32, i32
  }
  func.func @transform_2(%arg0: i32) -> (i32, i32) {
    %c0_i32 = arith.constant 0 : i32
    %c0_i32_0 = arith.constant 0 : i32
    %c0_i32_1 = arith.constant 0 : i32
    return %c0_i32, %c0_i32_0 : i32, i32
  }
  func.func @transform_3(%arg0: i32) -> (i32, i32) {
    %c0_i32 = arith.constant 0 : i32
    %c0_i32_0 = arith.constant 0 : i32
    return %arg0, %c0_i32 : i32, i32
  }
}

module attributes {stable_mosaic.version = 11 : i64} {
  func.func @_matmul_bias_kernel(%arg0: i32, %arg1: memref<128x24xf32, #tpu.memory_space<vmem>>, %arg2: memref<24x24xf32, #tpu.memory_space<vmem>>, %arg3: memref<1x24xf32, #tpu.memory_space<vmem>>, %arg4: memref<128x24xf32, #tpu.memory_space<vmem>>) attributes {dimension_semantics = [#tpu.dimension_semantics<parallel>], iteration_bounds = array<i64: 1>, scalar_prefetch = 0 : i64, scratch_operands = 0 : i64, tpu.core_type = #tpu.core_type<tc>, window_params = [{transform_indices = @transform_0, window_bounds = array<i64: 128, 24>}, {pipeline_mode = #tpu.pipeline_mode<synchronous>, transform_indices = @transform_1, window_bounds = array<i64: 24, 24>}, {pipeline_mode = #tpu.pipeline_mode<synchronous>, transform_indices = @transform_2, window_bounds = array<i64: 1, 24>}, {transform_indices = @transform_3, window_bounds = array<i64: 128, 24>}]} {
    %c0 = arith.constant 0 : index
    %c0_0 = arith.constant 0 : index
    %0 = vector.load %arg1[%c0, %c0_0] : memref<128x24xf32, #tpu.memory_space<vmem>>, vector<128x24xf32>
    %c0_1 = arith.constant 0 : index
    %c0_2 = arith.constant 0 : index
    %1 = vector.load %arg2[%c0_1, %c0_2] : memref<24x24xf32, #tpu.memory_space<vmem>>, vector<24x24xf32>
    %cst = arith.constant dense<0.000000e+00> : vector<128x24xf32>
    %2 = tpu.matmul %0, %1, %cst {dimension_numbers = #tpu.dot_dimension_numbers<[1], [0], [0], [1], [0, 0, 1, 1], [], []>} : vector<128x24xf32>, vector<24x24xf32>, vector<128x24xf32> -> vector<128x24xf32>
    %c0_3 = arith.constant 0 : index
    %c0_4 = arith.constant 0 : index
    %3 = vector.load %arg3[%c0_3, %c0_4] : memref<1x24xf32, #tpu.memory_space<vmem>>, vector<1x24xf32>
    %4 = vector.broadcast %3 : vector<1x24xf32> to vector<128x24xf32>
    %5 = arith.addf %2, %4 : vector<128x24xf32>
    %c0_5 = arith.constant 0 : index
    %c0_6 = arith.constant 0 : index
    %6 = vector.load %arg4[%c0_5, %c0_6] : memref<128x24xf32, #tpu.memory_space<vmem>>, vector<128x24xf32>
    tpu.vector_store %arg4[%c0_5, %c0_6], %5 {strides = array<i32>} : memref<128x24xf32, #tpu.memory_space<vmem>>, vector<128x24xf32>,
    return
  }
  func.func @transform_0(%arg0: i32) -> (i32, i32) {
    %c0_i32 = arith.constant 0 : i32
    %c0_i32_0 = arith.constant 0 : i32
    return %arg0, %c0_i32 : i32, i32
  }
  func.func @transform_1(%arg0: i32) -> (i32, i32) {
    %c0_i32 = arith.constant 0 : i32
    %c0_i32_0 = arith.constant 0 : i32
    %c0_i32_1 = arith.constant 0 : i32
    return %c0_i32, %c0_i32_0 : i32, i32
  }
  func.func @transform_2(%arg0: i32) -> (i32, i32) {
    %c0_i32 = arith.constant 0 : i32
    %c0_i32_0 = arith.constant 0 : i32
    %c0_i32_1 = arith.constant 0 : i32
    return %c0_i32, %c0_i32_0 : i32, i32
  }
  func.func @transform_3(%arg0: i32) -> (i32, i32) {
    %c0_i32 = arith.constant 0 : i32
    %c0_i32_0 = arith.constant 0 : i32
    return %arg0, %c0_i32 : i32, i32
  }
}

module attributes {stable_mosaic.version = 11 : i64} {
  func.func @_matmul_bias_kernel(%arg0: i32, %arg1: memref<128x270xf32, #tpu.memory_space<vmem>>, %arg2: memref<270x12xf32, #tpu.memory_space<vmem>>, %arg3: memref<1x12xf32, #tpu.memory_space<vmem>>, %arg4: memref<128x12xf32, #tpu.memory_space<vmem>>) attributes {dimension_semantics = [#tpu.dimension_semantics<parallel>], iteration_bounds = array<i64: 4>, scalar_prefetch = 0 : i64, scratch_operands = 0 : i64, tpu.core_type = #tpu.core_type<tc>, window_params = [{transform_indices = @transform_0, window_bounds = array<i64: 128, 270>}, {pipeline_mode = #tpu.pipeline_mode<synchronous>, transform_indices = @transform_1, window_bounds = array<i64: 270, 12>}, {pipeline_mode = #tpu.pipeline_mode<synchronous>, transform_indices = @transform_2, window_bounds = array<i64: 1, 12>}, {transform_indices = @transform_3, window_bounds = array<i64: 128, 12>}]} {
    %c0 = arith.constant 0 : index
    %c0_0 = arith.constant 0 : index
    %0 = vector.load %arg1[%c0, %c0_0] : memref<128x270xf32, #tpu.memory_space<vmem>>, vector<128x270xf32>
    %c0_1 = arith.constant 0 : index
    %c0_2 = arith.constant 0 : index
    %1 = vector.load %arg2[%c0_1, %c0_2] : memref<270x12xf32, #tpu.memory_space<vmem>>, vector<270x12xf32>
    %cst = arith.constant dense<0.000000e+00> : vector<128x12xf32>
    %2 = tpu.matmul %0, %1, %cst {dimension_numbers = #tpu.dot_dimension_numbers<[1], [0], [0], [1], [0, 0, 1, 1], [], []>} : vector<128x270xf32>, vector<270x12xf32>, vector<128x12xf32> -> vector<128x12xf32>
    %c0_3 = arith.constant 0 : index
    %c0_4 = arith.constant 0 : index
    %3 = vector.load %arg3[%c0_3, %c0_4] : memref<1x12xf32, #tpu.memory_space<vmem>>, vector<1x12xf32>
    %4 = vector.broadcast %3 : vector<1x12xf32> to vector<128x12xf32>
    %5 = arith.addf %2, %4 : vector<128x12xf32>
    %c0_5 = arith.constant 0 : index
    %c0_6 = arith.constant 0 : index
    %6 = vector.load %arg4[%c0_5, %c0_6] : memref<128x12xf32, #tpu.memory_space<vmem>>, vector<128x12xf32>
    tpu.vector_store %arg4[%c0_5, %c0_6], %5 {strides = array<i32>} : memref<128x12xf32, #tpu.memory_space<vmem>>, vector<128x12xf32>,
    return
  }
  func.func @transform_0(%arg0: i32) -> (i32, i32) {
    %c0_i32 = arith.constant 0 : i32
    %c0_i32_0 = arith.constant 0 : i32
    return %arg0, %c0_i32 : i32, i32
  }
  func.func @transform_1(%arg0: i32) -> (i32, i32) {
    %c0_i32 = arith.constant 0 : i32
    %c0_i32_0 = arith.constant 0 : i32
    %c0_i32_1 = arith.constant 0 : i32
    return %c0_i32, %c0_i32_0 : i32, i32
  }
  func.func @transform_2(%arg0: i32) -> (i32, i32) {
    %c0_i32 = arith.constant 0 : i32
    %c0_i32_0 = arith.constant 0 : i32
    %c0_i32_1 = arith.constant 0 : i32
    return %c0_i32, %c0_i32_0 : i32, i32
  }
  func.func @transform_3(%arg0: i32) -> (i32, i32) {
    %c0_i32 = arith.constant 0 : i32
    %c0_i32_0 = arith.constant 0 : i32
    return %arg0, %c0_i32 : i32, i32
  }
}

module attributes {stable_mosaic.version = 11 : i64} {
  func.func @_matmul_bias_kernel(%arg0: i32, %arg1: memref<128x12xf32, #tpu.memory_space<vmem>>, %arg2: memref<12x12xf32, #tpu.memory_space<vmem>>, %arg3: memref<1x12xf32, #tpu.memory_space<vmem>>, %arg4: memref<128x12xf32, #tpu.memory_space<vmem>>) attributes {dimension_semantics = [#tpu.dimension_semantics<parallel>], iteration_bounds = array<i64: 4>, scalar_prefetch = 0 : i64, scratch_operands = 0 : i64, tpu.core_type = #tpu.core_type<tc>, window_params = [{transform_indices = @transform_0, window_bounds = array<i64: 128, 12>}, {pipeline_mode = #tpu.pipeline_mode<synchronous>, transform_indices = @transform_1, window_bounds = array<i64: 12, 12>}, {pipeline_mode = #tpu.pipeline_mode<synchronous>, transform_indices = @transform_2, window_bounds = array<i64: 1, 12>}, {transform_indices = @transform_3, window_bounds = array<i64: 128, 12>}]} {
    %c0 = arith.constant 0 : index
    %c0_0 = arith.constant 0 : index
    %0 = vector.load %arg1[%c0, %c0_0] : memref<128x12xf32, #tpu.memory_space<vmem>>, vector<128x12xf32>
    %c0_1 = arith.constant 0 : index
    %c0_2 = arith.constant 0 : index
    %1 = vector.load %arg2[%c0_1, %c0_2] : memref<12x12xf32, #tpu.memory_space<vmem>>, vector<12x12xf32>
    %cst = arith.constant dense<0.000000e+00> : vector<128x12xf32>
    %2 = tpu.matmul %0, %1, %cst {dimension_numbers = #tpu.dot_dimension_numbers<[1], [0], [0], [1], [0, 0, 1, 1], [], []>} : vector<128x12xf32>, vector<12x12xf32>, vector<128x12xf32> -> vector<128x12xf32>
    %c0_3 = arith.constant 0 : index
    %c0_4 = arith.constant 0 : index
    %3 = vector.load %arg3[%c0_3, %c0_4] : memref<1x12xf32, #tpu.memory_space<vmem>>, vector<1x12xf32>
    %4 = vector.broadcast %3 : vector<1x12xf32> to vector<128x12xf32>
    %5 = arith.addf %2, %4 : vector<128x12xf32>
    %c0_5 = arith.constant 0 : index
    %c0_6 = arith.constant 0 : index
    %6 = vector.load %arg4[%c0_5, %c0_6] : memref<128x12xf32, #tpu.memory_space<vmem>>, vector<128x12xf32>
    tpu.vector_store %arg4[%c0_5, %c0_6], %5 {strides = array<i32>} : memref<128x12xf32, #tpu.memory_space<vmem>>, vector<128x12xf32>,
    return
  }
  func.func @transform_0(%arg0: i32) -> (i32, i32) {
    %c0_i32 = arith.constant 0 : i32
    %c0_i32_0 = arith.constant 0 : i32
    return %arg0, %c0_i32 : i32, i32
  }
  func.func @transform_1(%arg0: i32) -> (i32, i32) {
    %c0_i32 = arith.constant 0 : i32
    %c0_i32_0 = arith.constant 0 : i32
    %c0_i32_1 = arith.constant 0 : i32
    return %c0_i32, %c0_i32_0 : i32, i32
  }
  func.func @transform_2(%arg0: i32) -> (i32, i32) {
    %c0_i32 = arith.constant 0 : i32
    %c0_i32_0 = arith.constant 0 : i32
    %c0_i32_1 = arith.constant 0 : i32
    return %c0_i32, %c0_i32_0 : i32, i32
  }
  func.func @transform_3(%arg0: i32) -> (i32, i32) {
    %c0_i32 = arith.constant 0 : i32
    %c0_i32_0 = arith.constant 0 : i32
    return %arg0, %c0_i32 : i32, i32
  }
}

module attributes {stable_mosaic.version = 11 : i64} {
  func.func @_matmul_bias_kernel(%arg0: i32, %arg1: memref<128x12xf32, #tpu.memory_space<vmem>>, %arg2: memref<12x2xf32, #tpu.memory_space<vmem>>, %arg3: memref<1x2xf32, #tpu.memory_space<vmem>>, %arg4: memref<128x2xf32, #tpu.memory_space<vmem>>) attributes {dimension_semantics = [#tpu.dimension_semantics<parallel>], iteration_bounds = array<i64: 4>, scalar_prefetch = 0 : i64, scratch_operands = 0 : i64, tpu.core_type = #tpu.core_type<tc>, window_params = [{transform_indices = @transform_0, window_bounds = array<i64: 128, 12>}, {pipeline_mode = #tpu.pipeline_mode<synchronous>, transform_indices = @transform_1, window_bounds = array<i64: 12, 2>}, {pipeline_mode = #tpu.pipeline_mode<synchronous>, transform_indices = @transform_2, window_bounds = array<i64: 1, 2>}, {transform_indices = @transform_3, window_bounds = array<i64: 128, 2>}]} {
    %c0 = arith.constant 0 : index
    %c0_0 = arith.constant 0 : index
    %0 = vector.load %arg1[%c0, %c0_0] : memref<128x12xf32, #tpu.memory_space<vmem>>, vector<128x12xf32>
    %c0_1 = arith.constant 0 : index
    %c0_2 = arith.constant 0 : index
    %1 = vector.load %arg2[%c0_1, %c0_2] : memref<12x2xf32, #tpu.memory_space<vmem>>, vector<12x2xf32>
    %cst = arith.constant dense<0.000000e+00> : vector<128x2xf32>
    %2 = tpu.matmul %0, %1, %cst {dimension_numbers = #tpu.dot_dimension_numbers<[1], [0], [0], [1], [0, 0, 1, 1], [], []>} : vector<128x12xf32>, vector<12x2xf32>, vector<128x2xf32> -> vector<128x2xf32>
    %c0_3 = arith.constant 0 : index
    %c0_4 = arith.constant 0 : index
    %3 = vector.load %arg3[%c0_3, %c0_4] : memref<1x2xf32, #tpu.memory_space<vmem>>, vector<1x2xf32>
    %4 = vector.broadcast %3 : vector<1x2xf32> to vector<128x2xf32>
    %5 = arith.addf %2, %4 : vector<128x2xf32>
    %c0_5 = arith.constant 0 : index
    %c0_6 = arith.constant 0 : index
    %6 = vector.load %arg4[%c0_5, %c0_6] : memref<128x2xf32, #tpu.memory_space<vmem>>, vector<128x2xf32>
    tpu.vector_store %arg4[%c0_5, %c0_6], %5 {strides = array<i32>} : memref<128x2xf32, #tpu.memory_space<vmem>>, vector<128x2xf32>,
    return
  }
  func.func @transform_0(%arg0: i32) -> (i32, i32) {
    %c0_i32 = arith.constant 0 : i32
    %c0_i32_0 = arith.constant 0 : i32
    return %arg0, %c0_i32 : i32, i32
  }
  func.func @transform_1(%arg0: i32) -> (i32, i32) {
    %c0_i32 = arith.constant 0 : i32
    %c0_i32_0 = arith.constant 0 : i32
    %c0_i32_1 = arith.constant 0 : i32
    return %c0_i32, %c0_i32_0 : i32, i32
  }
  func.func @transform_2(%arg0: i32) -> (i32, i32) {
    %c0_i32 = arith.constant 0 : i32
    %c0_i32_0 = arith.constant 0 : i32
    %c0_i32_1 = arith.constant 0 : i32
    return %c0_i32, %c0_i32_0 : i32, i32
  }
  func.func @transform_3(%arg0: i32) -> (i32, i32) {
    %c0_i32 = arith.constant 0 : i32
    %c0_i32_0 = arith.constant 0 : i32
    return %arg0, %c0_i32 : i32, i32
  }
}

</mosaic_0001>

<bundles_post_ra>
// kernel: mul.330
= control target key start
LH: loop header
LB: loop body
LE: loop exit
PB: predicated region body
PF: predicated region fallthrough
CT: control target
= control target key end

     0   :  { %s154_s0 = inlined_call_operand.vmem [shape: f32[2,16,16,2], index: 0, kind: input, shape index: {}]   ;;  %s155_s1 = inlined_call_operand.vmem [shape: f32[2,16,16,2,2], index: 1, kind: output, shape index: {}]  }
   0x1   :  { %v4_v0 = vld [vmem:[%s154_s0] sm:$0xff]  ;;  %v52_v2 = vld [vmem:[%s154_s0 + $0x10] sm:$0xff]  ;;  %v60_v4 = vld [vmem:[%s154_s0 + $0x8] sm:$0xff] }
   0x2   :  { %v50_v1 = vld [vmem:[%s154_s0 + $0x20] sm:$0xff]  ;;  %5 = vst [vmem:[%s155_s1] sm:$0xff] %v4_v0  ;;  %53 = vst [vmem:[%s155_s1 + $0x20] sm:$0xff] %v52_v2  ;;  %v54_v3 = vld [vmem:[%s154_s0 + $0x30] sm:$0xff] }
   0x3   :  { %51 = vst [vmem:[%s155_s1 + $0x40] sm:$0xff] %v50_v1  ;;  %56 = vst [vmem:[%s155_s1 + $0x10] sm:$0xff] %v4_v0  ;;  %v62_v5 = vld [vmem:[%s154_s0 + $0x28] sm:$0xff]  ;;  %v64_v6 = vld [vmem:[%s154_s0 + $0x18] sm:$0xff] }
   0x4   :  { %57 = vst [vmem:[%s155_s1 + $0x50] sm:$0xff] %v50_v1  ;;  %58 = vst [vmem:[%s155_s1 + $0x30] sm:$0xff] %v52_v2  ;;  %v66_v7 = vld [vmem:[%s154_s0 + $0x38] sm:$0xff] }
   0x5   :  { %55 = vst [vmem:[%s155_s1 + $0x60] sm:$0xff] %v54_v3  ;;  %59 = vst [vmem:[%s155_s1 + $0x70] sm:$0xff] %v54_v3 }
   0x6   :  { %61 = vst [vmem:[%s155_s1 + $0x8] sm:$0xff] %v60_v4  ;;  %63 = vst [vmem:[%s155_s1 + $0x48] sm:$0xff] %v62_v5 }
   0x7   :  { %68 = vst [vmem:[%s155_s1 + $0x18] sm:$0xff] %v60_v4  ;;  %69 = vst [vmem:[%s155_s1 + $0x58] sm:$0xff] %v62_v5 }
   0x8   :  { %65 = vst [vmem:[%s155_s1 + $0x28] sm:$0xff] %v64_v6  ;;  %67 = vst [vmem:[%s155_s1 + $0x68] sm:$0xff] %v66_v7 }
   0x9   :  { %70 = vst [vmem:[%s155_s1 + $0x38] sm:$0xff] %v64_v6  ;;  %71 = vst [vmem:[%s155_s1 + $0x78] sm:$0xff] %v66_v7 }

// kernel: skip_capsule_forward.12
= control target key start
LH: loop header
LB: loop body
LE: loop exit
PB: predicated region body
PF: predicated region fallthrough
CT: control target
= control target key end

     0   :  { %s591_s12 = smov 0   ;;  %s674_s0 = inlined_call_operand.vmem [shape: f32[512,9], index: 0, kind: input, shape index: {}]   ;;  %s675_s1 = inlined_call_operand.vmem [shape: f32[9,12], index: 1, kind: input, shape index: {}]   ;;  %s676_s2 = inlined_call_operand.vmem [shape: f32[1,12], index: 2, kind: input, shape index: {}]   ;;  %s677_s3 = inlined_call_operand.vmem [shape: f32[512,12], index: 3, kind: output, shape index: {}]  }
   0x1 LB: > { %s470_s13 = sadd.s32 4294967295, %s568_s12   ;;  %p474_p0 = scmp.ge.s32.totalorder %s568_s12, 1  ;;  %s568_s12 = sphi %s591_s12, %s13_s12  }
   0x2   : > { %p138_p1 = scmp.lt.s32.totalorder %s568_s12, 5 }
   0x4   : > { %p139_p2 = pnand %p474_p0, %p138_p1 }
   0x5   : > { %v190_v0 = vld [vmem:[%s675_s1] sm:$0xff] (!%p139_p2)  ;;  %v191_v1 = vld [vmem:[%s675_s1 + $0x8] sm:$0x1] (!%p139_p2)  ;;  %vm248_vm0 = vcmask (!%p139_p2), 1040384   ;;  %s475_s18 = sshll.u32 (!%p139_p2), %s470_s13, 4  ;;  %vm570_vm1 = vmmov (!%p139_p2), 1  }
   0x6   : > { %142 = sbr.rel (%p139_p2) target bundleno = 247 (0xf7), region = 32  ;;  %v545_v2 = vpack.c.bf16 (!%p139_p2), %v191_v1, %v190_v0  ;;  %vm546_vm2 = vmpackc.low (!%p139_p2), %vm248_vm0, %vm570_vm1  ;;  %p163_p3 = scmp.lt.s32.totalorder (!%p139_p2), %s475_s18, 63  ;;  %vm199_vm3 = vcmask (!%p139_p2), 72704   ;;  %v479_v19 = vld [vmem:[%s676_s2] ss:$0 sm:$0xff] (!%p139_p2)  ;;  %vm397_vm4 = vcmask (!%p139_p2), 97280  }
   0x8   : > { %547 = vmatprep.subr.msk.bf16.mxu0 (!%p139_p2), %vm546_vm2, %v545_v2  ;;  %551 = vmatprep.subr.msk.bf16.mxu1 (!%p139_p2), %vm546_vm2, %v545_v2 }
   0x9   : > { %550 = vmatpush3.bf16.msk.msra.mxu0 (!%p139_p2), %vm546_vm2, %v545_v2  ;;  %552 = vmatpush3.bf16.msk.msra.mxu1 (!%p139_p2), %vm546_vm2, %v545_v2 }
   0xd   : > { %s679_s18 = smov (!%p163_p3, %s475_s18), 63 }
   0xe   : > { %s476_s19 = sshll.u32 %s679_s18, 3 }
   0xf   : > { %s166_s22 = scalar_lea.vmem %s674_s0, %s476_s19  ;;  %s637_s27 = scalar_lea.vmem %s677_s3, %s476_s19 }
  0x10   : > { %v174_v3 = vld [vmem:[%s166_s22] sm:$0xff]  ;;  %v175_v5 = vld [vmem:[%s166_s22 + $0x8] sm:$0xff]  ;;  %v176_v7 = vld [vmem:[%s166_s22 + $0x10] sm:$0xff] }
  0x11   : > { %v182_v4 = vld [vmem:[%s166_s22 + $0x40] sm:$0xff]  ;;  %521 = vmatprep.mubr.msk.f32.mxu0 %vm199_vm3, %v174_v3  ;;  %v183_v6 = vld [vmem:[%s166_s22 + $0x48] sm:$0xff]  ;;  %v184_v8 = vld [vmem:[%s166_s22 + $0x50] sm:$0xff] }
  0x12   : > { %533 = vmatprep.mubr.msk.f32.mxu1 %vm199_vm3, %v182_v4  ;;  %522 = vmatmul.mubr.msk.f32.vlgmr.msra.gmra.mrb[0].mxu0 %vm199_vm3, %v175_v5  ;;  %v177_v9 = vld [vmem:[%s166_s22 + $0x18] sm:$0xff]  ;;  %v178_v11 = vld [vmem:[%s166_s22 + $0x20] sm:$0xff]  ;;  %v179_v13 = vld [vmem:[%s166_s22 + $0x28] sm:$0xff] }
  0x13   : > { %534 = vmatmul.mubr.msk.f32.vlgmr.msra.gmra.mrb[0].mxu1 %vm199_vm3, %v183_v6  ;;  %524 = vmatprep.mubr.msk.f32.mxu0 %vm199_vm3, %v176_v7  ;;  %v185_v10 = vld [vmem:[%s166_s22 + $0x58] sm:$0xff]  ;;  %v186_v12 = vld [vmem:[%s166_s22 + $0x60] sm:$0xff]  ;;  %v187_v14 = vld [vmem:[%s166_s22 + $0x68] sm:$0xff] }
  0x14   : > { %536 = vmatprep.mubr.msk.f32.mxu1 %vm199_vm3, %v184_v8  ;;  %v180_v15 = vld [vmem:[%s166_s22 + $0x30] sm:$0xff]  ;;  %v181_v17 = vld [vmem:[%s166_s22 + $0x38] sm:$0xff] }
  0x15   : > { %v188_v16 = vld [vmem:[%s166_s22 + $0x70] sm:$0xff]  ;;  %v189_v18 = vld [vmem:[%s166_s22 + $0x78] sm:$0xff] }
  0x16   : > { %525 = vmatmul.mubr.msk.f32.gmra.mrb[2].mxu0 %vm199_vm3, %v177_v9 }
  0x17   : > { %537 = vmatmul.mubr.msk.f32.gmra.mrb[2].mxu1 %vm199_vm3, %v185_v10  ;;  %527 = vmatprep.mubr.msk.f32.mxu0 %vm199_vm3, %v178_v11 }
  0x18   : > { %539 = vmatprep.mubr.msk.f32.mxu1 %vm199_vm3, %v186_v12 }
  0x1a   : > { %528 = vmatmul.mubr.msk.f32.gmra.mrb[4].mxu0 %vm199_vm3, %v179_v13 }
  0x1b   : > { %540 = vmatmul.mubr.msk.f32.gmra.mrb[4].mxu1 %vm199_vm3, %v187_v14  ;;  %530 = vmatprep.mubr.msk.f32.mxu0 %vm199_vm3, %v180_v15 }
  0x1c   : > { %542 = vmatprep.mubr.msk.f32.mxu1 %vm199_vm3, %v188_v16 }
  0x1e   : > { %531 = vmatmul.mubr.msk.f32.gmra.mrb[6].mxu0 %vm199_vm3, %v181_v17 }
  0x1f   : > { %543 = vmatmul.mubr.msk.f32.gmra.mrb[6].mxu1 %vm199_vm3, %v189_v18 }
  0xe5   : > { %v523_v20 = vpop.f32.mrb[0].mxu0 }
  0xe6   : > { %v535_v21 = vpop.f32.mrb[0].mxu1  ;;  %v324_v22 = vadd.f32 %v523_v20, %v479_v19  ;;  %v318_v24 = vpop.f32.mrb[1].mxu0 }
  0xe7   : > { %v364_v23 = vadd.f32 %v535_v21, %v479_v19  ;;  %v358_v25 = vpop.f32.mrb[1].mxu1  ;;  %v319_v26 = vadd.f32 %v479_v19, %v318_v24 }
  0xe8   : > { %v359_v27 = vadd.f32 %v479_v19, %v358_v25  ;;  %399 = vst.msk [vmem:[%s637_s27 + $0x8] sm:$0xff] %vm397_vm4, %v324_v22 }
  0xe9   : > { %407 = vst.msk [vmem:[%s637_s27 + $0x48] sm:$0xff] %vm397_vm4, %v364_v23  ;;  %398 = vst.msk [vmem:[%s637_s27] sm:$0xff] %vm397_vm4, %v319_v26  ;;  %v526_v28 = vpop.f32.mrb[2].mxu0 }
  0xea   : > { %406 = vst.msk [vmem:[%s637_s27 + $0x40] sm:$0xff] %vm397_vm4, %v359_v27  ;;  %v538_v29 = vpop.f32.mrb[2].mxu1  ;;  %v334_v30 = vadd.f32 %v526_v28, %v479_v19  ;;  %v328_v32 = vpop.f32.mrb[3].mxu0 }
  0xeb   : > { %v374_v31 = vadd.f32 %v538_v29, %v479_v19  ;;  %v368_v33 = vpop.f32.mrb[3].mxu1  ;;  %v329_v34 = vadd.f32 %v479_v19, %v328_v32 }
  0xec   : > { %v369_v35 = vadd.f32 %v479_v19, %v368_v33  ;;  %401 = vst.msk [vmem:[%s637_s27 + $0x18] sm:$0xff] %vm397_vm4, %v334_v30 }
  0xed   : > { %409 = vst.msk [vmem:[%s637_s27 + $0x58] sm:$0xff] %vm397_vm4, %v374_v31  ;;  %400 = vst.msk [vmem:[%s637_s27 + $0x10] sm:$0xff] %vm397_vm4, %v329_v34  ;;  %v529_v36 = vpop.f32.mrb[4].mxu0 }
  0xee   : > { %408 = vst.msk [vmem:[%s637_s27 + $0x50] sm:$0xff] %vm397_vm4, %v369_v35  ;;  %v541_v37 = vpop.f32.mrb[4].mxu1  ;;  %v344_v38 = vadd.f32 %v529_v36, %v479_v19  ;;  %v338_v40 = vpop.f32.mrb[5].mxu0 }
  0xef   : > { %v384_v39 = vadd.f32 %v541_v37, %v479_v19  ;;  %v378_v41 = vpop.f32.mrb[5].mxu1  ;;  %v339_v42 = vadd.f32 %v479_v19, %v338_v40 }
  0xf0   : > { %v379_v43 = vadd.f32 %v479_v19, %v378_v41  ;;  %403 = vst.msk [vmem:[%s637_s27 + $0x28] sm:$0xff] %vm397_vm4, %v344_v38 }
  0xf1   : > { %411 = vst.msk [vmem:[%s637_s27 + $0x68] sm:$0xff] %vm397_vm4, %v384_v39  ;;  %402 = vst.msk [vmem:[%s637_s27 + $0x20] sm:$0xff] %vm397_vm4, %v339_v42  ;;  %v532_v44 = vpop.f32.mrb[6].mxu0 }
  0xf2   : > { %410 = vst.msk [vmem:[%s637_s27 + $0x60] sm:$0xff] %vm397_vm4, %v379_v43  ;;  %v544_v45 = vpop.f32.mrb[6].mxu1  ;;  %v354_v46 = vadd.f32 %v532_v44, %v479_v19  ;;  %v348_v48 = vpop.f32.mrb[7].mxu0 }
  0xf3   : > { %v394_v47 = vadd.f32 %v544_v45, %v479_v19  ;;  %v388_v49 = vpop.f32.mrb[7].mxu1  ;;  %v349_v50 = vadd.f32 %v479_v19, %v348_v48 }
  0xf4   : > { %v389_v51 = vadd.f32 %v479_v19, %v388_v49  ;;  %405 = vst.msk [vmem:[%s637_s27 + $0x38] sm:$0xff] %vm397_vm4, %v354_v46 }
  0xf5   : > { %413 = vst.msk [vmem:[%s637_s27 + $0x78] sm:$0xff] %vm397_vm4, %v394_v47  ;;  %404 = vst.msk [vmem:[%s637_s27 + $0x30] sm:$0xff] %vm397_vm4, %v349_v50 }
  0xf6   : > { %412 = vst.msk [vmem:[%s637_s27 + $0x70] sm:$0xff] %vm397_vm4, %v389_v51 }
  0xf7 PF: > { %s13_s12 = sadd.s32 1, %s568_s12  }
  0xf8   : > { %p10_p4 = scmp.ge.s32.totalorder %s13_s12, 6  }
  0xfa   :  { %12 = sbr.rel (!%p10_p4) target bundleno = 1 (0x1), region = 62 }

// kernel: skip_capsule_forward.20
= control target key start
LH: loop header
LB: loop body
LE: loop exit
PB: predicated region body
PF: predicated region fallthrough
CT: control target
= control target key end

     0   :  { %s591_s12 = smov 0   ;;  %s674_s0 = inlined_call_operand.vmem [shape: f32[512,12], index: 0, kind: input, shape index: {}]   ;;  %s675_s1 = inlined_call_operand.vmem [shape: f32[12,6], index: 1, kind: input, shape index: {}]   ;;  %s676_s2 = inlined_call_operand.vmem [shape: f32[1,6], index: 2, kind: input, shape index: {}]   ;;  %s677_s3 = inlined_call_operand.vmem [shape: f32[512,6], index: 3, kind: output, shape index: {}]  }
   0x1 LB: > { %s470_s13 = sadd.s32 4294967295, %s568_s12   ;;  %p474_p0 = scmp.ge.s32.totalorder %s568_s12, 1  ;;  %s568_s12 = sphi %s591_s12, %s13_s12  }
   0x2   : > { %p138_p1 = scmp.lt.s32.totalorder %s568_s12, 5 }
   0x4   : > { %p139_p2 = pnand %p474_p0, %p138_p1 }
   0x5   : > { %v190_v0 = vld [vmem:[%s675_s1] sm:$0xff] (!%p139_p2)  ;;  %v191_v1 = vld [vmem:[%s675_s1 + $0x8] sm:$0xf] (!%p139_p2)  ;;  %vm248_vm0 = vcmask (!%p139_p2), 1043456   ;;  %s475_s18 = sshll.u32 (!%p139_p2), %s470_s13, 4  ;;  %vm570_vm1 = vmmov (!%p139_p2), 1  }
   0x6   : > { %142 = sbr.rel (%p139_p2) target bundleno = 247 (0xf7), region = 32  ;;  %v545_v2 = vpack.c.bf16 (!%p139_p2), %v191_v1, %v190_v0  ;;  %vm546_vm2 = vmpackc.low (!%p139_p2), %vm248_vm0, %vm570_vm1  ;;  %p163_p3 = scmp.lt.s32.totalorder (!%p139_p2), %s475_s18, 63  ;;  %vm199_vm3 = vcmask (!%p139_p2), 97280   ;;  %v479_v19 = vld [vmem:[%s676_s2] ss:$0 sm:$0xff] (!%p139_p2)  ;;  %vm397_vm4 = vcmask (!%p139_p2), 48128  }
   0x8   : > { %547 = vmatprep.subr.msk.bf16.mxu0 (!%p139_p2), %vm546_vm2, %v545_v2  ;;  %551 = vmatprep.subr.msk.bf16.mxu1 (!%p139_p2), %vm546_vm2, %v545_v2 }
   0x9   : > { %550 = vmatpush3.bf16.msk.msra.mxu0 (!%p139_p2), %vm546_vm2, %v545_v2  ;;  %552 = vmatpush3.bf16.msk.msra.mxu1 (!%p139_p2), %vm546_vm2, %v545_v2 }
   0xd   : > { %s679_s18 = smov (!%p163_p3, %s475_s18), 63 }
   0xe   : > { %s476_s19 = sshll.u32 %s679_s18, 3 }
   0xf   : > { %s166_s22 = scalar_lea.vmem %s674_s0, %s476_s19  ;;  %s637_s27 = scalar_lea.vmem %s677_s3, %s476_s19 }
  0x10   : > { %v174_v3 = vld [vmem:[%s166_s22] sm:$0xff]  ;;  %v175_v5 = vld [vmem:[%s166_s22 + $0x8] sm:$0xff]  ;;  %v176_v7 = vld [vmem:[%s166_s22 + $0x10] sm:$0xff] }
  0x11   : > { %v182_v4 = vld [vmem:[%s166_s22 + $0x40] sm:$0xff]  ;;  %521 = vmatprep.mubr.msk.f32.mxu0 %vm199_vm3, %v174_v3  ;;  %v183_v6 = vld [vmem:[%s166_s22 + $0x48] sm:$0xff]  ;;  %v184_v8 = vld [vmem:[%s166_s22 + $0x50] sm:$0xff] }
  0x12   : > { %533 = vmatprep.mubr.msk.f32.mxu1 %vm199_vm3, %v182_v4  ;;  %522 = vmatmul.mubr.msk.f32.vlgmr.msra.gmra.mrb[0].mxu0 %vm199_vm3, %v175_v5  ;;  %v177_v9 = vld [vmem:[%s166_s22 + $0x18] sm:$0xff]  ;;  %v178_v11 = vld [vmem:[%s166_s22 + $0x20] sm:$0xff]  ;;  %v179_v13 = vld [vmem:[%s166_s22 + $0x28] sm:$0xff] }
  0x13   : > { %534 = vmatmul.mubr.msk.f32.vlgmr.msra.gmra.mrb[0].mxu1 %vm199_vm3, %v183_v6  ;;  %524 = vmatprep.mubr.msk.f32.mxu0 %vm199_vm3, %v176_v7  ;;  %v185_v10 = vld [vmem:[%s166_s22 + $0x58] sm:$0xff]  ;;  %v186_v12 = vld [vmem:[%s166_s22 + $0x60] sm:$0xff]  ;;  %v187_v14 = vld [vmem:[%s166_s22 + $0x68] sm:$0xff] }
  0x14   : > { %536 = vmatprep.mubr.msk.f32.mxu1 %vm199_vm3, %v184_v8  ;;  %v180_v15 = vld [vmem:[%s166_s22 + $0x30] sm:$0xff]  ;;  %v181_v17 = vld [vmem:[%s166_s22 + $0x38] sm:$0xff] }
  0x15   : > { %v188_v16 = vld [vmem:[%s166_s22 + $0x70] sm:$0xff]  ;;  %v189_v18 = vld [vmem:[%s166_s22 + $0x78] sm:$0xff] }
  0x16   : > { %525 = vmatmul.mubr.msk.f32.gmra.mrb[2].mxu0 %vm199_vm3, %v177_v9 }
  0x17   : > { %537 = vmatmul.mubr.msk.f32.gmra.mrb[2].mxu1 %vm199_vm3, %v185_v10  ;;  %527 = vmatprep.mubr.msk.f32.mxu0 %vm199_vm3, %v178_v11 }
  0x18   : > { %539 = vmatprep.mubr.msk.f32.mxu1 %vm199_vm3, %v186_v12 }
  0x1a   : > { %528 = vmatmul.mubr.msk.f32.gmra.mrb[4].mxu0 %vm199_vm3, %v179_v13 }
  0x1b   : > { %540 = vmatmul.mubr.msk.f32.gmra.mrb[4].mxu1 %vm199_vm3, %v187_v14  ;;  %530 = vmatprep.mubr.msk.f32.mxu0 %vm199_vm3, %v180_v15 }
  0x1c   : > { %542 = vmatprep.mubr.msk.f32.mxu1 %vm199_vm3, %v188_v16 }
  0x1e   : > { %531 = vmatmul.mubr.msk.f32.gmra.mrb[6].mxu0 %vm199_vm3, %v181_v17 }
  0x1f   : > { %543 = vmatmul.mubr.msk.f32.gmra.mrb[6].mxu1 %vm199_vm3, %v189_v18 }
  0xe5   : > { %v523_v20 = vpop.f32.mrb[0].mxu0 }
  0xe6   : > { %v535_v21 = vpop.f32.mrb[0].mxu1  ;;  %v324_v22 = vadd.f32 %v523_v20, %v479_v19  ;;  %v318_v24 = vpop.f32.mrb[1].mxu0 }
  0xe7   : > { %v364_v23 = vadd.f32 %v535_v21, %v479_v19  ;;  %v358_v25 = vpop.f32.mrb[1].mxu1  ;;  %v319_v26 = vadd.f32 %v479_v19, %v318_v24 }
  0xe8   : > { %v359_v27 = vadd.f32 %v479_v19, %v358_v25  ;;  %399 = vst.msk [vmem:[%s637_s27 + $0x8] sm:$0xff] %vm397_vm4, %v324_v22 }
  0xe9   : > { %407 = vst.msk [vmem:[%s637_s27 + $0x48] sm:$0xff] %vm397_vm4, %v364_v23  ;;  %398 = vst.msk [vmem:[%s637_s27] sm:$0xff] %vm397_vm4, %v319_v26  ;;  %v526_v28 = vpop.f32.mrb[2].mxu0 }
  0xea   : > { %406 = vst.msk [vmem:[%s637_s27 + $0x40] sm:$0xff] %vm397_vm4, %v359_v27  ;;  %v538_v29 = vpop.f32.mrb[2].mxu1  ;;  %v334_v30 = vadd.f32 %v526_v28, %v479_v19  ;;  %v328_v32 = vpop.f32.mrb[3].mxu0 }
  0xeb   : > { %v374_v31 = vadd.f32 %v538_v29, %v479_v19  ;;  %v368_v33 = vpop.f32.mrb[3].mxu1  ;;  %v329_v34 = vadd.f32 %v479_v19, %v328_v32 }
  0xec   : > { %v369_v35 = vadd.f32 %v479_v19, %v368_v33  ;;  %401 = vst.msk [vmem:[%s637_s27 + $0x18] sm:$0xff] %vm397_vm4, %v334_v30 }
  0xed   : > { %409 = vst.msk [vmem:[%s637_s27 + $0x58] sm:$0xff] %vm397_vm4, %v374_v31  ;;  %400 = vst.msk [vmem:[%s637_s27 + $0x10] sm:$0xff] %vm397_vm4, %v329_v34  ;;  %v529_v36 = vpop.f32.mrb[4].mxu0 }
  0xee   : > { %408 = vst.msk [vmem:[%s637_s27 + $0x50] sm:$0xff] %vm397_vm4, %v369_v35  ;;  %v541_v37 = vpop.f32.mrb[4].mxu1  ;;  %v344_v38 = vadd.f32 %v529_v36, %v479_v19  ;;  %v338_v40 = vpop.f32.mrb[5].mxu0 }
  0xef   : > { %v384_v39 = vadd.f32 %v541_v37, %v479_v19  ;;  %v378_v41 = vpop.f32.mrb[5].mxu1  ;;  %v339_v42 = vadd.f32 %v479_v19, %v338_v40 }
  0xf0   : > { %v379_v43 = vadd.f32 %v479_v19, %v378_v41  ;;  %403 = vst.msk [vmem:[%s637_s27 + $0x28] sm:$0xff] %vm397_vm4, %v344_v38 }
  0xf1   : > { %411 = vst.msk [vmem:[%s637_s27 + $0x68] sm:$0xff] %vm397_vm4, %v384_v39  ;;  %402 = vst.msk [vmem:[%s637_s27 + $0x20] sm:$0xff] %vm397_vm4, %v339_v42  ;;  %v532_v44 = vpop.f32.mrb[6].mxu0 }
  0xf2   : > { %410 = vst.msk [vmem:[%s637_s27 + $0x60] sm:$0xff] %vm397_vm4, %v379_v43  ;;  %v544_v45 = vpop.f32.mrb[6].mxu1  ;;  %v354_v46 = vadd.f32 %v532_v44, %v479_v19  ;;  %v348_v48 = vpop.f32.mrb[7].mxu0 }
  0xf3   : > { %v394_v47 = vadd.f32 %v544_v45, %v479_v19  ;;  %v388_v49 = vpop.f32.mrb[7].mxu1  ;;  %v349_v50 = vadd.f32 %v479_v19, %v348_v48 }
  0xf4   : > { %v389_v51 = vadd.f32 %v479_v19, %v388_v49  ;;  %405 = vst.msk [vmem:[%s637_s27 + $0x38] sm:$0xff] %vm397_vm4, %v354_v46 }
  0xf5   : > { %413 = vst.msk [vmem:[%s637_s27 + $0x78] sm:$0xff] %vm397_vm4, %v394_v47  ;;  %404 = vst.msk [vmem:[%s637_s27 + $0x30] sm:$0xff] %vm397_vm4, %v349_v50 }
  0xf6   : > { %412 = vst.msk [vmem:[%s637_s27 + $0x70] sm:$0xff] %vm397_vm4, %v389_v51 }
  0xf7 PF: > { %s13_s12 = sadd.s32 1, %s568_s12  }
  0xf8   : > { %p10_p4 = scmp.ge.s32.totalorder %s13_s12, 6  }
  0xfa   :  { %12 = sbr.rel (!%p10_p4) target bundleno = 1 (0x1), region = 62 }

// kernel: skip_capsule_forward.13
= control target key start
LH: loop header
LB: loop body
LE: loop exit
PB: predicated region body
PF: predicated region fallthrough
CT: control target
= control target key end

     0   :  { %vm51_vm0 = vcmask 883712   ;;  %vm100_vm1 = vcmask 1043456   ;;  %vm415_vm2 = vmmov 1   ;;  %vm249_vm4 = vcmask 97280   ;;  %s609_s1 = inlined_call_operand.vmem [shape: f32[108,12], index: 1, kind: input, shape index: {}]   ;;  %s610_s0 = inlined_call_operand.vmem [shape: f32[128,108], index: 0, kind: input, shape index: {}]   ;;  %s611_s2 = inlined_call_operand.vmem [shape: f32[1,12], index: 2, kind: input, shape index: {}]   ;;  %s612_s3 = inlined_call_operand.vmem [shape: f32[128,12], index: 3, kind: output, shape index: {}]  }
   0x1   :  { %v30_v0 = vld [vmem:[%s609_s1] sm:$0xff]  ;;  %v31_v1 = vld [vmem:[%s609_s1 + $0x8] sm:$0xff]  ;;  %v32_v2 = vld [vmem:[%s609_s1 + $0x10] sm:$0xff] }
   0x2   :  { %v370_v3 = vpack.c.bf16 %v31_v1, %v30_v0  ;;  %v33_v4 = vld [vmem:[%s609_s1 + $0x18] sm:$0xff]  ;;  %v34_v6 = vld [vmem:[%s609_s1 + $0x20] sm:$0xff]  ;;  %v35_v7 = vld [vmem:[%s609_s1 + $0x28] sm:$0xff] }
   0x3   :  { %v374_v5 = vpack.c.bf16 %v33_v4, %v32_v2  ;;  %v378_v8 = vpack.c.bf16 %v35_v7, %v34_v6  ;;  %v14_v9 = vld [vmem:[%s610_s0] sm:$0xff]  ;;  %v36_v11 = vld [vmem:[%s609_s1 + $0x30] sm:$0xff]  ;;  %v37_v12 = vld [vmem:[%s609_s1 + $0x38] sm:$0xff] }
   0x4   :  { %371 = vmatprep.subr.bf16.mxu0 %v370_v3  ;;  %400 = vmatprep.subr.bf16.mxu1 %v370_v3  ;;  %v22_v10 = vld [vmem:[%s610_s0 + $0x40] sm:$0xff]  ;;  %v382_v13 = vpack.c.bf16 %v37_v12, %v36_v11  ;;  %v39_v15 = vld [vmem:[%s609_s1 + $0x48] sm:$0xff]  ;;  %v40_v17 = vld [vmem:[%s609_s1 + $0x50] sm:$0xff] }
   0x5   :  { %373 = vmatpush3.bf16.msra.mxu0 %v370_v3  ;;  %407 = vmatpush3.bf16.msra.mxu1 %v370_v3  ;;  %v38_v14 = vld [vmem:[%s609_s1 + $0x40] sm:$0xff]  ;;  %v41_v18 = vld [vmem:[%s609_s1 + $0x58] sm:$0xff]  ;;  %v43_v21 = vld [vmem:[%s609_s1 + $0x68] sm:$0xf] }
   0x6   :  { %375 = vmatprep.subr.bf16.mxu0 %v374_v5  ;;  %401 = vmatprep.subr.bf16.mxu1 %v374_v5  ;;  %v386_v16 = vpack.c.bf16 %v39_v15, %v38_v14  ;;  %v390_v19 = vpack.c.bf16 %v41_v18, %v40_v17  ;;  %v42_v20 = vld [vmem:[%s609_s1 + $0x60] sm:$0xff]  ;;  %vm395_vm3 = vmpackc.low %vm100_vm1, %vm415_vm2  ;;  %v15_v23 = vld [vmem:[%s610_s0 + $0x8] sm:$0xff] }
   0x7   :  { %346 = vmatprep.mubr.msk.f32.mxu0 %vm51_vm0, %v14_v9  ;;  %358 = vmatprep.mubr.msk.f32.mxu1 %vm51_vm0, %v22_v10  ;;  %v394_v22 = vpack.c.bf16 %v43_v21, %v42_v20  ;;  %v23_v24 = vld [vmem:[%s610_s0 + $0x48] sm:$0xff]  ;;  %v16_v25 = vld [vmem:[%s610_s0 + $0x10] sm:$0xff]  ;;  %v17_v27 = vld [vmem:[%s610_s0 + $0x18] sm:$0xff] }
   0x8   :  { %v24_v26 = vld [vmem:[%s610_s0 + $0x50] sm:$0xff]  ;;  %v25_v28 = vld [vmem:[%s610_s0 + $0x58] sm:$0xff]  ;;  %v18_v29 = vld [vmem:[%s610_s0 + $0x20] sm:$0xff] }
   0x9   :  { %377 = vmatpush3.bf16.msra.mxu0 %v374_v5  ;;  %408 = vmatpush3.bf16.msra.mxu1 %v374_v5  ;;  %v26_v30 = vld [vmem:[%s610_s0 + $0x60] sm:$0xff]  ;;  %v19_v31 = vld [vmem:[%s610_s0 + $0x28] sm:$0xff]  ;;  %v20_v33 = vld [vmem:[%s610_s0 + $0x30] sm:$0xff] }
   0xa   :  { %379 = vmatprep.subr.bf16.mxu0 %v378_v8  ;;  %402 = vmatprep.subr.bf16.mxu1 %v378_v8  ;;  %v27_v32 = vld [vmem:[%s610_s0 + $0x68] sm:$0xff]  ;;  %v28_v34 = vld [vmem:[%s610_s0 + $0x70] sm:$0xff]  ;;  %v21_v35 = vld [vmem:[%s610_s0 + $0x38] sm:$0xff] }
   0xb   :  { %v29_v36 = vld [vmem:[%s610_s0 + $0x78] sm:$0xff]  ;;  %v270_v37 = vld [vmem:[%s611_s2] ss:$0 sm:$0xff] }
   0xd   :  { %381 = vmatpush3.bf16.msra.mxu0 %v378_v8  ;;  %409 = vmatpush3.bf16.msra.mxu1 %v378_v8 }
   0xe   :  { %383 = vmatprep.subr.bf16.mxu0 %v382_v13  ;;  %403 = vmatprep.subr.bf16.mxu1 %v382_v13 }
  0x11   :  { %385 = vmatpush3.bf16.msra.mxu0 %v382_v13  ;;  %410 = vmatpush3.bf16.msra.mxu1 %v382_v13 }
  0x12   :  { %387 = vmatprep.subr.bf16.mxu0 %v386_v16  ;;  %404 = vmatprep.subr.bf16.mxu1 %v386_v16 }
  0x15   :  { %389 = vmatpush3.bf16.msra.mxu0 %v386_v16  ;;  %411 = vmatpush3.bf16.msra.mxu1 %v386_v16 }
  0x16   :  { %391 = vmatprep.subr.bf16.mxu0 %v390_v19  ;;  %405 = vmatprep.subr.bf16.mxu1 %v390_v19 }
  0x19   :  { %393 = vmatpush3.bf16.msra.mxu0 %v390_v19  ;;  %412 = vmatpush3.bf16.msra.mxu1 %v390_v19 }
  0x1a   :  { %396 = vmatprep.subr.msk.bf16.mxu0 %vm395_vm3, %v394_v22  ;;  %406 = vmatprep.subr.msk.bf16.mxu1 %vm395_vm3, %v394_v22 }
  0x1d   :  { %399 = vmatpush3.bf16.msk.msra.mxu0 %vm395_vm3, %v394_v22  ;;  %413 = vmatpush3.bf16.msk.msra.mxu1 %vm395_vm3, %v394_v22 }
  0x20   :  { %347 = vmatmul.mubr.msk.f32.vlgmr.msra.gmra.mrb[0].mxu0 %vm51_vm0, %v15_v23  ;;  %359 = vmatmul.mubr.msk.f32.vlgmr.msra.gmra.mrb[0].mxu1 %vm51_vm0, %v23_v24 }
  0x21   :  { %349 = vmatprep.mubr.msk.f32.mxu0 %vm51_vm0, %v16_v25  ;;  %361 = vmatprep.mubr.msk.f32.mxu1 %vm51_vm0, %v24_v26 }
  0x24   :  { %350 = vmatmul.mubr.msk.f32.gmra.mrb[2].mxu0 %vm51_vm0, %v17_v27  ;;  %362 = vmatmul.mubr.msk.f32.gmra.mrb[2].mxu1 %vm51_vm0, %v25_v28 }
  0x25   :  { %352 = vmatprep.mubr.msk.f32.mxu0 %vm51_vm0, %v18_v29  ;;  %364 = vmatprep.mubr.msk.f32.mxu1 %vm51_vm0, %v26_v30 }
  0x28   :  { %353 = vmatmul.mubr.msk.f32.gmra.mrb[4].mxu0 %vm51_vm0, %v19_v31  ;;  %365 = vmatmul.mubr.msk.f32.gmra.mrb[4].mxu1 %vm51_vm0, %v27_v32 }
  0x29   :  { %355 = vmatprep.mubr.msk.f32.mxu0 %vm51_vm0, %v20_v33  ;;  %367 = vmatprep.mubr.msk.f32.mxu1 %vm51_vm0, %v28_v34 }
  0x2c   :  { %356 = vmatmul.mubr.msk.f32.gmra.mrb[6].mxu0 %vm51_vm0, %v21_v35  ;;  %368 = vmatmul.mubr.msk.f32.gmra.mrb[6].mxu1 %vm51_vm0, %v29_v36 }
  0xf3   :  { %v348_v38 = vpop.f32.mrb[0].mxu0  ;;  %v360_v39 = vpop.f32.mrb[0].mxu1 }
  0xf4   :  { %v176_v40 = vadd.f32 %v348_v38, %v270_v37  ;;  %v216_v41 = vadd.f32 %v360_v39, %v270_v37  ;;  %v170_v42 = vpop.f32.mrb[1].mxu0  ;;  %v210_v43 = vpop.f32.mrb[1].mxu1 }
  0xf5   :  { %v171_v44 = vadd.f32 %v270_v37, %v170_v42  ;;  %v211_v45 = vadd.f32 %v270_v37, %v210_v43 }
  0xf6   :  { %251 = vst.msk [vmem:[%s612_s3 + $0x8] sm:$0xff] %vm249_vm4, %v176_v40  ;;  %259 = vst.msk [vmem:[%s612_s3 + $0x48] sm:$0xff] %vm249_vm4, %v216_v41 }
  0xf7   :  { %250 = vst.msk [vmem:[%s612_s3] sm:$0xff] %vm249_vm4, %v171_v44  ;;  %258 = vst.msk [vmem:[%s612_s3 + $0x40] sm:$0xff] %vm249_vm4, %v211_v45  ;;  %v351_v46 = vpop.f32.mrb[2].mxu0  ;;  %v363_v47 = vpop.f32.mrb[2].mxu1 }
  0xf8   :  { %v186_v48 = vadd.f32 %v351_v46, %v270_v37  ;;  %v226_v49 = vadd.f32 %v363_v47, %v270_v37  ;;  %v180_v50 = vpop.f32.mrb[3].mxu0  ;;  %v220_v51 = vpop.f32.mrb[3].mxu1 }
  0xf9   :  { %v181_v52 = vadd.f32 %v270_v37, %v180_v50  ;;  %v221_v53 = vadd.f32 %v270_v37, %v220_v51 }
  0xfa   :  { %253 = vst.msk [vmem:[%s612_s3 + $0x18] sm:$0xff] %vm249_vm4, %v186_v48  ;;  %261 = vst.msk [vmem:[%s612_s3 + $0x58] sm:$0xff] %vm249_vm4, %v226_v49 }
  0xfb   :  { %252 = vst.msk [vmem:[%s612_s3 + $0x10] sm:$0xff] %vm249_vm4, %v181_v52  ;;  %260 = vst.msk [vmem:[%s612_s3 + $0x50] sm:$0xff] %vm249_vm4, %v221_v53  ;;  %v354_v54 = vpop.f32.mrb[4].mxu0  ;;  %v366_v55 = vpop.f32.mrb[4].mxu1 }
  0xfc   :  { %v196_v56 = vadd.f32 %v354_v54, %v270_v37  ;;  %v236_v57 = vadd.f32 %v366_v55, %v270_v37  ;;  %v190_v58 = vpop.f32.mrb[5].mxu0  ;;  %v230_v59 = vpop.f32.mrb[5].mxu1 }
  0xfd   :  { %v191_v60 = vadd.f32 %v270_v37, %v190_v58  ;;  %v231_v61 = vadd.f32 %v270_v37, %v230_v59 }
  0xfe   :  { %255 = vst.msk [vmem:[%s612_s3 + $0x28] sm:$0xff] %vm249_vm4, %v196_v56  ;;  %263 = vst.msk [vmem:[%s612_s3 + $0x68] sm:$0xff] %vm249_vm4, %v236_v57 }
  0xff   :  { %254 = vst.msk [vmem:[%s612_s3 + $0x20] sm:$0xff] %vm249_vm4, %v191_v60  ;;  %262 = vst.msk [vmem:[%s612_s3 + $0x60] sm:$0xff] %vm249_vm4, %v231_v61  ;;  %v357_v62 = vpop.f32.mrb[6].mxu0  ;;  %v369_v63 = vpop.f32.mrb[6].mxu1 }
 0x100   :  { %v206_v0 = vadd.f32 %v357_v62, %v270_v37  ;;  %v246_v1 = vadd.f32 %v369_v63, %v270_v37  ;;  %v200_v2 = vpop.f32.mrb[7].mxu0  ;;  %v240_v3 = vpop.f32.mrb[7].mxu1 }
 0x101   :  { %v201_v4 = vadd.f32 %v270_v37, %v200_v2  ;;  %v241_v5 = vadd.f32 %v270_v37, %v240_v3 }
 0x102   :  { %257 = vst.msk [vmem:[%s612_s3 + $0x38] sm:$0xff] %vm249_vm4, %v206_v0  ;;  %265 = vst.msk [vmem:[%s612_s3 + $0x78] sm:$0xff] %vm249_vm4, %v246_v1 }
 0x103   :  { %256 = vst.msk [vmem:[%s612_s3 + $0x30] sm:$0xff] %vm249_vm4, %v201_v4  ;;  %264 = vst.msk [vmem:[%s612_s3 + $0x70] sm:$0xff] %vm249_vm4, %v241_v5 }

// kernel: skip_capsule_forward.14
= control target key start
LH: loop header
LB: loop body
LE: loop exit
PB: predicated region body
PF: predicated region fallthrough
CT: control target
= control target key end

     0   :  { %vm88_vm0 = vcmask 1043456   ;;  %vm39_vm1 = vcmask 97280   ;;  %vm330_vm2 = vmmov 1   ;;  %s488_s1 = inlined_call_operand.vmem [shape: f32[12,12], index: 1, kind: input, shape index: {}]   ;;  %s489_s0 = inlined_call_operand.vmem [shape: f32[128,12], index: 0, kind: input, shape index: {}]   ;;  %s490_s2 = inlined_call_operand.vmem [shape: f32[1,12], index: 2, kind: input, shape index: {}]   ;;  %s491_s3 = inlined_call_operand.vmem [shape: f32[128,12], index: 3, kind: output, shape index: {}]  }
   0x1   :  { %v30_v0 = vld [vmem:[%s488_s1] sm:$0xff]  ;;  %v31_v1 = vld [vmem:[%s488_s1 + $0x8] sm:$0xf]  ;;  %vm322_vm3 = vmpackc.low %vm88_vm0, %vm330_vm2 }
   0x2   :  { %v321_v2 = vpack.c.bf16 %v31_v1, %v30_v0  ;;  %v14_v3 = vld [vmem:[%s489_s0] sm:$0xff]  ;;  %v15_v5 = vld [vmem:[%s489_s0 + $0x8] sm:$0xff]  ;;  %v16_v7 = vld [vmem:[%s489_s0 + $0x10] sm:$0xff] }
   0x3   :  { %v22_v4 = vld [vmem:[%s489_s0 + $0x40] sm:$0xff]  ;;  %297 = vmatprep.mubr.msk.f32.mxu0 %vm39_vm1, %v14_v3  ;;  %v23_v6 = vld [vmem:[%s489_s0 + $0x48] sm:$0xff]  ;;  %v24_v8 = vld [vmem:[%s489_s0 + $0x50] sm:$0xff] }
   0x4   :  { %309 = vmatprep.mubr.msk.f32.mxu1 %vm39_vm1, %v22_v4  ;;  %323 = vmatprep.subr.msk.bf16.mxu0 %vm322_vm3, %v321_v2  ;;  %v17_v9 = vld [vmem:[%s489_s0 + $0x18] sm:$0xff]  ;;  %v18_v11 = vld [vmem:[%s489_s0 + $0x20] sm:$0xff]  ;;  %v19_v13 = vld [vmem:[%s489_s0 + $0x28] sm:$0xff] }
   0x5   :  { %327 = vmatprep.subr.msk.bf16.mxu1 %vm322_vm3, %v321_v2  ;;  %326 = vmatpush3.bf16.msk.msra.mxu0 %vm322_vm3, %v321_v2  ;;  %v25_v10 = vld [vmem:[%s489_s0 + $0x58] sm:$0xff]  ;;  %v26_v12 = vld [vmem:[%s489_s0 + $0x60] sm:$0xff]  ;;  %v27_v14 = vld [vmem:[%s489_s0 + $0x68] sm:$0xff] }
   0x6   :  { %328 = vmatpush3.bf16.msk.msra.mxu1 %vm322_vm3, %v321_v2  ;;  %v20_v15 = vld [vmem:[%s489_s0 + $0x30] sm:$0xff]  ;;  %v21_v17 = vld [vmem:[%s489_s0 + $0x38] sm:$0xff]  ;;  %v257_v19 = vld [vmem:[%s490_s2] ss:$0 sm:$0xff] }
   0x7   :  { %v28_v16 = vld [vmem:[%s489_s0 + $0x70] sm:$0xff]  ;;  %v29_v18 = vld [vmem:[%s489_s0 + $0x78] sm:$0xff] }
   0x8   :  { %298 = vmatmul.mubr.msk.f32.vlgmr.msra.gmra.mrb[0].mxu0 %vm39_vm1, %v15_v5 }
   0x9   :  { %310 = vmatmul.mubr.msk.f32.vlgmr.msra.gmra.mrb[0].mxu1 %vm39_vm1, %v23_v6  ;;  %300 = vmatprep.mubr.msk.f32.mxu0 %vm39_vm1, %v16_v7 }
   0xa   :  { %312 = vmatprep.mubr.msk.f32.mxu1 %vm39_vm1, %v24_v8 }
   0xc   :  { %301 = vmatmul.mubr.msk.f32.gmra.mrb[2].mxu0 %vm39_vm1, %v17_v9 }
   0xd   :  { %313 = vmatmul.mubr.msk.f32.gmra.mrb[2].mxu1 %vm39_vm1, %v25_v10  ;;  %303 = vmatprep.mubr.msk.f32.mxu0 %vm39_vm1, %v18_v11 }
   0xe   :  { %315 = vmatprep.mubr.msk.f32.mxu1 %vm39_vm1, %v26_v12 }
  0x10   :  { %304 = vmatmul.mubr.msk.f32.gmra.mrb[4].mxu0 %vm39_vm1, %v19_v13 }
  0x11   :  { %316 = vmatmul.mubr.msk.f32.gmra.mrb[4].mxu1 %vm39_vm1, %v27_v14  ;;  %306 = vmatprep.mubr.msk.f32.mxu0 %vm39_vm1, %v20_v15 }
  0x12   :  { %318 = vmatprep.mubr.msk.f32.mxu1 %vm39_vm1, %v28_v16 }
  0x14   :  { %307 = vmatmul.mubr.msk.f32.gmra.mrb[6].mxu0 %vm39_vm1, %v21_v17 }
  0x15   :  { %319 = vmatmul.mubr.msk.f32.gmra.mrb[6].mxu1 %vm39_vm1, %v29_v18 }
  0xdb   :  { %v299_v20 = vpop.f32.mrb[0].mxu0 }
  0xdc   :  { %v311_v21 = vpop.f32.mrb[0].mxu1  ;;  %v164_v22 = vadd.f32 %v299_v20, %v257_v19  ;;  %v158_v24 = vpop.f32.mrb[1].mxu0 }
  0xdd   :  { %v204_v23 = vadd.f32 %v311_v21, %v257_v19  ;;  %v198_v25 = vpop.f32.mrb[1].mxu1  ;;  %v159_v26 = vadd.f32 %v257_v19, %v158_v24 }
  0xde   :  { %v199_v27 = vadd.f32 %v257_v19, %v198_v25  ;;  %238 = vst.msk [vmem:[%s491_s3 + $0x8] sm:$0xff] %vm39_vm1, %v164_v22 }
  0xdf   :  { %246 = vst.msk [vmem:[%s491_s3 + $0x48] sm:$0xff] %vm39_vm1, %v204_v23  ;;  %237 = vst.msk [vmem:[%s491_s3] sm:$0xff] %vm39_vm1, %v159_v26  ;;  %v302_v28 = vpop.f32.mrb[2].mxu0 }
  0xe0   :  { %245 = vst.msk [vmem:[%s491_s3 + $0x40] sm:$0xff] %vm39_vm1, %v199_v27  ;;  %v314_v29 = vpop.f32.mrb[2].mxu1  ;;  %v174_v30 = vadd.f32 %v302_v28, %v257_v19  ;;  %v168_v32 = vpop.f32.mrb[3].mxu0 }
  0xe1   :  { %v214_v31 = vadd.f32 %v314_v29, %v257_v19  ;;  %v208_v33 = vpop.f32.mrb[3].mxu1  ;;  %v169_v34 = vadd.f32 %v257_v19, %v168_v32 }
  0xe2   :  { %v209_v35 = vadd.f32 %v257_v19, %v208_v33  ;;  %240 = vst.msk [vmem:[%s491_s3 + $0x18] sm:$0xff] %vm39_vm1, %v174_v30 }
  0xe3   :  { %248 = vst.msk [vmem:[%s491_s3 + $0x58] sm:$0xff] %vm39_vm1, %v214_v31  ;;  %239 = vst.msk [vmem:[%s491_s3 + $0x10] sm:$0xff] %vm39_vm1, %v169_v34  ;;  %v305_v36 = vpop.f32.mrb[4].mxu0 }
  0xe4   :  { %247 = vst.msk [vmem:[%s491_s3 + $0x50] sm:$0xff] %vm39_vm1, %v209_v35  ;;  %v317_v37 = vpop.f32.mrb[4].mxu1  ;;  %v184_v38 = vadd.f32 %v305_v36, %v257_v19  ;;  %v178_v40 = vpop.f32.mrb[5].mxu0 }
  0xe5   :  { %v224_v39 = vadd.f32 %v317_v37, %v257_v19  ;;  %v218_v41 = vpop.f32.mrb[5].mxu1  ;;  %v179_v42 = vadd.f32 %v257_v19, %v178_v40 }
  0xe6   :  { %v219_v43 = vadd.f32 %v257_v19, %v218_v41  ;;  %242 = vst.msk [vmem:[%s491_s3 + $0x28] sm:$0xff] %vm39_vm1, %v184_v38 }
  0xe7   :  { %250 = vst.msk [vmem:[%s491_s3 + $0x68] sm:$0xff] %vm39_vm1, %v224_v39  ;;  %241 = vst.msk [vmem:[%s491_s3 + $0x20] sm:$0xff] %vm39_vm1, %v179_v42  ;;  %v308_v44 = vpop.f32.mrb[6].mxu0 }
  0xe8   :  { %249 = vst.msk [vmem:[%s491_s3 + $0x60] sm:$0xff] %vm39_vm1, %v219_v43  ;;  %v320_v45 = vpop.f32.mrb[6].mxu1  ;;  %v194_v46 = vadd.f32 %v308_v44, %v257_v19  ;;  %v188_v48 = vpop.f32.mrb[7].mxu0 }
  0xe9   :  { %v234_v47 = vadd.f32 %v320_v45, %v257_v19  ;;  %v228_v49 = vpop.f32.mrb[7].mxu1  ;;  %v189_v50 = vadd.f32 %v257_v19, %v188_v48 }
  0xea   :  { %v229_v51 = vadd.f32 %v257_v19, %v228_v49  ;;  %244 = vst.msk [vmem:[%s491_s3 + $0x38] sm:$0xff] %vm39_vm1, %v194_v46 }
  0xeb   :  { %252 = vst.msk [vmem:[%s491_s3 + $0x78] sm:$0xff] %vm39_vm1, %v234_v47  ;;  %243 = vst.msk [vmem:[%s491_s3 + $0x30] sm:$0xff] %vm39_vm1, %v189_v50 }
  0xec   :  { %251 = vst.msk [vmem:[%s491_s3 + $0x70] sm:$0xff] %vm39_vm1, %v229_v51 }

// kernel: skip_capsule_forward.15
= control target key start
LH: loop header
LB: loop body
LE: loop exit
PB: predicated region body
PF: predicated region fallthrough
CT: control target
= control target key end

     0   :  { %vm39_vm0 = vcmask 883712   ;;  %vm52_vm1 = vcmask 1043456   ;;  %vm253_vm2 = vmmov 1   ;;  %vm141_vm4 = vcmask 195584   ;;  %s347_s1 = inlined_call_operand.vmem [shape: f32[108,24], index: 1, kind: input, shape index: {}]   ;;  %s348_s0 = inlined_call_operand.vmem [shape: f32[32,108], index: 0, kind: input, shape index: {}]   ;;  %s349_s2 = inlined_call_operand.vmem [shape: f32[1,24], index: 2, kind: input, shape index: {}]   ;;  %s350_s3 = inlined_call_operand.vmem [shape: f32[32,24], index: 3, kind: output, shape index: {}]  }
   0x1   :  { %v18_v0 = vld [vmem:[%s347_s1] sm:$0xff]  ;;  %v19_v1 = vld [vmem:[%s347_s1 + $0x8] sm:$0xff]  ;;  %v20_v2 = vld [vmem:[%s347_s1 + $0x10] sm:$0xff] }
   0x2   :  { %v208_v3 = vpack.c.bf16 %v19_v1, %v18_v0  ;;  %v21_v4 = vld [vmem:[%s347_s1 + $0x18] sm:$0xff]  ;;  %v22_v6 = vld [vmem:[%s347_s1 + $0x20] sm:$0xff]  ;;  %v23_v7 = vld [vmem:[%s347_s1 + $0x28] sm:$0xff] }
   0x3   :  { %v212_v5 = vpack.c.bf16 %v21_v4, %v20_v2  ;;  %v216_v8 = vpack.c.bf16 %v23_v7, %v22_v6  ;;  %v14_v9 = vld [vmem:[%s348_s0] sm:$0xff]  ;;  %v16_v10 = vld [vmem:[%s348_s0 + $0x10] sm:$0xff]  ;;  %v25_v12 = vld [vmem:[%s347_s1 + $0x38] sm:$0xff] }
   0x4   :  { %209 = vmatprep.subr.bf16.mxu0 %v208_v3  ;;  %238 = vmatprep.subr.bf16.mxu1 %v208_v3  ;;  %v24_v11 = vld [vmem:[%s347_s1 + $0x30] sm:$0xff]  ;;  %v26_v14 = vld [vmem:[%s347_s1 + $0x40] sm:$0xff]  ;;  %v27_v15 = vld [vmem:[%s347_s1 + $0x48] sm:$0xff] }
   0x5   :  { %211 = vmatpush3.bf16.msra.mxu0 %v208_v3  ;;  %245 = vmatpush3.bf16.msra.mxu1 %v208_v3  ;;  %v220_v13 = vpack.c.bf16 %v25_v12, %v24_v11  ;;  %v224_v16 = vpack.c.bf16 %v27_v15, %v26_v14  ;;  %v28_v17 = vld [vmem:[%s347_s1 + $0x50] sm:$0xff]  ;;  %v29_v18 = vld [vmem:[%s347_s1 + $0x58] sm:$0xff]  ;;  %v30_v20 = vld [vmem:[%s347_s1 + $0x60] sm:$0xff] }
   0x6   :  { %213 = vmatprep.subr.bf16.mxu0 %v212_v5  ;;  %239 = vmatprep.subr.bf16.mxu1 %v212_v5  ;;  %v228_v19 = vpack.c.bf16 %v29_v18, %v28_v17  ;;  %v31_v21 = vld [vmem:[%s347_s1 + $0x68] sm:$0xf]  ;;  %vm233_vm3 = vmpackc.low %vm52_vm1, %vm253_vm2  ;;  %v17_v24 = vld [vmem:[%s348_s0 + $0x18] sm:$0xff] }
   0x7   :  { %202 = vmatprep.mubr.msk.f32.mxu0 %vm39_vm0, %v14_v9  ;;  %205 = vmatprep.mubr.msk.f32.mxu1 %vm39_vm0, %v16_v10  ;;  %v232_v22 = vpack.c.bf16 %v31_v21, %v30_v20  ;;  %v15_v23 = vld [vmem:[%s348_s0 + $0x8] sm:$0xff]  ;;  %v150_v25 = vld [vmem:[%s349_s2] ss:$0 sm:$0xff] }
   0x9   :  { %215 = vmatpush3.bf16.msra.mxu0 %v212_v5  ;;  %246 = vmatpush3.bf16.msra.mxu1 %v212_v5 }
   0xa   :  { %217 = vmatprep.subr.bf16.mxu0 %v216_v8  ;;  %240 = vmatprep.subr.bf16.mxu1 %v216_v8 }
   0xd   :  { %219 = vmatpush3.bf16.msra.mxu0 %v216_v8  ;;  %247 = vmatpush3.bf16.msra.mxu1 %v216_v8 }
   0xe   :  { %221 = vmatprep.subr.bf16.mxu0 %v220_v13  ;;  %241 = vmatprep.subr.bf16.mxu1 %v220_v13 }
  0x11   :  { %223 = vmatpush3.bf16.msra.mxu0 %v220_v13  ;;  %248 = vmatpush3.bf16.msra.mxu1 %v220_v13 }
  0x12   :  { %225 = vmatprep.subr.bf16.mxu0 %v224_v16  ;;  %242 = vmatprep.subr.bf16.mxu1 %v224_v16 }
  0x15   :  { %227 = vmatpush3.bf16.msra.mxu0 %v224_v16  ;;  %249 = vmatpush3.bf16.msra.mxu1 %v224_v16 }
  0x16   :  { %229 = vmatprep.subr.bf16.mxu0 %v228_v19  ;;  %243 = vmatprep.subr.bf16.mxu1 %v228_v19 }
  0x19   :  { %231 = vmatpush3.bf16.msra.mxu0 %v228_v19  ;;  %250 = vmatpush3.bf16.msra.mxu1 %v228_v19 }
  0x1a   :  { %234 = vmatprep.subr.msk.bf16.mxu0 %vm233_vm3, %v232_v22  ;;  %244 = vmatprep.subr.msk.bf16.mxu1 %vm233_vm3, %v232_v22 }
  0x1d   :  { %237 = vmatpush3.bf16.msk.msra.mxu0 %vm233_vm3, %v232_v22  ;;  %251 = vmatpush3.bf16.msk.msra.mxu1 %vm233_vm3, %v232_v22 }
  0x20   :  { %203 = vmatmul.mubr.msk.f32.vlgmr.msra.gmra.mrb[0].mxu0 %vm39_vm0, %v15_v23  ;;  %206 = vmatmul.mubr.msk.f32.vlgmr.msra.gmra.mrb[0].mxu1 %vm39_vm0, %v17_v24 }
  0xf3   :  { %v204_v26 = vpop.f32.mrb[0].mxu0  ;;  %v207_v27 = vpop.f32.mrb[0].mxu1 }
  0xf4   :  { %v128_v28 = vadd.f32 %v204_v26, %v150_v25  ;;  %v138_v29 = vadd.f32 %v207_v27, %v150_v25  ;;  %v122_v30 = vpop.f32.mrb[1].mxu0  ;;  %v132_v31 = vpop.f32.mrb[1].mxu1 }
  0xf5   :  { %v123_v32 = vadd.f32 %v150_v25, %v122_v30  ;;  %v133_v33 = vadd.f32 %v150_v25, %v132_v31 }
  0xf6   :  { %143 = vst.msk [vmem:[%s350_s3 + $0x8] sm:$0xff] %vm141_vm4, %v128_v28  ;;  %145 = vst.msk [vmem:[%s350_s3 + $0x18] sm:$0xff] %vm141_vm4, %v138_v29 }
  0xf7   :  { %142 = vst.msk [vmem:[%s350_s3] sm:$0xff] %vm141_vm4, %v123_v32  ;;  %144 = vst.msk [vmem:[%s350_s3 + $0x10] sm:$0xff] %vm141_vm4, %v133_v33 }

// kernel: skip_capsule_forward.16
= control target key start
LH: loop header
LB: loop body
LE: loop exit
PB: predicated region body
PF: predicated region fallthrough
CT: control target
= control target key end

     0   :  { %vm28_vm0 = vcmask 195584   ;;  %s230_s1 = inlined_call_operand.vmem [shape: f32[24,24], index: 1, kind: input, shape index: {}]   ;;  %s231_s0 = inlined_call_operand.vmem [shape: f32[32,24], index: 0, kind: input, shape index: {}]   ;;  %s232_s2 = inlined_call_operand.vmem [shape: f32[1,24], index: 2, kind: input, shape index: {}]   ;;  %s233_s3 = inlined_call_operand.vmem [shape: f32[32,24], index: 3, kind: output, shape index: {}]  }
   0x1   :  { %v18_v0 = vld [vmem:[%s230_s1] sm:$0xff]  ;;  %v19_v1 = vld [vmem:[%s230_s1 + $0x8] sm:$0xff]  ;;  %v16_v4 = vld [vmem:[%s231_s0 + $0x10] sm:$0xff] }
   0x2   :  { %v158_v2 = vpack.c.bf16 %v19_v1, %v18_v0  ;;  %v14_v3 = vld [vmem:[%s231_s0] sm:$0xff]  ;;  %v20_v5 = vld [vmem:[%s230_s1 + $0x10] sm:$0xff]  ;;  %155 = vmatprep.mubr.msk.f32.mxu1 %vm28_vm0, %v16_v4  ;;  %v15_v6 = vld [vmem:[%s231_s0 + $0x8] sm:$0xff] }
   0x3   :  { %152 = vmatprep.mubr.msk.f32.mxu0 %vm28_vm0, %v14_v3  ;;  %v17_v7 = vld [vmem:[%s231_s0 + $0x18] sm:$0xff]  ;;  %v134_v8 = vld [vmem:[%s232_s2] ss:$0 sm:$0xff] }
   0x4   :  { %159 = vmatprep.subr.bf16.mxu0 %v158_v2  ;;  %162 = vmatprep.subr.bf16.mxu1 %v158_v2 }
   0x5   :  { %161 = vmatpush3.bf16.msra.mxu0 %v158_v2  ;;  %164 = vmatpush3.bf16.msra.mxu1 %v158_v2 }
   0x6   :  { %150 = vmatprep.subr.mxu0 %v20_v5  ;;  %163 = vmatprep.subr.mxu1 %v20_v5 }
   0x9   :  { %151 = vmatpush3.msra.mxu0 %v20_v5  ;;  %165 = vmatpush3.msra.mxu1 %v20_v5 }
   0xa   :  { %153 = vmatmul.mubr.msk.f32.vlgmr.msra.gmra.mrb[0].mxu0 %vm28_vm0, %v15_v6  ;;  %156 = vmatmul.mubr.msk.f32.vlgmr.msra.gmra.mrb[0].mxu1 %vm28_vm0, %v17_v7 }
  0xdd   :  { %v154_v9 = vpop.f32.mrb[0].mxu0  ;;  %v157_v10 = vpop.f32.mrb[0].mxu1 }
  0xde   :  { %v113_v11 = vadd.f32 %v154_v9, %v134_v8  ;;  %v123_v12 = vadd.f32 %v157_v10, %v134_v8  ;;  %v107_v13 = vpop.f32.mrb[1].mxu0  ;;  %v117_v14 = vpop.f32.mrb[1].mxu1 }
  0xdf   :  { %v108_v15 = vadd.f32 %v134_v8, %v107_v13  ;;  %v118_v16 = vadd.f32 %v134_v8, %v117_v14 }
  0xe0   :  { %127 = vst.msk [vmem:[%s233_s3 + $0x8] sm:$0xff] %vm28_vm0, %v113_v11  ;;  %129 = vst.msk [vmem:[%s233_s3 + $0x18] sm:$0xff] %vm28_vm0, %v123_v12 }
  0xe1   :  { %126 = vst.msk [vmem:[%s233_s3] sm:$0xff] %vm28_vm0, %v108_v15  ;;  %128 = vst.msk [vmem:[%s233_s3 + $0x10] sm:$0xff] %vm28_vm0, %v118_v16 }

// kernel: mul.279
= control target key start
LH: loop header
LB: loop body
LE: loop exit
PB: predicated region body
PF: predicated region fallthrough
CT: control target
= control target key end

     0   :  { %s82_s0 = inlined_call_operand.vmem [shape: f32[2,8,8,2], index: 0, kind: input, shape index: {}]   ;;  %s83_s1 = inlined_call_operand.vmem [shape: f32[2,8,8,2,2], index: 1, kind: output, shape index: {}]  }
   0x1   :  { %v4_v0 = vld [vmem:[%s82_s0] sm:$0xff]  ;;  %v26_v1 = vld [vmem:[%s82_s0 + $0x10] sm:$0xff]  ;;  %v28_v2 = vld [vmem:[%s82_s0 + $0x8] sm:$0xff] }
   0x2   :  { %5 = vst [vmem:[%s83_s1] sm:$0xff] %v4_v0  ;;  %27 = vst [vmem:[%s83_s1 + $0x20] sm:$0xff] %v26_v1  ;;  %v30_v3 = vld [vmem:[%s82_s0 + $0x18] sm:$0xff] }
   0x3   :  { %29 = vst [vmem:[%s83_s1 + $0x10] sm:$0xff] %v28_v2  ;;  %32 = vst [vmem:[%s83_s1 + $0x8] sm:$0xff] %v4_v0 }
   0x4   :  { %33 = vst [vmem:[%s83_s1 + $0x28] sm:$0xff] %v26_v1  ;;  %34 = vst [vmem:[%s83_s1 + $0x18] sm:$0xff] %v28_v2 }
   0x5   :  { %31 = vst [vmem:[%s83_s1 + $0x30] sm:$0xff] %v30_v3  ;;  %35 = vst [vmem:[%s83_s1 + $0x38] sm:$0xff] %v30_v3 }

// kernel: skip_capsule_forward.17
= control target key start
LH: loop header
LB: loop body
LE: loop exit
PB: predicated region body
PF: predicated region fallthrough
CT: control target
= control target key end

     0   :  { %vm88_vm0 = vcmask 1043456   ;;  %vm39_vm1 = vcmask 97280   ;;  %vm331_vm2 = vmmov 1   ;;  %vm237_vm4 = vcmask 48128   ;;  %s489_s1 = inlined_call_operand.vmem [shape: f32[12,6], index: 1, kind: input, shape index: {}]   ;;  %s490_s0 = inlined_call_operand.vmem [shape: f32[128,12], index: 0, kind: input, shape index: {}]   ;;  %s491_s2 = inlined_call_operand.vmem [shape: f32[1,6], index: 2, kind: input, shape index: {}]   ;;  %s492_s3 = inlined_call_operand.vmem [shape: f32[128,6], index: 3, kind: output, shape index: {}]  }
   0x1   :  { %v30_v0 = vld [vmem:[%s489_s1] sm:$0xff]  ;;  %v31_v1 = vld [vmem:[%s489_s1 + $0x8] sm:$0xf]  ;;  %vm323_vm3 = vmpackc.low %vm88_vm0, %vm331_vm2 }
   0x2   :  { %v322_v2 = vpack.c.bf16 %v31_v1, %v30_v0  ;;  %v14_v3 = vld [vmem:[%s490_s0] sm:$0xff]  ;;  %v15_v5 = vld [vmem:[%s490_s0 + $0x8] sm:$0xff]  ;;  %v16_v7 = vld [vmem:[%s490_s0 + $0x10] sm:$0xff] }
   0x3   :  { %v22_v4 = vld [vmem:[%s490_s0 + $0x40] sm:$0xff]  ;;  %298 = vmatprep.mubr.msk.f32.mxu0 %vm39_vm1, %v14_v3  ;;  %v23_v6 = vld [vmem:[%s490_s0 + $0x48] sm:$0xff]  ;;  %v24_v8 = vld [vmem:[%s490_s0 + $0x50] sm:$0xff] }
   0x4   :  { %310 = vmatprep.mubr.msk.f32.mxu1 %vm39_vm1, %v22_v4  ;;  %324 = vmatprep.subr.msk.bf16.mxu0 %vm323_vm3, %v322_v2  ;;  %v17_v9 = vld [vmem:[%s490_s0 + $0x18] sm:$0xff]  ;;  %v18_v11 = vld [vmem:[%s490_s0 + $0x20] sm:$0xff]  ;;  %v19_v13 = vld [vmem:[%s490_s0 + $0x28] sm:$0xff] }
   0x5   :  { %328 = vmatprep.subr.msk.bf16.mxu1 %vm323_vm3, %v322_v2  ;;  %327 = vmatpush3.bf16.msk.msra.mxu0 %vm323_vm3, %v322_v2  ;;  %v25_v10 = vld [vmem:[%s490_s0 + $0x58] sm:$0xff]  ;;  %v26_v12 = vld [vmem:[%s490_s0 + $0x60] sm:$0xff]  ;;  %v27_v14 = vld [vmem:[%s490_s0 + $0x68] sm:$0xff] }
   0x6   :  { %329 = vmatpush3.bf16.msk.msra.mxu1 %vm323_vm3, %v322_v2  ;;  %v20_v15 = vld [vmem:[%s490_s0 + $0x30] sm:$0xff]  ;;  %v21_v17 = vld [vmem:[%s490_s0 + $0x38] sm:$0xff]  ;;  %v258_v19 = vld [vmem:[%s491_s2] ss:$0 sm:$0xff] }
   0x7   :  { %v28_v16 = vld [vmem:[%s490_s0 + $0x70] sm:$0xff]  ;;  %v29_v18 = vld [vmem:[%s490_s0 + $0x78] sm:$0xff] }
   0x8   :  { %299 = vmatmul.mubr.msk.f32.vlgmr.msra.gmra.mrb[0].mxu0 %vm39_vm1, %v15_v5 }
   0x9   :  { %311 = vmatmul.mubr.msk.f32.vlgmr.msra.gmra.mrb[0].mxu1 %vm39_vm1, %v23_v6  ;;  %301 = vmatprep.mubr.msk.f32.mxu0 %vm39_vm1, %v16_v7 }
   0xa   :  { %313 = vmatprep.mubr.msk.f32.mxu1 %vm39_vm1, %v24_v8 }
   0xc   :  { %302 = vmatmul.mubr.msk.f32.gmra.mrb[2].mxu0 %vm39_vm1, %v17_v9 }
   0xd   :  { %314 = vmatmul.mubr.msk.f32.gmra.mrb[2].mxu1 %vm39_vm1, %v25_v10  ;;  %304 = vmatprep.mubr.msk.f32.mxu0 %vm39_vm1, %v18_v11 }
   0xe   :  { %316 = vmatprep.mubr.msk.f32.mxu1 %vm39_vm1, %v26_v12 }
  0x10   :  { %305 = vmatmul.mubr.msk.f32.gmra.mrb[4].mxu0 %vm39_vm1, %v19_v13 }
  0x11   :  { %317 = vmatmul.mubr.msk.f32.gmra.mrb[4].mxu1 %vm39_vm1, %v27_v14  ;;  %307 = vmatprep.mubr.msk.f32.mxu0 %vm39_vm1, %v20_v15 }
  0x12   :  { %319 = vmatprep.mubr.msk.f32.mxu1 %vm39_vm1, %v28_v16 }
  0x14   :  { %308 = vmatmul.mubr.msk.f32.gmra.mrb[6].mxu0 %vm39_vm1, %v21_v17 }
  0x15   :  { %320 = vmatmul.mubr.msk.f32.gmra.mrb[6].mxu1 %vm39_vm1, %v29_v18 }
  0xdb   :  { %v300_v20 = vpop.f32.mrb[0].mxu0 }
  0xdc   :  { %v312_v21 = vpop.f32.mrb[0].mxu1  ;;  %v164_v22 = vadd.f32 %v300_v20, %v258_v19  ;;  %v158_v24 = vpop.f32.mrb[1].mxu0 }
  0xdd   :  { %v204_v23 = vadd.f32 %v312_v21, %v258_v19  ;;  %v198_v25 = vpop.f32.mrb[1].mxu1  ;;  %v159_v26 = vadd.f32 %v258_v19, %v158_v24 }
  0xde   :  { %v199_v27 = vadd.f32 %v258_v19, %v198_v25  ;;  %239 = vst.msk [vmem:[%s492_s3 + $0x8] sm:$0xff] %vm237_vm4, %v164_v22 }
  0xdf   :  { %247 = vst.msk [vmem:[%s492_s3 + $0x48] sm:$0xff] %vm237_vm4, %v204_v23  ;;  %238 = vst.msk [vmem:[%s492_s3] sm:$0xff] %vm237_vm4, %v159_v26  ;;  %v303_v28 = vpop.f32.mrb[2].mxu0 }
  0xe0   :  { %246 = vst.msk [vmem:[%s492_s3 + $0x40] sm:$0xff] %vm237_vm4, %v199_v27  ;;  %v315_v29 = vpop.f32.mrb[2].mxu1  ;;  %v174_v30 = vadd.f32 %v303_v28, %v258_v19  ;;  %v168_v32 = vpop.f32.mrb[3].mxu0 }
  0xe1   :  { %v214_v31 = vadd.f32 %v315_v29, %v258_v19  ;;  %v208_v33 = vpop.f32.mrb[3].mxu1  ;;  %v169_v34 = vadd.f32 %v258_v19, %v168_v32 }
  0xe2   :  { %v209_v35 = vadd.f32 %v258_v19, %v208_v33  ;;  %241 = vst.msk [vmem:[%s492_s3 + $0x18] sm:$0xff] %vm237_vm4, %v174_v30 }
  0xe3   :  { %249 = vst.msk [vmem:[%s492_s3 + $0x58] sm:$0xff] %vm237_vm4, %v214_v31  ;;  %240 = vst.msk [vmem:[%s492_s3 + $0x10] sm:$0xff] %vm237_vm4, %v169_v34  ;;  %v306_v36 = vpop.f32.mrb[4].mxu0 }
  0xe4   :  { %248 = vst.msk [vmem:[%s492_s3 + $0x50] sm:$0xff] %vm237_vm4, %v209_v35  ;;  %v318_v37 = vpop.f32.mrb[4].mxu1  ;;  %v184_v38 = vadd.f32 %v306_v36, %v258_v19  ;;  %v178_v40 = vpop.f32.mrb[5].mxu0 }
  0xe5   :  { %v224_v39 = vadd.f32 %v318_v37, %v258_v19  ;;  %v218_v41 = vpop.f32.mrb[5].mxu1  ;;  %v179_v42 = vadd.f32 %v258_v19, %v178_v40 }
  0xe6   :  { %v219_v43 = vadd.f32 %v258_v19, %v218_v41  ;;  %243 = vst.msk [vmem:[%s492_s3 + $0x28] sm:$0xff] %vm237_vm4, %v184_v38 }
  0xe7   :  { %251 = vst.msk [vmem:[%s492_s3 + $0x68] sm:$0xff] %vm237_vm4, %v224_v39  ;;  %242 = vst.msk [vmem:[%s492_s3 + $0x20] sm:$0xff] %vm237_vm4, %v179_v42  ;;  %v309_v44 = vpop.f32.mrb[6].mxu0 }
  0xe8   :  { %250 = vst.msk [vmem:[%s492_s3 + $0x60] sm:$0xff] %vm237_vm4, %v219_v43  ;;  %v321_v45 = vpop.f32.mrb[6].mxu1  ;;  %v194_v46 = vadd.f32 %v309_v44, %v258_v19  ;;  %v188_v48 = vpop.f32.mrb[7].mxu0 }
  0xe9   :  { %v234_v47 = vadd.f32 %v321_v45, %v258_v19  ;;  %v228_v49 = vpop.f32.mrb[7].mxu1  ;;  %v189_v50 = vadd.f32 %v258_v19, %v188_v48 }
  0xea   :  { %v229_v51 = vadd.f32 %v258_v19, %v228_v49  ;;  %245 = vst.msk [vmem:[%s492_s3 + $0x38] sm:$0xff] %vm237_vm4, %v194_v46 }
  0xeb   :  { %253 = vst.msk [vmem:[%s492_s3 + $0x78] sm:$0xff] %vm237_vm4, %v234_v47  ;;  %244 = vst.msk [vmem:[%s492_s3 + $0x30] sm:$0xff] %vm237_vm4, %v189_v50 }
  0xec   :  { %252 = vst.msk [vmem:[%s492_s3 + $0x70] sm:$0xff] %vm237_vm4, %v229_v51 }

// kernel: skip_capsule_forward.18
= control target key start
LH: loop header
LB: loop body
LE: loop exit
PB: predicated region body
PF: predicated region fallthrough
CT: control target
= control target key end

     0   :  { %vm152_vm0 = vcmask 1045504   ;;  %vm666_vm1 = vmmov 1   ;;  %vm103_vm3 = vcmask 113664   ;;  %vm446_vm4 = vcmask 195584   ;;  %s1046_s1 = inlined_call_operand.vmem [shape: f32[270,24], index: 1, kind: input, shape index: {}]   ;;  %s1047_s0 = inlined_call_operand.vmem [shape: f32[128,270], index: 0, kind: input, shape index: {}]   ;;  %s1048_s2 = inlined_call_operand.vmem [shape: f32[1,24], index: 2, kind: input, shape index: {}]   ;;  %s1049_s3 = inlined_call_operand.vmem [shape: f32[128,24], index: 3, kind: output, shape index: {}]  }
   0x1   :  { %v78_v0 = vld [vmem:[%s1046_s1 + $0x80] sm:$0xff]  ;;  %v79_v1 = vld [vmem:[%s1046_s1 + $0x88] sm:$0xff]  ;;  %v80_v5 = vld [vmem:[%s1046_s1 + $0x90] sm:$0xff] }
   0x2   :  { %v62_v2 = vld [vmem:[%s1046_s1] sm:$0xff]  ;;  %v611_v3 = vpack.c.bf16 %v79_v1, %v78_v0  ;;  %v63_v4 = vld [vmem:[%s1046_s1 + $0x8] sm:$0xff]  ;;  %v81_v6 = vld [vmem:[%s1046_s1 + $0x98] sm:$0xff] }
   0x3   :  { %v613_v7 = vpack.c.bf16 %v63_v4, %v62_v2  ;;  %v615_v8 = vpack.c.bf16 %v81_v6, %v80_v5  ;;  %v64_v9 = vld [vmem:[%s1046_s1 + $0x10] sm:$0xff]  ;;  %v65_v10 = vld [vmem:[%s1046_s1 + $0x18] sm:$0xff]  ;;  %v82_v11 = vld [vmem:[%s1046_s1 + $0xa0] sm:$0xff] }
   0x4   :  { %612 = vmatprep.subr.bf16.mxu0 %v611_v3  ;;  %649 = vmatprep.subr.bf16.mxu1 %v611_v3  ;;  %v83_v12 = vld [vmem:[%s1046_s1 + $0xa8] sm:$0xff]  ;;  %v617_v13 = vpack.c.bf16 %v65_v10, %v64_v9  ;;  %v66_v15 = vld [vmem:[%s1046_s1 + $0x20] sm:$0xff]  ;;  %v84_v17 = vld [vmem:[%s1046_s1 + $0xb0] sm:$0xff] }
   0x5   :  { %614 = vmatpush3.bf16.msra.mxu0 %v613_v7  ;;  %657 = vmatpush3.bf16.msra.mxu1 %v613_v7  ;;  %v619_v14 = vpack.c.bf16 %v83_v12, %v82_v11  ;;  %v67_v16 = vld [vmem:[%s1046_s1 + $0x28] sm:$0xff]  ;;  %v85_v18 = vld [vmem:[%s1046_s1 + $0xb8] sm:$0xff]  ;;  %v68_v21 = vld [vmem:[%s1046_s1 + $0x30] sm:$0xff] }
   0x6   :  { %616 = vmatprep.subr.bf16.mxu0 %v615_v8  ;;  %650 = vmatprep.subr.bf16.mxu1 %v615_v8  ;;  %v621_v19 = vpack.c.bf16 %v67_v16, %v66_v15  ;;  %v623_v20 = vpack.c.bf16 %v85_v18, %v84_v17  ;;  %v69_v22 = vld [vmem:[%s1046_s1 + $0x38] sm:$0xff]  ;;  %v86_v23 = vld [vmem:[%s1046_s1 + $0xc0] sm:$0xff]  ;;  %v87_v24 = vld [vmem:[%s1046_s1 + $0xc8] sm:$0xff] }
   0x7   :  { %v15_v25 = vld [vmem:[%s1047_s0 + $0x8] sm:$0xff]  ;;  %v625_v27 = vpack.c.bf16 %v69_v22, %v68_v21  ;;  %v627_v28 = vpack.c.bf16 %v87_v24, %v86_v23  ;;  %v70_v29 = vld [vmem:[%s1046_s1 + $0x40] sm:$0xff]  ;;  %v88_v31 = vld [vmem:[%s1046_s1 + $0xd0] sm:$0xff] }
   0x8   :  { %220 = vmatprep.mubr.f32.mxu0 %v15_v25  ;;  %v51_v26 = vld [vmem:[%s1047_s0 + $0x128] sm:$0xff]  ;;  %v89_v32 = vld [vmem:[%s1046_s1 + $0xd8] sm:$0xff]  ;;  %v72_v35 = vld [vmem:[%s1046_s1 + $0x50] sm:$0xff] }
   0x9   :  { %618 = vmatpush3.bf16.msra.mxu0 %v617_v13  ;;  %658 = vmatpush3.bf16.msra.mxu1 %v617_v13  ;;  %v71_v30 = vld [vmem:[%s1046_s1 + $0x48] sm:$0xff]  ;;  %v631_v34 = vpack.c.bf16 %v89_v32, %v88_v31  ;;  %v73_v36 = vld [vmem:[%s1046_s1 + $0x58] sm:$0xff]  ;;  %v90_v37 = vld [vmem:[%s1046_s1 + $0xe0] sm:$0xff] }
   0xa   :  { %620 = vmatprep.subr.bf16.mxu0 %v619_v14  ;;  %651 = vmatprep.subr.bf16.mxu1 %v619_v14  ;;  %v629_v33 = vpack.c.bf16 %v71_v30, %v70_v29  ;;  %v91_v38 = vld [vmem:[%s1046_s1 + $0xe8] sm:$0xff]  ;;  %v633_v39 = vpack.c.bf16 %v73_v36, %v72_v35  ;;  %v74_v41 = vld [vmem:[%s1046_s1 + $0x60] sm:$0xff]  ;;  %v92_v43 = vld [vmem:[%s1046_s1 + $0xf0] sm:$0xff] }
   0xb   :  { %280 = vmatprep.mubr.f32.mxu1 %v51_v26  ;;  %v635_v40 = vpack.c.bf16 %v91_v38, %v90_v37  ;;  %v75_v42 = vld [vmem:[%s1046_s1 + $0x68] sm:$0xff]  ;;  %v93_v44 = vld [vmem:[%s1046_s1 + $0xf8] sm:$0xff]  ;;  %v76_v47 = vld [vmem:[%s1046_s1 + $0x70] sm:$0xff] }
   0xc   :  { %v637_v45 = vpack.c.bf16 %v75_v42, %v74_v41  ;;  %v639_v46 = vpack.c.bf16 %v93_v44, %v92_v43  ;;  %v77_v48 = vld [vmem:[%s1046_s1 + $0x78] sm:$0xff]  ;;  %v94_v49 = vld [vmem:[%s1046_s1 + $0x100] sm:$0xff]  ;;  %v95_v50 = vld [vmem:[%s1046_s1 + $0x108] sm:$0x3f] }
   0xd   :  { %622 = vmatpush3.bf16.msra.mxu0 %v621_v19  ;;  %659 = vmatpush3.bf16.msra.mxu1 %v621_v19  ;;  %v641_v51 = vpack.c.bf16 %v77_v48, %v76_v47  ;;  %v643_v52 = vpack.c.bf16 %v95_v50, %v94_v49  ;;  %vm644_vm2 = vmpackc.low %vm152_vm0, %vm666_vm1  ;;  %v14_v53 = vld [vmem:[%s1047_s0] sm:$0xff]  ;;  %v17_v57 = vld [vmem:[%s1047_s0 + $0x18] sm:$0xff] }
   0xe   :  { %624 = vmatprep.subr.bf16.mxu0 %v623_v20  ;;  %652 = vmatprep.subr.bf16.mxu1 %v623_v20  ;;  %v50_v54 = vld [vmem:[%s1047_s0 + $0x120] sm:$0xff]  ;;  %v53_v58 = vld [vmem:[%s1047_s0 + $0x138] sm:$0xff]  ;;  %v20_v61 = vld [vmem:[%s1047_s0 + $0x30] sm:$0xff] }
   0xf   :  { %v18_v55 = vld [vmem:[%s1047_s0 + $0x20] sm:$0xff]  ;;  %v21_v59 = vld [vmem:[%s1047_s0 + $0x38] sm:$0xff]  ;;  %v56_v62 = vld [vmem:[%s1047_s0 + $0x150] sm:$0xff] }
  0x10   :  { %v54_v56 = vld [vmem:[%s1047_s0 + $0x140] sm:$0xff]  ;;  %v57_v60 = vld [vmem:[%s1047_s0 + $0x158] sm:$0xff]  ;;  %v24_v63 = vld [vmem:[%s1047_s0 + $0x50] sm:$0xff] }
  0x11   :  { %626 = vmatpush3.bf16.msra.mxu0 %v625_v27  ;;  %660 = vmatpush3.bf16.msra.mxu1 %v625_v27  ;;  %v60_v0 = vld [vmem:[%s1047_s0 + $0x170] sm:$0xff]  ;;  %v23_v1 = vld [vmem:[%s1047_s0 + $0x48] sm:$0xff]  ;;  %v26_v5 = vld [vmem:[%s1047_s0 + $0x60] sm:$0xff] }
  0x12   :  { %628 = vmatprep.subr.bf16.mxu0 %v627_v28  ;;  %653 = vmatprep.subr.bf16.mxu1 %v627_v28  ;;  %v59_v2 = vld [vmem:[%s1047_s0 + $0x168] sm:$0xff]  ;;  %v16_v4 = vld [vmem:[%s1047_s0 + $0x10] sm:$0xff]  ;;  %v30_v7 = vld [vmem:[%s1047_s0 + $0x80] sm:$0xff] }
  0x13   :  { %v27_v3 = vld [vmem:[%s1047_s0 + $0x68] sm:$0xff]  ;;  %v22_v8 = vld [vmem:[%s1047_s0 + $0x40] sm:$0xff]  ;;  %v29_v9 = vld [vmem:[%s1047_s0 + $0x78] sm:$0xff] }
  0x14   :  { %v19_v6 = vld [vmem:[%s1047_s0 + $0x28] sm:$0xff]  ;;  %v25_v10 = vld [vmem:[%s1047_s0 + $0x58] sm:$0xff]  ;;  %v28_v12 = vld [vmem:[%s1047_s0 + $0x70] sm:$0xff] }
  0x15   :  { %630 = vmatpush3.bf16.msra.mxu0 %v629_v33  ;;  %661 = vmatpush3.bf16.msra.mxu1 %v629_v33  ;;  %v33_v11 = vld [vmem:[%s1047_s0 + $0x98] sm:$0xff]  ;;  %v32_v13 = vld [vmem:[%s1047_s0 + $0x90] sm:$0xff]  ;;  %v31_v14 = vld [vmem:[%s1047_s0 + $0x88] sm:$0xff] }
  0x16   :  { %632 = vmatprep.subr.bf16.mxu0 %v631_v34  ;;  %654 = vmatprep.subr.bf16.mxu1 %v631_v34  ;;  %v36_v15 = vld [vmem:[%s1047_s0 + $0xb0] sm:$0xff]  ;;  %v34_v16 = vld [vmem:[%s1047_s0 + $0xa0] sm:$0xff]  ;;  %v35_v17 = vld [vmem:[%s1047_s0 + $0xa8] sm:$0xff] }
  0x17   :  { %v37_v18 = vld [vmem:[%s1047_s0 + $0xb8] sm:$0xff]  ;;  %v39_v19 = vld [vmem:[%s1047_s0 + $0xc8] sm:$0xff]  ;;  %v40_v20 = vld [vmem:[%s1047_s0 + $0xd0] sm:$0xff] }
  0x18   :  { %v38_v21 = vld [vmem:[%s1047_s0 + $0xc0] sm:$0xff]  ;;  %v43_v22 = vld [vmem:[%s1047_s0 + $0xe8] sm:$0xff]  ;;  %v41_v25 = vld [vmem:[%s1047_s0 + $0xd8] sm:$0xff] }
  0x19   :  { %634 = vmatpush3.bf16.msra.mxu0 %v633_v39  ;;  %662 = vmatpush3.bf16.msra.mxu1 %v633_v39  ;;  %v42_v23 = vld [vmem:[%s1047_s0 + $0xe0] sm:$0xff]  ;;  %v49_v26 = vld [vmem:[%s1047_s0 + $0x118] sm:$0xff]  ;;  %v52_v28 = vld [vmem:[%s1047_s0 + $0x130] sm:$0xff] }
  0x1a   :  { %636 = vmatprep.subr.bf16.mxu0 %v635_v40  ;;  %655 = vmatprep.subr.bf16.mxu1 %v635_v40  ;;  %v46_v24 = vld [vmem:[%s1047_s0 + $0x100] sm:$0xff]  ;;  %v45_v27 = vld [vmem:[%s1047_s0 + $0xf8] sm:$0xff]  ;;  %v44_v29 = vld [vmem:[%s1047_s0 + $0xf0] sm:$0xff] }
  0x1b   :  { %v55_v30 = vld [vmem:[%s1047_s0 + $0x148] sm:$0xff]  ;;  %v48_v31 = vld [vmem:[%s1047_s0 + $0x110] sm:$0xff]  ;;  %v58_v32 = vld [vmem:[%s1047_s0 + $0x160] sm:$0xff] }
  0x1c   :  { %v47_v33 = vld [vmem:[%s1047_s0 + $0x108] sm:$0xff]  ;;  %v61_v34 = vld [vmem:[%s1047_s0 + $0x178] sm:$0xff] }
  0x1d   :  { %638 = vmatpush3.bf16.msra.mxu0 %v637_v45  ;;  %663 = vmatpush3.bf16.msra.mxu1 %v637_v45 }
  0x1e   :  { %640 = vmatprep.subr.bf16.mxu0 %v639_v46  ;;  %656 = vmatprep.subr.bf16.mxu1 %v639_v46 }
  0x21   :  { %642 = vmatpush3.bf16.msra.mxu0 %v641_v51  ;;  %664 = vmatpush3.bf16.msra.mxu1 %v641_v51 }
  0x22   :  { %645 = vmatprep.subr.msk.bf16.mxu1 %vm644_vm2, %v643_v52 }
  0x24   :  { %221 = vmatmul.mubr.f32.vlgmr.msra.gmra.mrb[0].mxu0 %v14_v53  ;;  %281 = vmatmul.mubr.f32.vlgmr.msra.gmra.mrb[0].mxu1 %v50_v54 }
  0x25   :  { %225 = vmatprep.mubr.f32.mxu0 %v18_v55  ;;  %285 = vmatprep.mubr.f32.mxu1 %v54_v56 }
  0x26   :  { %648 = vmatpush3.bf16.msk.msra.mxu1 %vm644_vm2, %v643_v52 }
  0x28   :  { %226 = vmatmul.mubr.f32.gmra.mrb[2].mxu0 %v17_v57  ;;  %286 = vmatmul.mubr.f32.gmra.mrb[2].mxu1 %v53_v58  ;;  %v958_v57 = vld [vmem:[%s1048_s2] ss:$0 sm:$0xff] }
  0x29   :  { %230 = vmatprep.mubr.f32.mxu0 %v21_v59  ;;  %290 = vmatprep.mubr.f32.mxu1 %v57_v60 }
  0x2c   :  { %231 = vmatmul.mubr.f32.gmra.mrb[4].mxu0 %v20_v61  ;;  %291 = vmatmul.mubr.f32.gmra.mrb[4].mxu1 %v56_v62 }
  0x2d   :  { %235 = vmatprep.mubr.f32.mxu0 %v24_v63  ;;  %295 = vmatprep.mubr.f32.mxu1 %v60_v0 }
  0x30   :  { %236 = vmatmul.mubr.f32.gmra.mrb[6].mxu0 %v23_v1  ;;  %296 = vmatmul.mubr.f32.gmra.mrb[6].mxu1 %v59_v2 }
  0x31   :  { %240 = vmatprep.mubr.f32.mxu0 %v27_v3  ;;  %587 = vmatprep.mubr.msk.f32.mxu1 %vm103_vm3, %v16_v4 }
  0x34   :  { %241 = vmatmul.mubr.f32.gmra.mrb[8].mxu0 %v26_v5  ;;  %588 = vmatmul.mubr.msk.f32.vlgmr.msra.gmra.mrb[8].mxu1 %vm103_vm3, %v19_v6 }
  0x35   :  { %245 = vmatprep.mubr.f32.mxu0 %v30_v7  ;;  %590 = vmatprep.mubr.msk.f32.mxu1 %vm103_vm3, %v22_v8 }
  0x38   :  { %246 = vmatmul.mubr.f32.gmra.mrb[10].mxu0 %v29_v9  ;;  %591 = vmatmul.mubr.msk.f32.gmra.mrb[10].mxu1 %vm103_vm3, %v25_v10 }
  0x39   :  { %250 = vmatprep.mubr.f32.mxu0 %v33_v11  ;;  %593 = vmatprep.mubr.msk.f32.mxu1 %vm103_vm3, %v28_v12 }
  0x3c   :  { %251 = vmatmul.mubr.f32.gmra.mrb[12].mxu0 %v32_v13  ;;  %594 = vmatmul.mubr.msk.f32.gmra.mrb[12].mxu1 %vm103_vm3, %v31_v14 }
  0x3d   :  { %255 = vmatprep.mubr.f32.mxu0 %v36_v15  ;;  %596 = vmatprep.mubr.msk.f32.mxu1 %vm103_vm3, %v34_v16 }
  0x40   :  { %256 = vmatmul.mubr.f32.gmra.mrb[14].mxu0 %v35_v17  ;;  %597 = vmatmul.mubr.msk.f32.gmra.mrb[14].mxu1 %vm103_vm3, %v37_v18 }
  0x41   :  { %260 = vmatprep.mubr.f32.mxu0 %v39_v19  ;;  %599 = vmatprep.mubr.msk.f32.mxu1 %vm103_vm3, %v40_v20 }
  0x44   :  { %261 = vmatmul.mubr.f32.gmra.mrb[16].mxu0 %v38_v21  ;;  %600 = vmatmul.mubr.msk.f32.gmra.mrb[16].mxu1 %vm103_vm3, %v43_v22 }
  0x45   :  { %265 = vmatprep.mubr.f32.mxu0 %v42_v23  ;;  %602 = vmatprep.mubr.msk.f32.mxu1 %vm103_vm3, %v46_v24 }
  0x48   :  { %266 = vmatmul.mubr.f32.gmra.mrb[18].mxu0 %v41_v25  ;;  %603 = vmatmul.mubr.msk.f32.gmra.mrb[18].mxu1 %vm103_vm3, %v49_v26 }
  0x49   :  { %270 = vmatprep.mubr.f32.mxu0 %v45_v27  ;;  %605 = vmatprep.mubr.msk.f32.mxu1 %vm103_vm3, %v52_v28 }
  0x4c   :  { %271 = vmatmul.mubr.f32.gmra.mrb[20].mxu0 %v44_v29  ;;  %606 = vmatmul.mubr.msk.f32.gmra.mrb[20].mxu1 %vm103_vm3, %v55_v30 }
  0x4d   :  { %275 = vmatprep.mubr.f32.mxu0 %v48_v31  ;;  %608 = vmatprep.mubr.msk.f32.mxu1 %vm103_vm3, %v58_v32 }
  0x50   :  { %276 = vmatmul.mubr.f32.gmra.mrb[22].mxu0 %v47_v33  ;;  %609 = vmatmul.mubr.msk.f32.gmra.mrb[22].mxu1 %vm103_vm3, %v61_v34 }
  0xf7   :  { %v517_v35 = vpop.f32.mrb[0].mxu0  ;;  %v553_v36 = vpop.f32.mrb[0].mxu1 }
  0xf8   :  { %v518_v37 = vpop.f32.mrb[1].mxu0  ;;  %v554_v38 = vpop.f32.mrb[1].mxu1 }
  0xf9   :  { %v519_v39 = vadd.f32 %v518_v37, %v517_v35  ;;  %v949_v40 = vadd.f32 %v554_v38, %v553_v36 }
  0xfb   :  { %v520_v41 = vpop.f32.mrb[2].mxu0  ;;  %v556_v42 = vpop.f32.mrb[2].mxu1  ;;  %v223_v63 = vadd.f32 %v519_v39, %v958_v57 }
  0xfc   :  { %v521_v43 = vpop.f32.mrb[3].mxu0  ;;  %v557_v44 = vpop.f32.mrb[3].mxu1 }
  0xfd   :  { %v522_v45 = vadd.f32 %v521_v43, %v520_v41  ;;  %v951_v46 = vadd.f32 %v557_v44, %v556_v42 }
  0xff   :  { %v523_v47 = vpop.f32.mrb[4].mxu0  ;;  %v559_v48 = vpop.f32.mrb[4].mxu1  ;;  %v228_v60 = vadd.f32 %v522_v45, %v958_v57  ;;  %v288_v45 = vadd.f32 %v951_v46, %v958_v57 }
 0x100   :  { %v524_v49 = vpop.f32.mrb[5].mxu0  ;;  %v560_v50 = vpop.f32.mrb[5].mxu1 }
 0x101   :  { %v525_v51 = vadd.f32 %v524_v49, %v523_v47  ;;  %v953_v52 = vadd.f32 %v560_v50, %v559_v48  ;;  %v283_v50 = vadd.f32 %v949_v40, %v958_v57 }
 0x103   :  { %v526_v53 = vpop.f32.mrb[6].mxu0  ;;  %v562_v54 = vpop.f32.mrb[6].mxu1  ;;  %v233_v8 = vadd.f32 %v525_v51, %v958_v57 }
 0x104   :  { %v527_v55 = vpop.f32.mrb[7].mxu0  ;;  %v563_v56 = vpop.f32.mrb[7].mxu1 }
 0x105   :  { %v528_v58 = vadd.f32 %v527_v55, %v526_v53  ;;  %v960_v59 = vadd.f32 %v563_v56, %v562_v54 }
 0x107   :  { %v529_v61 = vpop.f32.mrb[8].mxu0  ;;  %v589_v62 = vpop.f32.mrb[8].mxu1  ;;  %v238_v5 = vadd.f32 %v528_v58, %v958_v57  ;;  %v298_v46 = vadd.f32 %v960_v59, %v958_v57 }
 0x108   :  { %v373_v0 = vadd.f32 %v589_v62, %v228_v60  ;;  %v530_v1 = vpop.f32.mrb[9].mxu0  ;;  %v367_v2 = vpop.f32.mrb[9].mxu1  ;;  %v293_v62 = vadd.f32 %v953_v52, %v958_v57 }
 0x109   :  { %v531_v3 = vadd.f32 %v530_v1, %v529_v61  ;;  %v368_v4 = vadd.f32 %v367_v2, %v223_v63 }
 0x10a   :  { %448 = vst.msk [vmem:[%s1049_s3 + $0x8] sm:$0xff] %vm446_vm4, %v373_v0 }
 0x10b   :  { %447 = vst.msk [vmem:[%s1049_s3] sm:$0xff] %vm446_vm4, %v368_v4  ;;  %v532_v6 = vpop.f32.mrb[10].mxu0  ;;  %v592_v7 = vpop.f32.mrb[10].mxu1  ;;  %v243_v17 = vadd.f32 %v531_v3, %v958_v57 }
 0x10c   :  { %v383_v9 = vadd.f32 %v592_v7, %v238_v5  ;;  %v533_v10 = vpop.f32.mrb[11].mxu0  ;;  %v377_v11 = vpop.f32.mrb[11].mxu1 }
 0x10d   :  { %v534_v12 = vadd.f32 %v533_v10, %v532_v6  ;;  %v378_v13 = vadd.f32 %v377_v11, %v233_v8 }
 0x10e   :  { %450 = vst.msk [vmem:[%s1049_s3 + $0x18] sm:$0xff] %vm446_vm4, %v383_v9 }
 0x10f   :  { %449 = vst.msk [vmem:[%s1049_s3 + $0x10] sm:$0xff] %vm446_vm4, %v378_v13  ;;  %v535_v14 = vpop.f32.mrb[12].mxu0  ;;  %v248_v15 = vadd.f32 %v534_v12, %v958_v57  ;;  %v595_v16 = vpop.f32.mrb[12].mxu1 }
 0x110   :  { %v536_v18 = vpop.f32.mrb[13].mxu0  ;;  %v387_v19 = vpop.f32.mrb[13].mxu1 }
 0x111   :  { %v393_v20 = vadd.f32 %v595_v16, %v248_v15  ;;  %v537_v21 = vadd.f32 %v536_v18, %v535_v14  ;;  %v388_v22 = vadd.f32 %v387_v19, %v243_v17 }
 0x113   :  { %452 = vst.msk [vmem:[%s1049_s3 + $0x28] sm:$0xff] %vm446_vm4, %v393_v20  ;;  %451 = vst.msk [vmem:[%s1049_s3 + $0x20] sm:$0xff] %vm446_vm4, %v388_v22  ;;  %v538_v23 = vpop.f32.mrb[14].mxu0  ;;  %v598_v24 = vpop.f32.mrb[14].mxu1  ;;  %v253_v25 = vadd.f32 %v537_v21, %v958_v57 }
 0x114   :  { %v539_v26 = vpop.f32.mrb[15].mxu0  ;;  %v397_v27 = vpop.f32.mrb[15].mxu1 }
 0x115   :  { %v540_v28 = vadd.f32 %v539_v26, %v538_v23  ;;  %v398_v29 = vadd.f32 %v397_v27, %v253_v25 }
 0x117   :  { %v258_v30 = vadd.f32 %v540_v28, %v958_v57  ;;  %453 = vst.msk [vmem:[%s1049_s3 + $0x30] sm:$0xff] %vm446_vm4, %v398_v29  ;;  %v541_v31 = vpop.f32.mrb[16].mxu0  ;;  %v601_v32 = vpop.f32.mrb[16].mxu1 }
 0x118   :  { %v542_v33 = vpop.f32.mrb[17].mxu0  ;;  %v407_v34 = vpop.f32.mrb[17].mxu1 }
 0x119   :  { %v403_v35 = vadd.f32 %v598_v24, %v258_v30  ;;  %v543_v36 = vadd.f32 %v542_v33, %v541_v31 }
 0x11b   :  { %454 = vst.msk [vmem:[%s1049_s3 + $0x38] sm:$0xff] %vm446_vm4, %v403_v35  ;;  %v544_v37 = vpop.f32.mrb[18].mxu0  ;;  %v263_v38 = vadd.f32 %v543_v36, %v958_v57  ;;  %v604_v39 = vpop.f32.mrb[18].mxu1 }
 0x11c   :  { %v545_v41 = vpop.f32.mrb[19].mxu0  ;;  %v417_v42 = vpop.f32.mrb[19].mxu1 }
 0x11d   :  { %v408_v43 = vadd.f32 %v407_v34, %v263_v38  ;;  %v546_v44 = vadd.f32 %v545_v41, %v544_v37 }
 0x11f   :  { %455 = vst.msk [vmem:[%s1049_s3 + $0x40] sm:$0xff] %vm446_vm4, %v408_v43  ;;  %v268_v47 = vadd.f32 %v546_v44, %v958_v57  ;;  %v547_v48 = vpop.f32.mrb[20].mxu0  ;;  %v607_v49 = vpop.f32.mrb[20].mxu1 }
 0x120   :  { %v433_v51 = vadd.f32 %v607_v49, %v288_v45  ;;  %v548_v53 = vpop.f32.mrb[21].mxu0  ;;  %v427_v54 = vpop.f32.mrb[21].mxu1 }
 0x121   :  { %v413_v55 = vadd.f32 %v601_v32, %v268_v47  ;;  %v549_v56 = vadd.f32 %v548_v53, %v547_v48  ;;  %v428_v58 = vadd.f32 %v427_v54, %v283_v50 }
 0x122   :  { %460 = vst.msk [vmem:[%s1049_s3 + $0x68] sm:$0xff] %vm446_vm4, %v433_v51 }
 0x123   :  { %456 = vst.msk [vmem:[%s1049_s3 + $0x48] sm:$0xff] %vm446_vm4, %v413_v55  ;;  %v273_v40 = vadd.f32 %v549_v56, %v958_v57  ;;  %459 = vst.msk [vmem:[%s1049_s3 + $0x60] sm:$0xff] %vm446_vm4, %v428_v58  ;;  %v550_v60 = vpop.f32.mrb[22].mxu0  ;;  %v610_v61 = vpop.f32.mrb[22].mxu1 }
 0x124   :  { %v443_v63 = vadd.f32 %v610_v61, %v298_v46  ;;  %v551_v0 = vpop.f32.mrb[23].mxu0  ;;  %v437_v59 = vpop.f32.mrb[23].mxu1 }
 0x125   :  { %v418_v1 = vadd.f32 %v417_v42, %v273_v40  ;;  %v552_v2 = vadd.f32 %v551_v0, %v550_v60  ;;  %v438_v3 = vadd.f32 %v437_v59, %v293_v62 }
 0x126   :  { %462 = vst.msk [vmem:[%s1049_s3 + $0x78] sm:$0xff] %vm446_vm4, %v443_v63 }
 0x127   :  { %457 = vst.msk [vmem:[%s1049_s3 + $0x50] sm:$0xff] %vm446_vm4, %v418_v1  ;;  %v278_v4 = vadd.f32 %v552_v2, %v958_v57  ;;  %461 = vst.msk [vmem:[%s1049_s3 + $0x70] sm:$0xff] %vm446_vm4, %v438_v3 }
 0x129   :  { %v423_v52 = vadd.f32 %v604_v39, %v278_v4 }
 0x12b   :  { %458 = vst.msk [vmem:[%s1049_s3 + $0x58] sm:$0xff] %vm446_vm4, %v423_v52 }

// kernel: skip_capsule_forward.19
= control target key start
LH: loop header
LB: loop body
LE: loop exit
PB: predicated region body
PF: predicated region fallthrough
CT: control target
= control target key end

     0   :  { %vm40_vm0 = vcmask 195584   ;;  %s488_s1 = inlined_call_operand.vmem [shape: f32[24,24], index: 1, kind: input, shape index: {}]   ;;  %s489_s0 = inlined_call_operand.vmem [shape: f32[128,24], index: 0, kind: input, shape index: {}]   ;;  %s490_s2 = inlined_call_operand.vmem [shape: f32[1,24], index: 2, kind: input, shape index: {}]   ;;  %s491_s3 = inlined_call_operand.vmem [shape: f32[128,24], index: 3, kind: output, shape index: {}]  }
   0x1   :  { %v30_v0 = vld [vmem:[%s488_s1] sm:$0xff]  ;;  %v31_v1 = vld [vmem:[%s488_s1 + $0x8] sm:$0xff]  ;;  %v32_v5 = vld [vmem:[%s488_s1 + $0x10] sm:$0xff] }
   0x2   :  { %v320_v2 = vpack.c.bf16 %v31_v1, %v30_v0  ;;  %v14_v3 = vld [vmem:[%s489_s0] sm:$0xff]  ;;  %v15_v6 = vld [vmem:[%s489_s0 + $0x8] sm:$0xff]  ;;  %v16_v8 = vld [vmem:[%s489_s0 + $0x10] sm:$0xff] }
   0x3   :  { %v22_v4 = vld [vmem:[%s489_s0 + $0x40] sm:$0xff]  ;;  %296 = vmatprep.mubr.msk.f32.mxu0 %vm40_vm0, %v14_v3  ;;  %v23_v7 = vld [vmem:[%s489_s0 + $0x48] sm:$0xff]  ;;  %v24_v9 = vld [vmem:[%s489_s0 + $0x50] sm:$0xff] }
   0x4   :  { %308 = vmatprep.mubr.msk.f32.mxu1 %vm40_vm0, %v22_v4  ;;  %321 = vmatprep.subr.bf16.mxu0 %v320_v2  ;;  %v17_v10 = vld [vmem:[%s489_s0 + $0x18] sm:$0xff]  ;;  %v18_v12 = vld [vmem:[%s489_s0 + $0x20] sm:$0xff]  ;;  %v19_v14 = vld [vmem:[%s489_s0 + $0x28] sm:$0xff] }
   0x5   :  { %324 = vmatprep.subr.bf16.mxu1 %v320_v2  ;;  %323 = vmatpush3.bf16.msra.mxu0 %v320_v2  ;;  %v25_v11 = vld [vmem:[%s489_s0 + $0x58] sm:$0xff]  ;;  %v26_v13 = vld [vmem:[%s489_s0 + $0x60] sm:$0xff]  ;;  %v27_v15 = vld [vmem:[%s489_s0 + $0x68] sm:$0xff] }
   0x6   :  { %326 = vmatpush3.bf16.msra.mxu1 %v320_v2  ;;  %294 = vmatprep.subr.mxu0 %v32_v5  ;;  %v20_v16 = vld [vmem:[%s489_s0 + $0x30] sm:$0xff]  ;;  %v21_v18 = vld [vmem:[%s489_s0 + $0x38] sm:$0xff]  ;;  %v254_v20 = vld [vmem:[%s490_s2] ss:$0 sm:$0xff] }
   0x7   :  { %325 = vmatprep.subr.mxu1 %v32_v5  ;;  %v28_v17 = vld [vmem:[%s489_s0 + $0x70] sm:$0xff]  ;;  %v29_v19 = vld [vmem:[%s489_s0 + $0x78] sm:$0xff] }
   0x9   :  { %295 = vmatpush3.msra.mxu0 %v32_v5 }
   0xa   :  { %327 = vmatpush3.msra.mxu1 %v32_v5  ;;  %297 = vmatmul.mubr.msk.f32.vlgmr.msra.gmra.mrb[0].mxu0 %vm40_vm0, %v15_v6 }
   0xb   :  { %309 = vmatmul.mubr.msk.f32.vlgmr.msra.gmra.mrb[0].mxu1 %vm40_vm0, %v23_v7  ;;  %299 = vmatprep.mubr.msk.f32.mxu0 %vm40_vm0, %v16_v8 }
   0xc   :  { %311 = vmatprep.mubr.msk.f32.mxu1 %vm40_vm0, %v24_v9 }
   0xe   :  { %300 = vmatmul.mubr.msk.f32.gmra.mrb[2].mxu0 %vm40_vm0, %v17_v10 }
   0xf   :  { %312 = vmatmul.mubr.msk.f32.gmra.mrb[2].mxu1 %vm40_vm0, %v25_v11  ;;  %302 = vmatprep.mubr.msk.f32.mxu0 %vm40_vm0, %v18_v12 }
  0x10   :  { %314 = vmatprep.mubr.msk.f32.mxu1 %vm40_vm0, %v26_v13 }
  0x12   :  { %303 = vmatmul.mubr.msk.f32.gmra.mrb[4].mxu0 %vm40_vm0, %v19_v14 }
  0x13   :  { %315 = vmatmul.mubr.msk.f32.gmra.mrb[4].mxu1 %vm40_vm0, %v27_v15  ;;  %305 = vmatprep.mubr.msk.f32.mxu0 %vm40_vm0, %v20_v16 }
  0x14   :  { %317 = vmatprep.mubr.msk.f32.mxu1 %vm40_vm0, %v28_v17 }
  0x16   :  { %306 = vmatmul.mubr.msk.f32.gmra.mrb[6].mxu0 %vm40_vm0, %v21_v18 }
  0x17   :  { %318 = vmatmul.mubr.msk.f32.gmra.mrb[6].mxu1 %vm40_vm0, %v29_v19 }
  0xdd   :  { %v298_v21 = vpop.f32.mrb[0].mxu0 }
  0xde   :  { %v310_v22 = vpop.f32.mrb[0].mxu1  ;;  %v161_v23 = vadd.f32 %v298_v21, %v254_v20  ;;  %v155_v25 = vpop.f32.mrb[1].mxu0 }
  0xdf   :  { %v201_v24 = vadd.f32 %v310_v22, %v254_v20  ;;  %v195_v26 = vpop.f32.mrb[1].mxu1  ;;  %v156_v27 = vadd.f32 %v254_v20, %v155_v25 }
  0xe0   :  { %v196_v28 = vadd.f32 %v254_v20, %v195_v26  ;;  %235 = vst.msk [vmem:[%s491_s3 + $0x8] sm:$0xff] %vm40_vm0, %v161_v23 }
  0xe1   :  { %243 = vst.msk [vmem:[%s491_s3 + $0x48] sm:$0xff] %vm40_vm0, %v201_v24  ;;  %234 = vst.msk [vmem:[%s491_s3] sm:$0xff] %vm40_vm0, %v156_v27  ;;  %v301_v29 = vpop.f32.mrb[2].mxu0 }
  0xe2   :  { %242 = vst.msk [vmem:[%s491_s3 + $0x40] sm:$0xff] %vm40_vm0, %v196_v28  ;;  %v313_v30 = vpop.f32.mrb[2].mxu1  ;;  %v171_v31 = vadd.f32 %v301_v29, %v254_v20  ;;  %v165_v33 = vpop.f32.mrb[3].mxu0 }
  0xe3   :  { %v211_v32 = vadd.f32 %v313_v30, %v254_v20  ;;  %v205_v34 = vpop.f32.mrb[3].mxu1  ;;  %v166_v35 = vadd.f32 %v254_v20, %v165_v33 }
  0xe4   :  { %v206_v36 = vadd.f32 %v254_v20, %v205_v34  ;;  %237 = vst.msk [vmem:[%s491_s3 + $0x18] sm:$0xff] %vm40_vm0, %v171_v31 }
  0xe5   :  { %245 = vst.msk [vmem:[%s491_s3 + $0x58] sm:$0xff] %vm40_vm0, %v211_v32  ;;  %236 = vst.msk [vmem:[%s491_s3 + $0x10] sm:$0xff] %vm40_vm0, %v166_v35  ;;  %v304_v37 = vpop.f32.mrb[4].mxu0 }
  0xe6   :  { %244 = vst.msk [vmem:[%s491_s3 + $0x50] sm:$0xff] %vm40_vm0, %v206_v36  ;;  %v316_v38 = vpop.f32.mrb[4].mxu1  ;;  %v181_v39 = vadd.f32 %v304_v37, %v254_v20  ;;  %v175_v41 = vpop.f32.mrb[5].mxu0 }
  0xe7   :  { %v221_v40 = vadd.f32 %v316_v38, %v254_v20  ;;  %v215_v42 = vpop.f32.mrb[5].mxu1  ;;  %v176_v43 = vadd.f32 %v254_v20, %v175_v41 }
  0xe8   :  { %v216_v44 = vadd.f32 %v254_v20, %v215_v42  ;;  %239 = vst.msk [vmem:[%s491_s3 + $0x28] sm:$0xff] %vm40_vm0, %v181_v39 }
  0xe9   :  { %247 = vst.msk [vmem:[%s491_s3 + $0x68] sm:$0xff] %vm40_vm0, %v221_v40  ;;  %238 = vst.msk [vmem:[%s491_s3 + $0x20] sm:$0xff] %vm40_vm0, %v176_v43  ;;  %v307_v45 = vpop.f32.mrb[6].mxu0 }
  0xea   :  { %246 = vst.msk [vmem:[%s491_s3 + $0x60] sm:$0xff] %vm40_vm0, %v216_v44  ;;  %v319_v46 = vpop.f32.mrb[6].mxu1  ;;  %v191_v47 = vadd.f32 %v307_v45, %v254_v20  ;;  %v185_v49 = vpop.f32.mrb[7].mxu0 }
  0xeb   :  { %v231_v48 = vadd.f32 %v319_v46, %v254_v20  ;;  %v225_v50 = vpop.f32.mrb[7].mxu1  ;;  %v186_v51 = vadd.f32 %v254_v20, %v185_v49 }
  0xec   :  { %v226_v52 = vadd.f32 %v254_v20, %v225_v50  ;;  %241 = vst.msk [vmem:[%s491_s3 + $0x38] sm:$0xff] %vm40_vm0, %v191_v47 }
  0xed   :  { %249 = vst.msk [vmem:[%s491_s3 + $0x78] sm:$0xff] %vm40_vm0, %v231_v48  ;;  %240 = vst.msk [vmem:[%s491_s3 + $0x30] sm:$0xff] %vm40_vm0, %v186_v51 }
  0xee   :  { %248 = vst.msk [vmem:[%s491_s3 + $0x70] sm:$0xff] %vm40_vm0, %v226_v52 }

// kernel: skip_capsule_forward.21
= control target key start
LH: loop header
LB: loop body
LE: loop exit
PB: predicated region body
PF: predicated region fallthrough
CT: control target
= control target key end

     0   :  { %s930_s12 = smov 0   ;;  %s1186_s0 = inlined_call_operand.vmem [shape: f32[512,270], index: 0, kind: input, shape index: {}]   ;;  %s1187_s1 = inlined_call_operand.vmem [shape: f32[270,12], index: 1, kind: input, shape index: {}]   ;;  %s1188_s2 = inlined_call_operand.vmem [shape: f32[1,12], index: 2, kind: input, shape index: {}]   ;;  %s1189_s3 = inlined_call_operand.vmem [shape: f32[512,12], index: 3, kind: output, shape index: {}]  }
   0x1 LB: > { %s682_s13 = sadd.s32 4294967295, %s907_s12   ;;  %p686_p0 = scmp.ge.s32.totalorder %s907_s12, 1  ;;  %s907_s12 = sphi %s930_s12, %s13_s12  }
   0x2   : > { %p139_p1 = scmp.lt.s32.totalorder %s907_s12, 5 }
   0x4   : > { %p140_p2 = pnand %p686_p0, %p139_p1 }
   0x5   : > { %v241_v0 = vld [vmem:[%s1187_s1 + $0x80] sm:$0xff] (!%p140_p2)  ;;  %v242_v1 = vld [vmem:[%s1187_s1 + $0x88] sm:$0xff] (!%p140_p2)  ;;  %s687_s20 = sshll.u32 (!%p140_p2), %s682_s13, 4  ;;  %v243_v5 = vld [vmem:[%s1187_s1 + $0x90] sm:$0xff] (!%p140_p2)  ;;  %vm315_vm0 = vcmask (!%p140_p2), 1045504   ;;  %vm909_vm1 = vmmov (!%p140_p2), 1  }
   0x6   : > { %143 = sbr.rel (%p140_p2) target bundleno = 304 (0x130), region = 32  ;;  %v225_v2 = vld [vmem:[%s1187_s1] sm:$0xff] (!%p140_p2)  ;;  %v837_v3 = vpack.c.bf16 (!%p140_p2), %v242_v1, %v241_v0  ;;  %v226_v4 = vld [vmem:[%s1187_s1 + $0x8] sm:$0xff] (!%p140_p2)  ;;  %v244_v6 = vld [vmem:[%s1187_s1 + $0x98] sm:$0xff] (!%p140_p2)  ;;  %p165_p3 = scmp.lt.s32.totalorder (!%p140_p2), %s687_s20, 63  ;;  %vm266_vm3 = vcmask (!%p140_p2), 113664  }
   0x7   : > { %v839_v7 = vpack.c.bf16 (!%p140_p2), %v226_v4, %v225_v2  ;;  %v841_v8 = vpack.c.bf16 (!%p140_p2), %v244_v6, %v243_v5  ;;  %v227_v9 = vld [vmem:[%s1187_s1 + $0x10] sm:$0xff] (!%p140_p2)  ;;  %v228_v10 = vld [vmem:[%s1187_s1 + $0x18] sm:$0xff] (!%p140_p2)  ;;  %v245_v11 = vld [vmem:[%s1187_s1 + $0xa0] sm:$0xff] (!%p140_p2)  ;;  %vm609_vm4 = vcmask (!%p140_p2), 97280  }
   0x8   : > { %838 = vmatprep.subr.bf16.mxu0 (!%p140_p2), %v837_v3  ;;  %875 = vmatprep.subr.bf16.mxu1 (!%p140_p2), %v837_v3  ;;  %v246_v12 = vld [vmem:[%s1187_s1 + $0xa8] sm:$0xff] (!%p140_p2)  ;;  %v843_v13 = vpack.c.bf16 (!%p140_p2), %v228_v10, %v227_v9  ;;  %v229_v15 = vld [vmem:[%s1187_s1 + $0x20] sm:$0xff] (!%p140_p2)  ;;  %v247_v17 = vld [vmem:[%s1187_s1 + $0xb0] sm:$0xff] (!%p140_p2) }
   0x9   : > { %840 = vmatpush3.bf16.msra.mxu0 (!%p140_p2), %v839_v7  ;;  %883 = vmatpush3.bf16.msra.mxu1 (!%p140_p2), %v839_v7  ;;  %v845_v14 = vpack.c.bf16 (!%p140_p2), %v246_v12, %v245_v11  ;;  %v230_v16 = vld [vmem:[%s1187_s1 + $0x28] sm:$0xff] (!%p140_p2)  ;;  %v248_v18 = vld [vmem:[%s1187_s1 + $0xb8] sm:$0xff] (!%p140_p2)  ;;  %v231_v21 = vld [vmem:[%s1187_s1 + $0x30] sm:$0xff] (!%p140_p2) }
   0xa   : > { %842 = vmatprep.subr.bf16.mxu0 (!%p140_p2), %v841_v8  ;;  %876 = vmatprep.subr.bf16.mxu1 (!%p140_p2), %v841_v8  ;;  %v847_v19 = vpack.c.bf16 (!%p140_p2), %v230_v16, %v229_v15  ;;  %v849_v20 = vpack.c.bf16 (!%p140_p2), %v248_v18, %v247_v17  ;;  %v232_v22 = vld [vmem:[%s1187_s1 + $0x38] sm:$0xff] (!%p140_p2)  ;;  %v249_v23 = vld [vmem:[%s1187_s1 + $0xc0] sm:$0xff] (!%p140_p2)  ;;  %v250_v24 = vld [vmem:[%s1187_s1 + $0xc8] sm:$0xff] (!%p140_p2) }
   0xb   : > { %v851_v27 = vpack.c.bf16 (!%p140_p2), %v232_v22, %v231_v21  ;;  %v853_v28 = vpack.c.bf16 (!%p140_p2), %v250_v24, %v249_v23  ;;  %v233_v29 = vld [vmem:[%s1187_s1 + $0x40] sm:$0xff] (!%p140_p2)  ;;  %v234_v30 = vld [vmem:[%s1187_s1 + $0x48] sm:$0xff] (!%p140_p2)  ;;  %v251_v31 = vld [vmem:[%s1187_s1 + $0xd0] sm:$0xff] (!%p140_p2) }
   0xc   : > { %v252_v32 = vld [vmem:[%s1187_s1 + $0xd8] sm:$0xff] (!%p140_p2)  ;;  %v855_v33 = vpack.c.bf16 (!%p140_p2), %v234_v30, %v233_v29  ;;  %v235_v35 = vld [vmem:[%s1187_s1 + $0x50] sm:$0xff] (!%p140_p2)  ;;  %v253_v37 = vld [vmem:[%s1187_s1 + $0xe0] sm:$0xff] (!%p140_p2) }
   0xd   : > { %s1191_s20 = smov (!%p165_p3, %s687_s20), 63  ;;  %844 = vmatpush3.bf16.msra.mxu0 %v843_v13  ;;  %884 = vmatpush3.bf16.msra.mxu1 %v843_v13  ;;  %v857_v34 = vpack.c.bf16 %v252_v32, %v251_v31  ;;  %v236_v36 = vld [vmem:[%s1187_s1 + $0x58] sm:$0xff]  ;;  %v254_v38 = vld [vmem:[%s1187_s1 + $0xe8] sm:$0xff]  ;;  %v237_v41 = vld [vmem:[%s1187_s1 + $0x60] sm:$0xff] }
   0xe   : > { %s891_s13 = smul.u32 24, %s1191_s20  ;;  %846 = vmatprep.subr.bf16.mxu0 %v845_v14  ;;  %877 = vmatprep.subr.bf16.mxu1 %v845_v14  ;;  %v859_v39 = vpack.c.bf16 %v236_v36, %v235_v35  ;;  %v861_v40 = vpack.c.bf16 %v254_v38, %v253_v37  ;;  %v238_v42 = vld [vmem:[%s1187_s1 + $0x68] sm:$0xff]  ;;  %v255_v43 = vld [vmem:[%s1187_s1 + $0xf0] sm:$0xff]  ;;  %v256_v44 = vld [vmem:[%s1187_s1 + $0xf8] sm:$0xff] }
   0xf   : > { %v863_v45 = vpack.c.bf16 %v238_v42, %v237_v41  ;;  %v865_v46 = vpack.c.bf16 %v256_v44, %v255_v43  ;;  %v239_v47 = vld [vmem:[%s1187_s1 + $0x70] sm:$0xff]  ;;  %v240_v48 = vld [vmem:[%s1187_s1 + $0x78] sm:$0xff]  ;;  %v257_v49 = vld [vmem:[%s1187_s1 + $0x100] sm:$0xff] }
  0x10   : > { %s986_s21 = scalar_lea.vmem %s1186_s0, %s891_s13  ;;  %v258_v50 = vld [vmem:[%s1187_s1 + $0x108] sm:$0x3f]  ;;  %v867_v51 = vpack.c.bf16 %v240_v48, %v239_v47  ;;  %vm870_vm2 = vmpackc.low %vm315_vm0, %vm909_vm1 }
  0x11   : > { %v178_v25 = vld [vmem:[%s986_s21 + $0x8] sm:$0xff]  ;;  %848 = vmatpush3.bf16.msra.mxu0 %v847_v19  ;;  %885 = vmatpush3.bf16.msra.mxu1 %v847_v19  ;;  %v869_v52 = vpack.c.bf16 %v258_v50, %v257_v49  ;;  %v177_v53 = vld [vmem:[%s986_s21] sm:$0xff]  ;;  %v180_v57 = vld [vmem:[%s986_s21 + $0x18] sm:$0xff] }
  0x12   : > { %383 = vmatprep.mubr.f32.mxu0 %v178_v25  ;;  %v214_v26 = vld [vmem:[%s986_s21 + $0x128] sm:$0xff]  ;;  %850 = vmatprep.subr.bf16.mxu0 %v849_v20  ;;  %v213_v54 = vld [vmem:[%s986_s21 + $0x120] sm:$0xff]  ;;  %v216_v58 = vld [vmem:[%s986_s21 + $0x138] sm:$0xff] }
  0x13   : > { %878 = vmatprep.subr.bf16.mxu1 %v849_v20  ;;  %443 = vmatprep.mubr.f32.mxu1 %v214_v26  ;;  %v181_v55 = vld [vmem:[%s986_s21 + $0x20] sm:$0xff]  ;;  %v184_v59 = vld [vmem:[%s986_s21 + $0x38] sm:$0xff]  ;;  %v183_v61 = vld [vmem:[%s986_s21 + $0x30] sm:$0xff] }
  0x14   : > { %v217_v56 = vld [vmem:[%s986_s21 + $0x140] sm:$0xff]  ;;  %v220_v60 = vld [vmem:[%s986_s21 + $0x158] sm:$0xff]  ;;  %v219_v62 = vld [vmem:[%s986_s21 + $0x150] sm:$0xff] }
  0x15   : > { %852 = vmatpush3.bf16.msra.mxu0 %v851_v27  ;;  %886 = vmatpush3.bf16.msra.mxu1 %v851_v27  ;;  %v187_v63 = vld [vmem:[%s986_s21 + $0x50] sm:$0xff]  ;;  %v186_v1 = vld [vmem:[%s986_s21 + $0x48] sm:$0xff]  ;;  %v189_v5 = vld [vmem:[%s986_s21 + $0x60] sm:$0xff] }
  0x16   : > { %854 = vmatprep.subr.bf16.mxu0 %v853_v28  ;;  %879 = vmatprep.subr.bf16.mxu1 %v853_v28  ;;  %v223_v0 = vld [vmem:[%s986_s21 + $0x170] sm:$0xff]  ;;  %v222_v2 = vld [vmem:[%s986_s21 + $0x168] sm:$0xff]  ;;  %v193_v7 = vld [vmem:[%s986_s21 + $0x80] sm:$0xff] }
  0x17   : > { %v190_v3 = vld [vmem:[%s986_s21 + $0x68] sm:$0xff]  ;;  %v179_v4 = vld [vmem:[%s986_s21 + $0x10] sm:$0xff]  ;;  %v185_v8 = vld [vmem:[%s986_s21 + $0x40] sm:$0xff] }
  0x18   : > { %v182_v6 = vld [vmem:[%s986_s21 + $0x28] sm:$0xff]  ;;  %v192_v9 = vld [vmem:[%s986_s21 + $0x78] sm:$0xff]  ;;  %v191_v12 = vld [vmem:[%s986_s21 + $0x70] sm:$0xff] }
  0x19   : > { %856 = vmatpush3.bf16.msra.mxu0 %v855_v33  ;;  %887 = vmatpush3.bf16.msra.mxu1 %v855_v33  ;;  %v188_v10 = vld [vmem:[%s986_s21 + $0x58] sm:$0xff]  ;;  %v195_v13 = vld [vmem:[%s986_s21 + $0x90] sm:$0xff]  ;;  %v194_v14 = vld [vmem:[%s986_s21 + $0x88] sm:$0xff] }
  0x1a   : > { %858 = vmatprep.subr.bf16.mxu0 %v857_v34  ;;  %880 = vmatprep.subr.bf16.mxu1 %v857_v34  ;;  %v196_v11 = vld [vmem:[%s986_s21 + $0x98] sm:$0xff]  ;;  %v199_v15 = vld [vmem:[%s986_s21 + $0xb0] sm:$0xff]  ;;  %v197_v16 = vld [vmem:[%s986_s21 + $0xa0] sm:$0xff] }
  0x1b   : > { %v198_v17 = vld [vmem:[%s986_s21 + $0xa8] sm:$0xff]  ;;  %v200_v18 = vld [vmem:[%s986_s21 + $0xb8] sm:$0xff]  ;;  %v203_v20 = vld [vmem:[%s986_s21 + $0xd0] sm:$0xff] }
  0x1c   : > { %v202_v19 = vld [vmem:[%s986_s21 + $0xc8] sm:$0xff]  ;;  %v201_v21 = vld [vmem:[%s986_s21 + $0xc0] sm:$0xff]  ;;  %v204_v25 = vld [vmem:[%s986_s21 + $0xd8] sm:$0xff] }
  0x1d   : > { %860 = vmatpush3.bf16.msra.mxu0 %v859_v39  ;;  %888 = vmatpush3.bf16.msra.mxu1 %v859_v39  ;;  %v206_v22 = vld [vmem:[%s986_s21 + $0xe8] sm:$0xff]  ;;  %v205_v23 = vld [vmem:[%s986_s21 + $0xe0] sm:$0xff]  ;;  %v212_v26 = vld [vmem:[%s986_s21 + $0x118] sm:$0xff] }
  0x1e   : > { %862 = vmatprep.subr.bf16.mxu0 %v861_v40  ;;  %881 = vmatprep.subr.bf16.mxu1 %v861_v40  ;;  %v209_v24 = vld [vmem:[%s986_s21 + $0x100] sm:$0xff]  ;;  %v208_v27 = vld [vmem:[%s986_s21 + $0xf8] sm:$0xff]  ;;  %v215_v28 = vld [vmem:[%s986_s21 + $0x130] sm:$0xff] }
  0x1f   : > { %v207_v29 = vld [vmem:[%s986_s21 + $0xf0] sm:$0xff]  ;;  %v218_v30 = vld [vmem:[%s986_s21 + $0x148] sm:$0xff]  ;;  %v221_v32 = vld [vmem:[%s986_s21 + $0x160] sm:$0xff] }
  0x20   : > { %v211_v31 = vld [vmem:[%s986_s21 + $0x110] sm:$0xff]  ;;  %v210_v33 = vld [vmem:[%s986_s21 + $0x108] sm:$0xff]  ;;  %v224_v34 = vld [vmem:[%s986_s21 + $0x178] sm:$0xff]  ;;  %s690_s21 = sshll.u32 %s1191_s20, 3 }
  0x21   : > { %864 = vmatpush3.bf16.msra.mxu0 %v863_v45  ;;  %889 = vmatpush3.bf16.msra.mxu1 %v863_v45  ;;  %s1130_s16 = scalar_lea.vmem %s1189_s3, %s690_s21 }
  0x22   : > { %866 = vmatprep.subr.bf16.mxu0 %v865_v46  ;;  %882 = vmatprep.subr.bf16.mxu1 %v865_v46 }
  0x25   : > { %868 = vmatpush3.bf16.msra.mxu0 %v867_v51  ;;  %890 = vmatpush3.bf16.msra.mxu1 %v867_v51 }
  0x26   : > { %871 = vmatprep.subr.msk.bf16.mxu1 %vm870_vm2, %v869_v52 }
  0x28   : > { %384 = vmatmul.mubr.f32.vlgmr.msra.gmra.mrb[0].mxu0 %v177_v53  ;;  %444 = vmatmul.mubr.f32.vlgmr.msra.gmra.mrb[0].mxu1 %v213_v54 }
  0x29   : > { %388 = vmatprep.mubr.f32.mxu0 %v181_v55  ;;  %448 = vmatprep.mubr.f32.mxu1 %v217_v56 }
  0x2a   : > { %874 = vmatpush3.bf16.msk.msra.mxu1 %vm870_vm2, %v869_v52 }
  0x2c   : > { %389 = vmatmul.mubr.f32.gmra.mrb[2].mxu0 %v180_v57  ;;  %449 = vmatmul.mubr.f32.gmra.mrb[2].mxu1 %v216_v58  ;;  %v1122_v57 = vld [vmem:[%s1188_s2] ss:$0 sm:$0xff] }
  0x2d   : > { %393 = vmatprep.mubr.f32.mxu0 %v184_v59  ;;  %453 = vmatprep.mubr.f32.mxu1 %v220_v60 }
  0x30   : > { %394 = vmatmul.mubr.f32.gmra.mrb[4].mxu0 %v183_v61  ;;  %454 = vmatmul.mubr.f32.gmra.mrb[4].mxu1 %v219_v62 }
  0x31   : > { %398 = vmatprep.mubr.f32.mxu0 %v187_v63  ;;  %458 = vmatprep.mubr.f32.mxu1 %v223_v0 }
  0x34   : > { %399 = vmatmul.mubr.f32.gmra.mrb[6].mxu0 %v186_v1  ;;  %459 = vmatmul.mubr.f32.gmra.mrb[6].mxu1 %v222_v2 }
  0x35   : > { %403 = vmatprep.mubr.f32.mxu0 %v190_v3  ;;  %813 = vmatprep.mubr.msk.f32.mxu1 %vm266_vm3, %v179_v4 }
  0x38   : > { %404 = vmatmul.mubr.f32.gmra.mrb[8].mxu0 %v189_v5  ;;  %814 = vmatmul.mubr.msk.f32.vlgmr.msra.gmra.mrb[8].mxu1 %vm266_vm3, %v182_v6 }
  0x39   : > { %408 = vmatprep.mubr.f32.mxu0 %v193_v7  ;;  %816 = vmatprep.mubr.msk.f32.mxu1 %vm266_vm3, %v185_v8 }
  0x3c   : > { %409 = vmatmul.mubr.f32.gmra.mrb[10].mxu0 %v192_v9  ;;  %817 = vmatmul.mubr.msk.f32.gmra.mrb[10].mxu1 %vm266_vm3, %v188_v10 }
  0x3d   : > { %413 = vmatprep.mubr.f32.mxu0 %v196_v11  ;;  %819 = vmatprep.mubr.msk.f32.mxu1 %vm266_vm3, %v191_v12 }
  0x40   : > { %414 = vmatmul.mubr.f32.gmra.mrb[12].mxu0 %v195_v13  ;;  %820 = vmatmul.mubr.msk.f32.gmra.mrb[12].mxu1 %vm266_vm3, %v194_v14 }
  0x41   : > { %418 = vmatprep.mubr.f32.mxu0 %v199_v15  ;;  %822 = vmatprep.mubr.msk.f32.mxu1 %vm266_vm3, %v197_v16 }
  0x44   : > { %419 = vmatmul.mubr.f32.gmra.mrb[14].mxu0 %v198_v17  ;;  %823 = vmatmul.mubr.msk.f32.gmra.mrb[14].mxu1 %vm266_vm3, %v200_v18 }
  0x45   : > { %423 = vmatprep.mubr.f32.mxu0 %v202_v19  ;;  %825 = vmatprep.mubr.msk.f32.mxu1 %vm266_vm3, %v203_v20 }
  0x48   : > { %424 = vmatmul.mubr.f32.gmra.mrb[16].mxu0 %v201_v21  ;;  %826 = vmatmul.mubr.msk.f32.gmra.mrb[16].mxu1 %vm266_vm3, %v206_v22 }
  0x49   : > { %428 = vmatprep.mubr.f32.mxu0 %v205_v23  ;;  %828 = vmatprep.mubr.msk.f32.mxu1 %vm266_vm3, %v209_v24 }
  0x4c   : > { %429 = vmatmul.mubr.f32.gmra.mrb[18].mxu0 %v204_v25  ;;  %829 = vmatmul.mubr.msk.f32.gmra.mrb[18].mxu1 %vm266_vm3, %v212_v26 }
  0x4d   : > { %433 = vmatprep.mubr.f32.mxu0 %v208_v27  ;;  %831 = vmatprep.mubr.msk.f32.mxu1 %vm266_vm3, %v215_v28 }
  0x50   : > { %434 = vmatmul.mubr.f32.gmra.mrb[20].mxu0 %v207_v29  ;;  %832 = vmatmul.mubr.msk.f32.gmra.mrb[20].mxu1 %vm266_vm3, %v218_v30 }
  0x51   : > { %438 = vmatprep.mubr.f32.mxu0 %v211_v31  ;;  %834 = vmatprep.mubr.msk.f32.mxu1 %vm266_vm3, %v221_v32 }
  0x54   : > { %439 = vmatmul.mubr.f32.gmra.mrb[22].mxu0 %v210_v33  ;;  %835 = vmatmul.mubr.msk.f32.gmra.mrb[22].mxu1 %vm266_vm3, %v224_v34 }
  0xfb   : > { %v743_v35 = vpop.f32.mrb[0].mxu0  ;;  %v779_v36 = vpop.f32.mrb[0].mxu1 }
  0xfc   : > { %v744_v37 = vpop.f32.mrb[1].mxu0  ;;  %v780_v38 = vpop.f32.mrb[1].mxu1 }
  0xfd   : > { %v745_v39 = vadd.f32 %v744_v37, %v743_v35  ;;  %v1112_v40 = vadd.f32 %v780_v38, %v779_v36 }
  0xff   : > { %v746_v41 = vpop.f32.mrb[2].mxu0  ;;  %v782_v42 = vpop.f32.mrb[2].mxu1  ;;  %v386_v63 = vadd.f32 %v745_v39, %v1122_v57 }
 0x100   : > { %v747_v43 = vpop.f32.mrb[3].mxu0  ;;  %v783_v44 = vpop.f32.mrb[3].mxu1 }
 0x101   : > { %v748_v45 = vadd.f32 %v747_v43, %v746_v41  ;;  %v1114_v46 = vadd.f32 %v783_v44, %v782_v42 }
 0x103   : > { %v749_v47 = vpop.f32.mrb[4].mxu0  ;;  %v785_v48 = vpop.f32.mrb[4].mxu1  ;;  %v391_v60 = vadd.f32 %v748_v45, %v1122_v57  ;;  %v451_v45 = vadd.f32 %v1114_v46, %v1122_v57 }
 0x104   : > { %v750_v49 = vpop.f32.mrb[5].mxu0  ;;  %v786_v50 = vpop.f32.mrb[5].mxu1 }
 0x105   : > { %v751_v51 = vadd.f32 %v750_v49, %v749_v47  ;;  %v1116_v52 = vadd.f32 %v786_v50, %v785_v48  ;;  %v446_v50 = vadd.f32 %v1112_v40, %v1122_v57 }
 0x107   : > { %v752_v53 = vpop.f32.mrb[6].mxu0  ;;  %v788_v54 = vpop.f32.mrb[6].mxu1  ;;  %v396_v8 = vadd.f32 %v751_v51, %v1122_v57 }
 0x108   : > { %v753_v55 = vpop.f32.mrb[7].mxu0  ;;  %v789_v56 = vpop.f32.mrb[7].mxu1 }
 0x109   : > { %v754_v58 = vadd.f32 %v753_v55, %v752_v53  ;;  %v1124_v59 = vadd.f32 %v789_v56, %v788_v54 }
 0x10b   : > { %v755_v61 = vpop.f32.mrb[8].mxu0  ;;  %v815_v62 = vpop.f32.mrb[8].mxu1  ;;  %v401_v5 = vadd.f32 %v754_v58, %v1122_v57  ;;  %v461_v46 = vadd.f32 %v1124_v59, %v1122_v57 }
 0x10c   : > { %v536_v0 = vadd.f32 %v815_v62, %v391_v60  ;;  %v756_v1 = vpop.f32.mrb[9].mxu0  ;;  %v530_v2 = vpop.f32.mrb[9].mxu1  ;;  %v456_v62 = vadd.f32 %v1116_v52, %v1122_v57 }
 0x10d   : > { %v757_v3 = vadd.f32 %v756_v1, %v755_v61  ;;  %v531_v4 = vadd.f32 %v530_v2, %v386_v63 }
 0x10e   : > { %611 = vst.msk [vmem:[%s1130_s16 + $0x8] sm:$0xff] %vm609_vm4, %v536_v0 }
 0x10f   : > { %610 = vst.msk [vmem:[%s1130_s16] sm:$0xff] %vm609_vm4, %v531_v4  ;;  %v758_v6 = vpop.f32.mrb[10].mxu0  ;;  %v818_v7 = vpop.f32.mrb[10].mxu1  ;;  %v406_v17 = vadd.f32 %v757_v3, %v1122_v57 }
 0x110   : > { %v546_v9 = vadd.f32 %v818_v7, %v401_v5  ;;  %v759_v10 = vpop.f32.mrb[11].mxu0  ;;  %v540_v11 = vpop.f32.mrb[11].mxu1 }
 0x111   : > { %v760_v12 = vadd.f32 %v759_v10, %v758_v6  ;;  %v541_v13 = vadd.f32 %v540_v11, %v396_v8 }
 0x112   : > { %613 = vst.msk [vmem:[%s1130_s16 + $0x18] sm:$0xff] %vm609_vm4, %v546_v9 }
 0x113   : > { %612 = vst.msk [vmem:[%s1130_s16 + $0x10] sm:$0xff] %vm609_vm4, %v541_v13  ;;  %v761_v14 = vpop.f32.mrb[12].mxu0  ;;  %v411_v15 = vadd.f32 %v760_v12, %v1122_v57  ;;  %v821_v16 = vpop.f32.mrb[12].mxu1 }
 0x114   : > { %v762_v18 = vpop.f32.mrb[13].mxu0  ;;  %v550_v19 = vpop.f32.mrb[13].mxu1 }
 0x115   : > { %v556_v20 = vadd.f32 %v821_v16, %v411_v15  ;;  %v763_v21 = vadd.f32 %v762_v18, %v761_v14  ;;  %v551_v22 = vadd.f32 %v550_v19, %v406_v17 }
 0x117   : > { %615 = vst.msk [vmem:[%s1130_s16 + $0x28] sm:$0xff] %vm609_vm4, %v556_v20  ;;  %614 = vst.msk [vmem:[%s1130_s16 + $0x20] sm:$0xff] %vm609_vm4, %v551_v22  ;;  %v764_v23 = vpop.f32.mrb[14].mxu0  ;;  %v824_v24 = vpop.f32.mrb[14].mxu1  ;;  %v416_v25 = vadd.f32 %v763_v21, %v1122_v57 }
 0x118   : > { %v765_v26 = vpop.f32.mrb[15].mxu0  ;;  %v560_v27 = vpop.f32.mrb[15].mxu1 }
 0x119   : > { %v766_v28 = vadd.f32 %v765_v26, %v764_v23  ;;  %v561_v29 = vadd.f32 %v560_v27, %v416_v25 }
 0x11b   : > { %v421_v30 = vadd.f32 %v766_v28, %v1122_v57  ;;  %616 = vst.msk [vmem:[%s1130_s16 + $0x30] sm:$0xff] %vm609_vm4, %v561_v29  ;;  %v767_v31 = vpop.f32.mrb[16].mxu0  ;;  %v827_v32 = vpop.f32.mrb[16].mxu1 }
 0x11c   : > { %v768_v33 = vpop.f32.mrb[17].mxu0  ;;  %v570_v34 = vpop.f32.mrb[17].mxu1 }
 0x11d   : > { %v566_v35 = vadd.f32 %v824_v24, %v421_v30  ;;  %v769_v36 = vadd.f32 %v768_v33, %v767_v31 }
 0x11f   : > { %617 = vst.msk [vmem:[%s1130_s16 + $0x38] sm:$0xff] %vm609_vm4, %v566_v35  ;;  %v770_v37 = vpop.f32.mrb[18].mxu0  ;;  %v426_v38 = vadd.f32 %v769_v36, %v1122_v57  ;;  %v830_v39 = vpop.f32.mrb[18].mxu1 }
 0x120   : > { %v771_v41 = vpop.f32.mrb[19].mxu0  ;;  %v580_v42 = vpop.f32.mrb[19].mxu1 }
 0x121   : > { %v571_v43 = vadd.f32 %v570_v34, %v426_v38  ;;  %v772_v44 = vadd.f32 %v771_v41, %v770_v37 }
 0x123   : > { %618 = vst.msk [vmem:[%s1130_s16 + $0x40] sm:$0xff] %vm609_vm4, %v571_v43  ;;  %v431_v47 = vadd.f32 %v772_v44, %v1122_v57  ;;  %v773_v48 = vpop.f32.mrb[20].mxu0  ;;  %v833_v49 = vpop.f32.mrb[20].mxu1 }
 0x124   : > { %v596_v51 = vadd.f32 %v833_v49, %v451_v45  ;;  %v774_v53 = vpop.f32.mrb[21].mxu0  ;;  %v590_v54 = vpop.f32.mrb[21].mxu1 }
 0x125   : > { %v576_v55 = vadd.f32 %v827_v32, %v431_v47  ;;  %v775_v56 = vadd.f32 %v774_v53, %v773_v48  ;;  %v591_v58 = vadd.f32 %v590_v54, %v446_v50 }
 0x126   : > { %623 = vst.msk [vmem:[%s1130_s16 + $0x68] sm:$0xff] %vm609_vm4, %v596_v51 }
 0x127   : > { %619 = vst.msk [vmem:[%s1130_s16 + $0x48] sm:$0xff] %vm609_vm4, %v576_v55  ;;  %v436_v60 = vadd.f32 %v775_v56, %v1122_v57  ;;  %622 = vst.msk [vmem:[%s1130_s16 + $0x60] sm:$0xff] %vm609_vm4, %v591_v58  ;;  %v776_v40 = vpop.f32.mrb[22].mxu0  ;;  %v836_v61 = vpop.f32.mrb[22].mxu1 }
 0x128   : > { %v606_v63 = vadd.f32 %v836_v61, %v461_v46  ;;  %v777_v0 = vpop.f32.mrb[23].mxu0  ;;  %v600_v1 = vpop.f32.mrb[23].mxu1 }
 0x129   : > { %v581_v2 = vadd.f32 %v580_v42, %v436_v60  ;;  %v778_v3 = vadd.f32 %v777_v0, %v776_v40  ;;  %v601_v4 = vadd.f32 %v600_v1, %v456_v62 }
 0x12a   : > { %625 = vst.msk [vmem:[%s1130_s16 + $0x78] sm:$0xff] %vm609_vm4, %v606_v63 }
 0x12b   : > { %620 = vst.msk [vmem:[%s1130_s16 + $0x50] sm:$0xff] %vm609_vm4, %v581_v2  ;;  %v441_v59 = vadd.f32 %v778_v3, %v1122_v57  ;;  %624 = vst.msk [vmem:[%s1130_s16 + $0x70] sm:$0xff] %vm609_vm4, %v601_v4 }
 0x12d   : > { %v586_v5 = vadd.f32 %v830_v39, %v441_v59 }
 0x12f   : > { %621 = vst.msk [vmem:[%s1130_s16 + $0x58] sm:$0xff] %vm609_vm4, %v586_v5 }
 0x130 PF: > { %s13_s12 = sadd.s32 1, %s907_s12  }
 0x131   : > { %p10_p4 = scmp.ge.s32.totalorder %s13_s12, 6  }
 0x133   :  { %12 = sbr.rel (!%p10_p4) target bundleno = 1 (0x1), region = 62 }

// kernel: skip_capsule_forward.22
= control target key start
LH: loop header
LB: loop body
LE: loop exit
PB: predicated region body
PF: predicated region fallthrough
CT: control target
= control target key end

     0   :  { %s590_s12 = smov 0   ;;  %s673_s0 = inlined_call_operand.vmem [shape: f32[512,12], index: 0, kind: input, shape index: {}]   ;;  %s674_s1 = inlined_call_operand.vmem [shape: f32[12,12], index: 1, kind: input, shape index: {}]   ;;  %s675_s2 = inlined_call_operand.vmem [shape: f32[1,12], index: 2, kind: input, shape index: {}]   ;;  %s676_s3 = inlined_call_operand.vmem [shape: f32[512,12], index: 3, kind: output, shape index: {}]  }
   0x1 LB: > { %s469_s13 = sadd.s32 4294967295, %s567_s12   ;;  %p473_p0 = scmp.ge.s32.totalorder %s567_s12, 1  ;;  %s567_s12 = sphi %s590_s12, %s13_s12  }
   0x2   : > { %p138_p1 = scmp.lt.s32.totalorder %s567_s12, 5 }
   0x4   : > { %p139_p2 = pnand %p473_p0, %p138_p1 }
   0x5   : > { %v190_v0 = vld [vmem:[%s674_s1] sm:$0xff] (!%p139_p2)  ;;  %v191_v1 = vld [vmem:[%s674_s1 + $0x8] sm:$0xf] (!%p139_p2)  ;;  %vm248_vm0 = vcmask (!%p139_p2), 1043456   ;;  %s474_s18 = sshll.u32 (!%p139_p2), %s469_s13, 4  ;;  %vm569_vm1 = vmmov (!%p139_p2), 1  }
   0x6   : > { %142 = sbr.rel (%p139_p2) target bundleno = 247 (0xf7), region = 32  ;;  %v544_v2 = vpack.c.bf16 (!%p139_p2), %v191_v1, %v190_v0  ;;  %vm545_vm2 = vmpackc.low (!%p139_p2), %vm248_vm0, %vm569_vm1  ;;  %p163_p3 = scmp.lt.s32.totalorder (!%p139_p2), %s474_s18, 63  ;;  %vm199_vm3 = vcmask (!%p139_p2), 97280   ;;  %v478_v19 = vld [vmem:[%s675_s2] ss:$0 sm:$0xff] (!%p139_p2) }
   0x8   : > { %546 = vmatprep.subr.msk.bf16.mxu0 (!%p139_p2), %vm545_vm2, %v544_v2  ;;  %550 = vmatprep.subr.msk.bf16.mxu1 (!%p139_p2), %vm545_vm2, %v544_v2 }
   0x9   : > { %549 = vmatpush3.bf16.msk.msra.mxu0 (!%p139_p2), %vm545_vm2, %v544_v2  ;;  %551 = vmatpush3.bf16.msk.msra.mxu1 (!%p139_p2), %vm545_vm2, %v544_v2 }
   0xd   : > { %s678_s18 = smov (!%p163_p3, %s474_s18), 63 }
   0xe   : > { %s475_s19 = sshll.u32 %s678_s18, 3 }
   0xf   : > { %s166_s22 = scalar_lea.vmem %s673_s0, %s475_s19  ;;  %s636_s27 = scalar_lea.vmem %s676_s3, %s475_s19 }
  0x10   : > { %v174_v3 = vld [vmem:[%s166_s22] sm:$0xff]  ;;  %v175_v5 = vld [vmem:[%s166_s22 + $0x8] sm:$0xff]  ;;  %v176_v7 = vld [vmem:[%s166_s22 + $0x10] sm:$0xff] }
  0x11   : > { %v182_v4 = vld [vmem:[%s166_s22 + $0x40] sm:$0xff]  ;;  %520 = vmatprep.mubr.msk.f32.mxu0 %vm199_vm3, %v174_v3  ;;  %v183_v6 = vld [vmem:[%s166_s22 + $0x48] sm:$0xff]  ;;  %v184_v8 = vld [vmem:[%s166_s22 + $0x50] sm:$0xff] }
  0x12   : > { %532 = vmatprep.mubr.msk.f32.mxu1 %vm199_vm3, %v182_v4  ;;  %521 = vmatmul.mubr.msk.f32.vlgmr.msra.gmra.mrb[0].mxu0 %vm199_vm3, %v175_v5  ;;  %v177_v9 = vld [vmem:[%s166_s22 + $0x18] sm:$0xff]  ;;  %v178_v11 = vld [vmem:[%s166_s22 + $0x20] sm:$0xff]  ;;  %v179_v13 = vld [vmem:[%s166_s22 + $0x28] sm:$0xff] }
  0x13   : > { %533 = vmatmul.mubr.msk.f32.vlgmr.msra.gmra.mrb[0].mxu1 %vm199_vm3, %v183_v6  ;;  %523 = vmatprep.mubr.msk.f32.mxu0 %vm199_vm3, %v176_v7  ;;  %v185_v10 = vld [vmem:[%s166_s22 + $0x58] sm:$0xff]  ;;  %v186_v12 = vld [vmem:[%s166_s22 + $0x60] sm:$0xff]  ;;  %v187_v14 = vld [vmem:[%s166_s22 + $0x68] sm:$0xff] }
  0x14   : > { %535 = vmatprep.mubr.msk.f32.mxu1 %vm199_vm3, %v184_v8  ;;  %v180_v15 = vld [vmem:[%s166_s22 + $0x30] sm:$0xff]  ;;  %v181_v17 = vld [vmem:[%s166_s22 + $0x38] sm:$0xff] }
  0x15   : > { %v188_v16 = vld [vmem:[%s166_s22 + $0x70] sm:$0xff]  ;;  %v189_v18 = vld [vmem:[%s166_s22 + $0x78] sm:$0xff] }
  0x16   : > { %524 = vmatmul.mubr.msk.f32.gmra.mrb[2].mxu0 %vm199_vm3, %v177_v9 }
  0x17   : > { %536 = vmatmul.mubr.msk.f32.gmra.mrb[2].mxu1 %vm199_vm3, %v185_v10  ;;  %526 = vmatprep.mubr.msk.f32.mxu0 %vm199_vm3, %v178_v11 }
  0x18   : > { %538 = vmatprep.mubr.msk.f32.mxu1 %vm199_vm3, %v186_v12 }
  0x1a   : > { %527 = vmatmul.mubr.msk.f32.gmra.mrb[4].mxu0 %vm199_vm3, %v179_v13 }
  0x1b   : > { %539 = vmatmul.mubr.msk.f32.gmra.mrb[4].mxu1 %vm199_vm3, %v187_v14  ;;  %529 = vmatprep.mubr.msk.f32.mxu0 %vm199_vm3, %v180_v15 }
  0x1c   : > { %541 = vmatprep.mubr.msk.f32.mxu1 %vm199_vm3, %v188_v16 }
  0x1e   : > { %530 = vmatmul.mubr.msk.f32.gmra.mrb[6].mxu0 %vm199_vm3, %v181_v17 }
  0x1f   : > { %542 = vmatmul.mubr.msk.f32.gmra.mrb[6].mxu1 %vm199_vm3, %v189_v18 }
  0xe5   : > { %v522_v20 = vpop.f32.mrb[0].mxu0 }
  0xe6   : > { %v534_v21 = vpop.f32.mrb[0].mxu1  ;;  %v324_v22 = vadd.f32 %v522_v20, %v478_v19  ;;  %v318_v24 = vpop.f32.mrb[1].mxu0 }
  0xe7   : > { %v364_v23 = vadd.f32 %v534_v21, %v478_v19  ;;  %v358_v25 = vpop.f32.mrb[1].mxu1  ;;  %v319_v26 = vadd.f32 %v478_v19, %v318_v24 }
  0xe8   : > { %v359_v27 = vadd.f32 %v478_v19, %v358_v25  ;;  %398 = vst.msk [vmem:[%s636_s27 + $0x8] sm:$0xff] %vm199_vm3, %v324_v22 }
  0xe9   : > { %406 = vst.msk [vmem:[%s636_s27 + $0x48] sm:$0xff] %vm199_vm3, %v364_v23  ;;  %397 = vst.msk [vmem:[%s636_s27] sm:$0xff] %vm199_vm3, %v319_v26  ;;  %v525_v28 = vpop.f32.mrb[2].mxu0 }
  0xea   : > { %405 = vst.msk [vmem:[%s636_s27 + $0x40] sm:$0xff] %vm199_vm3, %v359_v27  ;;  %v537_v29 = vpop.f32.mrb[2].mxu1  ;;  %v334_v30 = vadd.f32 %v525_v28, %v478_v19  ;;  %v328_v32 = vpop.f32.mrb[3].mxu0 }
  0xeb   : > { %v374_v31 = vadd.f32 %v537_v29, %v478_v19  ;;  %v368_v33 = vpop.f32.mrb[3].mxu1  ;;  %v329_v34 = vadd.f32 %v478_v19, %v328_v32 }
  0xec   : > { %v369_v35 = vadd.f32 %v478_v19, %v368_v33  ;;  %400 = vst.msk [vmem:[%s636_s27 + $0x18] sm:$0xff] %vm199_vm3, %v334_v30 }
  0xed   : > { %408 = vst.msk [vmem:[%s636_s27 + $0x58] sm:$0xff] %vm199_vm3, %v374_v31  ;;  %399 = vst.msk [vmem:[%s636_s27 + $0x10] sm:$0xff] %vm199_vm3, %v329_v34  ;;  %v528_v36 = vpop.f32.mrb[4].mxu0 }
  0xee   : > { %407 = vst.msk [vmem:[%s636_s27 + $0x50] sm:$0xff] %vm199_vm3, %v369_v35  ;;  %v540_v37 = vpop.f32.mrb[4].mxu1  ;;  %v344_v38 = vadd.f32 %v528_v36, %v478_v19  ;;  %v338_v40 = vpop.f32.mrb[5].mxu0 }
  0xef   : > { %v384_v39 = vadd.f32 %v540_v37, %v478_v19  ;;  %v378_v41 = vpop.f32.mrb[5].mxu1  ;;  %v339_v42 = vadd.f32 %v478_v19, %v338_v40 }
  0xf0   : > { %v379_v43 = vadd.f32 %v478_v19, %v378_v41  ;;  %402 = vst.msk [vmem:[%s636_s27 + $0x28] sm:$0xff] %vm199_vm3, %v344_v38 }
  0xf1   : > { %410 = vst.msk [vmem:[%s636_s27 + $0x68] sm:$0xff] %vm199_vm3, %v384_v39  ;;  %401 = vst.msk [vmem:[%s636_s27 + $0x20] sm:$0xff] %vm199_vm3, %v339_v42  ;;  %v531_v44 = vpop.f32.mrb[6].mxu0 }
  0xf2   : > { %409 = vst.msk [vmem:[%s636_s27 + $0x60] sm:$0xff] %vm199_vm3, %v379_v43  ;;  %v543_v45 = vpop.f32.mrb[6].mxu1  ;;  %v354_v46 = vadd.f32 %v531_v44, %v478_v19  ;;  %v348_v48 = vpop.f32.mrb[7].mxu0 }
  0xf3   : > { %v394_v47 = vadd.f32 %v543_v45, %v478_v19  ;;  %v388_v49 = vpop.f32.mrb[7].mxu1  ;;  %v349_v50 = vadd.f32 %v478_v19, %v348_v48 }
  0xf4   : > { %v389_v51 = vadd.f32 %v478_v19, %v388_v49  ;;  %404 = vst.msk [vmem:[%s636_s27 + $0x38] sm:$0xff] %vm199_vm3, %v354_v46 }
  0xf5   : > { %412 = vst.msk [vmem:[%s636_s27 + $0x78] sm:$0xff] %vm199_vm3, %v394_v47  ;;  %403 = vst.msk [vmem:[%s636_s27 + $0x30] sm:$0xff] %vm199_vm3, %v349_v50 }
  0xf6   : > { %411 = vst.msk [vmem:[%s636_s27 + $0x70] sm:$0xff] %vm199_vm3, %v389_v51 }
  0xf7 PF: > { %s13_s12 = sadd.s32 1, %s567_s12  }
  0xf8   : > { %p10_p4 = scmp.ge.s32.totalorder %s13_s12, 6  }
  0xfa   :  { %12 = sbr.rel (!%p10_p4) target bundleno = 1 (0x1), region = 62 }

// kernel: skip_capsule_forward.23
= control target key start
LH: loop header
LB: loop body
LE: loop exit
PB: predicated region body
PF: predicated region fallthrough
CT: control target
= control target key end

     0   :  { %s591_s12 = smov 0   ;;  %s674_s0 = inlined_call_operand.vmem [shape: f32[512,12], index: 0, kind: input, shape index: {}]   ;;  %s675_s1 = inlined_call_operand.vmem [shape: f32[12,2], index: 1, kind: input, shape index: {}]   ;;  %s676_s2 = inlined_call_operand.vmem [shape: f32[1,2], index: 2, kind: input, shape index: {}]   ;;  %s677_s3 = inlined_call_operand.vmem [shape: f32[512,2], index: 3, kind: output, shape index: {}]  }
   0x1 LB: > { %s470_s13 = sadd.s32 4294967295, %s568_s12   ;;  %p474_p0 = scmp.ge.s32.totalorder %s568_s12, 1  ;;  %s568_s12 = sphi %s591_s12, %s13_s12  }
   0x2   : > { %p138_p1 = scmp.lt.s32.totalorder %s568_s12, 5 }
   0x4   : > { %p139_p2 = pnand %p474_p0, %p138_p1 }
   0x5   : > { %v190_v0 = vld [vmem:[%s675_s1] sm:$0xff] (!%p139_p2)  ;;  %v191_v1 = vld [vmem:[%s675_s1 + $0x8] sm:$0xf] (!%p139_p2)  ;;  %vm248_vm0 = vcmask (!%p139_p2), 1043456   ;;  %s475_s18 = sshll.u32 (!%p139_p2), %s470_s13, 4  ;;  %vm570_vm1 = vmmov (!%p139_p2), 1  }
   0x6   : > { %142 = sbr.rel (%p139_p2) target bundleno = 247 (0xf7), region = 32  ;;  %v545_v2 = vpack.c.bf16 (!%p139_p2), %v191_v1, %v190_v0  ;;  %vm546_vm2 = vmpackc.low (!%p139_p2), %vm248_vm0, %vm570_vm1  ;;  %p163_p3 = scmp.lt.s32.totalorder (!%p139_p2), %s475_s18, 63  ;;  %vm199_vm3 = vcmask (!%p139_p2), 97280   ;;  %v479_v19 = vld [vmem:[%s676_s2] ss:$0 sm:$0xff] (!%p139_p2)  ;;  %vm397_vm4 = vcmask (!%p139_p2), 15360  }
   0x8   : > { %547 = vmatprep.subr.msk.bf16.mxu0 (!%p139_p2), %vm546_vm2, %v545_v2  ;;  %551 = vmatprep.subr.msk.bf16.mxu1 (!%p139_p2), %vm546_vm2, %v545_v2 }
   0x9   : > { %550 = vmatpush3.bf16.msk.msra.mxu0 (!%p139_p2), %vm546_vm2, %v545_v2  ;;  %552 = vmatpush3.bf16.msk.msra.mxu1 (!%p139_p2), %vm546_vm2, %v545_v2 }
   0xd   : > { %s679_s18 = smov (!%p163_p3, %s475_s18), 63 }
   0xe   : > { %s476_s19 = sshll.u32 %s679_s18, 3 }
   0xf   : > { %s166_s22 = scalar_lea.vmem %s674_s0, %s476_s19  ;;  %s637_s27 = scalar_lea.vmem %s677_s3, %s476_s19 }
  0x10   : > { %v174_v3 = vld [vmem:[%s166_s22] sm:$0xff]  ;;  %v175_v5 = vld [vmem:[%s166_s22 + $0x8] sm:$0xff]  ;;  %v176_v7 = vld [vmem:[%s166_s22 + $0x10] sm:$0xff] }
  0x11   : > { %v182_v4 = vld [vmem:[%s166_s22 + $0x40] sm:$0xff]  ;;  %521 = vmatprep.mubr.msk.f32.mxu0 %vm199_vm3, %v174_v3  ;;  %v183_v6 = vld [vmem:[%s166_s22 + $0x48] sm:$0xff]  ;;  %v184_v8 = vld [vmem:[%s166_s22 + $0x50] sm:$0xff] }
  0x12   : > { %533 = vmatprep.mubr.msk.f32.mxu1 %vm199_vm3, %v182_v4  ;;  %522 = vmatmul.mubr.msk.f32.vlgmr.msra.gmra.mrb[0].mxu0 %vm199_vm3, %v175_v5  ;;  %v177_v9 = vld [vmem:[%s166_s22 + $0x18] sm:$0xff]  ;;  %v178_v11 = vld [vmem:[%s166_s22 + $0x20] sm:$0xff]  ;;  %v179_v13 = vld [vmem:[%s166_s22 + $0x28] sm:$0xff] }
  0x13   : > { %534 = vmatmul.mubr.msk.f32.vlgmr.msra.gmra.mrb[0].mxu1 %vm199_vm3, %v183_v6  ;;  %524 = vmatprep.mubr.msk.f32.mxu0 %vm199_vm3, %v176_v7  ;;  %v185_v10 = vld [vmem:[%s166_s22 + $0x58] sm:$0xff]  ;;  %v186_v12 = vld [vmem:[%s166_s22 + $0x60] sm:$0xff]  ;;  %v187_v14 = vld [vmem:[%s166_s22 + $0x68] sm:$0xff] }
  0x14   : > { %536 = vmatprep.mubr.msk.f32.mxu1 %vm199_vm3, %v184_v8  ;;  %v180_v15 = vld [vmem:[%s166_s22 + $0x30] sm:$0xff]  ;;  %v181_v17 = vld [vmem:[%s166_s22 + $0x38] sm:$0xff] }
  0x15   : > { %v188_v16 = vld [vmem:[%s166_s22 + $0x70] sm:$0xff]  ;;  %v189_v18 = vld [vmem:[%s166_s22 + $0x78] sm:$0xff] }
  0x16   : > { %525 = vmatmul.mubr.msk.f32.gmra.mrb[2].mxu0 %vm199_vm3, %v177_v9 }
  0x17   : > { %537 = vmatmul.mubr.msk.f32.gmra.mrb[2].mxu1 %vm199_vm3, %v185_v10  ;;  %527 = vmatprep.mubr.msk.f32.mxu0 %vm199_vm3, %v178_v11 }
  0x18   : > { %539 = vmatprep.mubr.msk.f32.mxu1 %vm199_vm3, %v186_v12 }
  0x1a   : > { %528 = vmatmul.mubr.msk.f32.gmra.mrb[4].mxu0 %vm199_vm3, %v179_v13 }
  0x1b   : > { %540 = vmatmul.mubr.msk.f32.gmra.mrb[4].mxu1 %vm199_vm3, %v187_v14  ;;  %530 = vmatprep.mubr.msk.f32.mxu0 %vm199_vm3, %v180_v15 }
  0x1c   : > { %542 = vmatprep.mubr.msk.f32.mxu1 %vm199_vm3, %v188_v16 }
  0x1e   : > { %531 = vmatmul.mubr.msk.f32.gmra.mrb[6].mxu0 %vm199_vm3, %v181_v17 }
  0x1f   : > { %543 = vmatmul.mubr.msk.f32.gmra.mrb[6].mxu1 %vm199_vm3, %v189_v18 }
  0xe5   : > { %v523_v20 = vpop.f32.mrb[0].mxu0 }
  0xe6   : > { %v535_v21 = vpop.f32.mrb[0].mxu1  ;;  %v324_v22 = vadd.f32 %v523_v20, %v479_v19  ;;  %v318_v24 = vpop.f32.mrb[1].mxu0 }
  0xe7   : > { %v364_v23 = vadd.f32 %v535_v21, %v479_v19  ;;  %v358_v25 = vpop.f32.mrb[1].mxu1  ;;  %v319_v26 = vadd.f32 %v479_v19, %v318_v24 }
  0xe8   : > { %v359_v27 = vadd.f32 %v479_v19, %v358_v25  ;;  %399 = vst.msk [vmem:[%s637_s27 + $0x8] sm:$0xff] %vm397_vm4, %v324_v22 }
  0xe9   : > { %407 = vst.msk [vmem:[%s637_s27 + $0x48] sm:$0xff] %vm397_vm4, %v364_v23  ;;  %398 = vst.msk [vmem:[%s637_s27] sm:$0xff] %vm397_vm4, %v319_v26  ;;  %v526_v28 = vpop.f32.mrb[2].mxu0 }
  0xea   : > { %406 = vst.msk [vmem:[%s637_s27 + $0x40] sm:$0xff] %vm397_vm4, %v359_v27  ;;  %v538_v29 = vpop.f32.mrb[2].mxu1  ;;  %v334_v30 = vadd.f32 %v526_v28, %v479_v19  ;;  %v328_v32 = vpop.f32.mrb[3].mxu0 }
  0xeb   : > { %v374_v31 = vadd.f32 %v538_v29, %v479_v19  ;;  %v368_v33 = vpop.f32.mrb[3].mxu1  ;;  %v329_v34 = vadd.f32 %v479_v19, %v328_v32 }
  0xec   : > { %v369_v35 = vadd.f32 %v479_v19, %v368_v33  ;;  %401 = vst.msk [vmem:[%s637_s27 + $0x18] sm:$0xff] %vm397_vm4, %v334_v30 }
  0xed   : > { %409 = vst.msk [vmem:[%s637_s27 + $0x58] sm:$0xff] %vm397_vm4, %v374_v31  ;;  %400 = vst.msk [vmem:[%s637_s27 + $0x10] sm:$0xff] %vm397_vm4, %v329_v34  ;;  %v529_v36 = vpop.f32.mrb[4].mxu0 }
  0xee   : > { %408 = vst.msk [vmem:[%s637_s27 + $0x50] sm:$0xff] %vm397_vm4, %v369_v35  ;;  %v541_v37 = vpop.f32.mrb[4].mxu1  ;;  %v344_v38 = vadd.f32 %v529_v36, %v479_v19  ;;  %v338_v40 = vpop.f32.mrb[5].mxu0 }
  0xef   : > { %v384_v39 = vadd.f32 %v541_v37, %v479_v19  ;;  %v378_v41 = vpop.f32.mrb[5].mxu1  ;;  %v339_v42 = vadd.f32 %v479_v19, %v338_v40 }
  0xf0   : > { %v379_v43 = vadd.f32 %v479_v19, %v378_v41  ;;  %403 = vst.msk [vmem:[%s637_s27 + $0x28] sm:$0xff] %vm397_vm4, %v344_v38 }
  0xf1   : > { %411 = vst.msk [vmem:[%s637_s27 + $0x68] sm:$0xff] %vm397_vm4, %v384_v39  ;;  %402 = vst.msk [vmem:[%s637_s27 + $0x20] sm:$0xff] %vm397_vm4, %v339_v42  ;;  %v532_v44 = vpop.f32.mrb[6].mxu0 }
  0xf2   : > { %410 = vst.msk [vmem:[%s637_s27 + $0x60] sm:$0xff] %vm397_vm4, %v379_v43  ;;  %v544_v45 = vpop.f32.mrb[6].mxu1  ;;  %v354_v46 = vadd.f32 %v532_v44, %v479_v19  ;;  %v348_v48 = vpop.f32.mrb[7].mxu0 }
  0xf3   : > { %v394_v47 = vadd.f32 %v544_v45, %v479_v19  ;;  %v388_v49 = vpop.f32.mrb[7].mxu1  ;;  %v349_v50 = vadd.f32 %v479_v19, %v348_v48 }
  0xf4   : > { %v389_v51 = vadd.f32 %v479_v19, %v388_v49  ;;  %405 = vst.msk [vmem:[%s637_s27 + $0x38] sm:$0xff] %vm397_vm4, %v354_v46 }
  0xf5   : > { %413 = vst.msk [vmem:[%s637_s27 + $0x78] sm:$0xff] %vm397_vm4, %v394_v47  ;;  %404 = vst.msk [vmem:[%s637_s27 + $0x30] sm:$0xff] %vm397_vm4, %v349_v50 }
  0xf6   : > { %412 = vst.msk [vmem:[%s637_s27 + $0x70] sm:$0xff] %vm397_vm4, %v389_v51 }
  0xf7 PF: > { %s13_s12 = sadd.s32 1, %s568_s12  }
  0xf8   : > { %p10_p4 = scmp.ge.s32.totalorder %s13_s12, 6  }
  0xfa   :  { %12 = sbr.rel (!%p10_p4) target bundleno = 1 (0x1), region = 62 }

</bundles_post_ra>
